<compile_context>
chip_gen: v6e
topology: v6e:2x2x1
jax: 0.10.0
libtpu: 0.0.40
codegen_flags: <defaults>
</compile_context>

<pallas_src>
import functools

import jax
import jax.numpy as jnp
import numpy as np
from jax.experimental import pallas as pl
from jax.experimental.pallas import tpu as pltpu

LN_EPS = 1e-5


# --------------------------------------------------------------------------
# Pallas kernel: full 2-layer encoder over the flattened (T=S*N, E) slab.
# --------------------------------------------------------------------------
def _ln(h, w, b):
    mu = jnp.mean(h, axis=-1, keepdims=True)
    d = h - mu
    var = jnp.mean(d * d, axis=-1, keepdims=True)
    return d * jax.lax.rsqrt(var + LN_EPS) * w + b


def object_encoder_kernel(
    x_ref,      # (T, E)        f32   flattened activations
    wqkv_ref,   # (L, E, 3E)    bf16  merged q|k|v projection (scale folded in q)
    bqkv_ref,   # (L, 1, 3E)    f32   merged q|k|v bias (scale folded in q)
    wo_ref,     # (L, E, E)     bf16  out projection
    w1_ref,     # (L, E, H)     bf16
    w2_ref,     # (L, H, E)     bf16
    vec_ref,    # (L, 7, H)     f32   packed bo,b1,b2,ln1w,ln1b,ln2w,ln2b
    o_ref,      # (T, E)        f32
    *,
    num_heads: int,
    num_layers: int,
    batch: int,
):
    T, E = x_ref.shape
    nh = num_heads
    dh = E // nh
    neg = jnp.float32(-1e30)          # f32-safe mask value (scores stay f32)

    # Block-diagonal batch mask: flattened row r belongs to batch r % batch.
    rb = jax.lax.broadcasted_iota(jnp.int32, (T, T), 0) % batch
    cb = jax.lax.broadcasted_iota(jnp.int32, (T, T), 1) % batch
    mask = rb == cb                                   # (T, T) bool

    x = x_ref[...]                                    # (T, E) f32
    for l in range(num_layers):                       # static unroll (L=2)
        vl = vec_ref[l]                               # (7, H) f32
        bo = vl[0:1, :E]
        b1 = vl[1:2, :]
        b2 = vl[2:3, :E]
        g1, be1 = vl[3:4, :E], vl[4:5, :E]
        g2, be2 = vl[5:6, :E], vl[6:7, :E]

        # ---- merged QKV projection: one lane-dense (T,E)@(E,3E) matmul ----
        qkv = jnp.dot(x.astype(jnp.bfloat16), wqkv_ref[l],
                      preferred_element_type=jnp.float32) + bqkv_ref[l]   # (T, 3E)

        # ---- per-head attention (tiny T x T score blocks), heads sliced ---
        ctx = []
        for h in range(nh):                           # static unroll (nh=8)
            qh = qkv[:, h * dh:(h + 1) * dh].astype(jnp.bfloat16)
            kh = qkv[:, E + h * dh:E + (h + 1) * dh].astype(jnp.bfloat16)
            vh = qkv[:, 2 * E + h * dh:2 * E + (h + 1) * dh].astype(jnp.bfloat16)
            s = jax.lax.dot_general(qh, kh, (((1,), (1,)), ((), ())),
                                    preferred_element_type=jnp.float32)   # (T, T)
            s = jnp.where(mask, s, neg)
            s = s - jnp.max(s, axis=-1, keepdims=True)
            p = jnp.exp(s)
            p = p * pl.reciprocal(jnp.sum(p, axis=-1, keepdims=True), approx=False)
            ctx.append(jnp.dot(p.astype(jnp.bfloat16), vh,
                               preferred_element_type=jnp.float32))        # (T, dh)
        ctx = jnp.concatenate(ctx, axis=-1)            # (T, E), head-major lanes

        # ---- fused out-projection + head reduction: one K=E matmul --------
        attn = jnp.dot(ctx.astype(jnp.bfloat16), wo_ref[l],
                       preferred_element_type=jnp.float32) + bo            # (T, E)

        # ---- residual + LayerNorm 1 (post-norm) ---------------------------
        h1 = _ln(x + attn, g1, be1)

        # ---- feed-forward (relu) ------------------------------------------
        f = jnp.dot(h1.astype(jnp.bfloat16), w1_ref[l],
                    preferred_element_type=jnp.float32) + b1
        f = jnp.maximum(f, 0.0)
        f = jnp.dot(f.astype(jnp.bfloat16), w2_ref[l],
                    preferred_element_type=jnp.float32) + b2

        # ---- residual + LayerNorm 2 ---------------------------------------
        x = _ln(h1 + f, g2, be2)

    o_ref[...] = x


# --------------------------------------------------------------------------
# Wrapper: single pallas_call, everything resident in VMEM, one grid step.
# --------------------------------------------------------------------------
def _full_spec(shape):
    nd = len(shape)
    return pl.BlockSpec(shape, lambda i, _nd=nd: (0,) * _nd)


def object_encoder_forward(x_sne, packed, *, num_heads):
    """x_sne: (S, N, E) f32 (PyTorch seq-first layout). Returns (S, N, E)."""
    S, N, E = x_sne.shape
    T = S * N
    L = packed["wqkv"].shape[0]
    x2d = x_sne.reshape(T, E)                 # free reshape; row r -> batch r % N

    kernel = functools.partial(object_encoder_kernel,
                               num_heads=num_heads, num_layers=L, batch=N)

    out = pl.pallas_call(
        kernel,
        out_shape=jax.ShapeDtypeStruct((T, E), jnp.float32),
        grid=(1,),
        in_specs=[
            _full_spec((T, E)),
            _full_spec(packed["wqkv"].shape),
            _full_spec(packed["bqkv"].shape),
            _full_spec(packed["wo"].shape),
            _full_spec(packed["w1"].shape),
            _full_spec(packed["w2"].shape),
            _full_spec(packed["vec"].shape),
        ],
        out_specs=_full_spec((T, E)),
        compiler_params=pltpu.CompilerParams(
            dimension_semantics=("arbitrary",)),
    )(x2d, packed["wqkv"], packed["bqkv"], packed["wo"],
      packed["w1"], packed["w2"], packed["vec"])

    return out.reshape(S, N, E)


# --------------------------------------------------------------------------
# Parameter construction (PyTorch conventions) + packing for the kernel.
# --------------------------------------------------------------------------
def make_raw_layer_params(key, E, H):
    ks = jax.random.split(key, 8)
    se, sh = 1.0 / np.sqrt(E), 1.0 / np.sqrt(H)
    return {
        "in_proj_weight": jax.random.normal(ks[0], (3 * E, E), jnp.float32) * se,
        "in_proj_bias":   jax.random.normal(ks[1], (3 * E,), jnp.float32) * 0.02,
        "out_proj_w":     jax.random.normal(ks[2], (E, E), jnp.float32) * se,
        "out_proj_b":     jax.random.normal(ks[3], (E,), jnp.float32) * 0.02,
        "linear1_w":      jax.random.normal(ks[4], (H, E), jnp.float32) * se,
        "linear1_b":      jax.random.normal(ks[5], (H,), jnp.float32) * 0.02,
        "linear2_w":      jax.random.normal(ks[6], (E, H), jnp.float32) * sh,
        "linear2_b":      jax.random.normal(ks[7], (E,), jnp.float32) * 0.02,
        "ln1_w": jnp.ones((E,), jnp.float32), "ln1_b": jnp.zeros((E,), jnp.float32),
        "ln2_w": jnp.ones((E,), jnp.float32), "ln2_b": jnp.zeros((E,), jnp.float32),
    }


def pack_params(raw_layers, num_heads):
    E = raw_layers[0]["in_proj_weight"].shape[1]
    H = raw_layers[0]["linear1_w"].shape[0]
    assert H >= E, "vec packing assumes dim_feedforward >= d_model"
    dh = E // num_heads
    scale = 1.0 / float(np.sqrt(dh))

    wqkv, bqkv, wo, w1, w2, vec = [], [], [], [], [], []
    for p in raw_layers:
        Wt = p["in_proj_weight"].T                      # (E, 3E), cols [q | k | v]
        bv = p["in_proj_bias"]                          # (3E,)
        # Fold 1/sqrt(dh) into the Q columns and the Q bias (PyTorch scales q
        # after the in-projection, so scale both weight and bias).
        Wt = jnp.concatenate([Wt[:, :E] * scale, Wt[:, E:]], axis=1)
        bv = jnp.concatenate([bv[:E] * scale, bv[E:]])
        wqkv.append(Wt.astype(jnp.bfloat16))                          # (E, 3E)
        bqkv.append(bv.reshape(1, 3 * E).astype(jnp.float32))         # (1, 3E)
        wo.append(p["out_proj_w"].T.astype(jnp.bfloat16))             # (E, E)
        w1.append(p["linear1_w"].T.astype(jnp.bfloat16))              # (E, H)
        w2.append(p["linear2_w"].T.astype(jnp.bfloat16))              # (H, E)

        pad = jnp.zeros((H - E,), jnp.float32)
        padE = lambda v: jnp.concatenate([v.astype(jnp.float32), pad])
        vec.append(jnp.stack([
            padE(p["out_proj_b"]),                 # 0: bo
            p["linear1_b"].astype(jnp.float32),    # 1: b1 (full H width)
            padE(p["linear2_b"]),                  # 2: b2
            padE(p["ln1_w"]), padE(p["ln1_b"]),    # 3, 4
            padE(p["ln2_w"]), padE(p["ln2_b"]),    # 5, 6
        ]))

    return {
        "wqkv": jnp.stack(wqkv),           # (L, E, 3E)  bf16
        "bqkv": jnp.stack(bqkv),           # (L, 1, 3E)  f32
        "wo":   jnp.stack(wo),             # (L, E, E)   bf16
        "w1":   jnp.stack(w1),             # (L, E, H)   bf16
        "w2":   jnp.stack(w2),             # (L, H, E)   bf16
        "vec":  jnp.stack(vec),            # (L, 7, H)   f32
    }


# --------------------------------------------------------------------------
# Pure-JAX f32 reference (mirrors PyTorch TransformerEncoderLayer, eval mode)
# --------------------------------------------------------------------------
def _ln_ref(h, w, b):
    mu = jnp.mean(h, axis=-1, keepdims=True)
    var = jnp.mean((h - mu) ** 2, axis=-1, keepdims=True)
    return (h - mu) / jnp.sqrt(var + LN_EPS) * w + b


def reference_forward(x_sne, raw_layers, num_heads):
    S, N, E = x_sne.shape
    nh, dh = num_heads, E // num_heads
    x = jnp.transpose(x_sne, (1, 0, 2))                       # (N, S, E)
    for p in raw_layers:
        qkv = x @ p["in_proj_weight"].T + p["in_proj_bias"]
        q, k, v = qkv[..., :E], qkv[..., E:2 * E], qkv[..., 2 * E:]
        split = lambda t: t.reshape(N, S, nh, dh).transpose(0, 2, 1, 3)
        q, k, v = split(q) / np.sqrt(dh), split(k), split(v)
        s = jnp.einsum("nhqd,nhkd->nhqk", q, k)
        w = jax.nn.softmax(s, axis=-1)
        a = jnp.einsum("nhqk,nhkd->nhqd", w, v).transpose(0, 2, 1, 3).reshape(N, S, E)
        a = a @ p["out_proj_w"].T + p["out_proj_b"]
        h1 = _ln_ref(x + a, p["ln1_w"], p["ln1_b"])
        f = jnp.maximum(h1 @ p["linear1_w"].T + p["linear1_b"], 0.0)
        f = f @ p["linear2_w"].T + p["linear2_b"]
        x = _ln_ref(h1 + f, p["ln2_w"], p["ln2_b"])
    return jnp.transpose(x, (1, 0, 2))


if __name__ == "__main__":
    # Module defaults: ObjectEncoder(feature_dim=256, hidden_dim=512,
    # num_heads=8, num_layers=2); small input (seq=8, batch=2, 256).
    SEQ, BATCH, FEAT, HID, HEADS, LAYERS = 8, 2, 256, 512, 8, 2

    key = jax.random.PRNGKey(0)
    kx, *kls = jax.random.split(key, 1 + LAYERS)
    x = jax.random.normal(kx, (SEQ, BATCH, FEAT), jnp.float32)
    raw_layers = [make_raw_layer_params(kls[i], FEAT, HID) for i in range(LAYERS)]
    packed = pack_params(raw_layers, HEADS)

    fwd = jax.jit(functools.partial(object_encoder_forward, num_heads=HEADS))
    out = jax.block_until_ready(fwd(x, packed))
    assert out.shape == (SEQ, BATCH, FEAT)

    ref = jax.block_until_ready(reference_forward(x, raw_layers, HEADS))
    # bf16 matmul operands in the kernel vs full-f32 reference -> relaxed tolerance.
    np.testing.assert_allclose(np.asarray(out), np.asarray(ref), rtol=5e-2, atol=5e-2)

    print("KERNEL_OK")
</pallas_src>

<mosaic_0001>
module attributes {stable_mosaic.version = 11 : i64} {
  func.func @object_encoder_kernel(%arg0: i32, %arg1: memref<16x256xf32, #tpu.memory_space<vmem>>, %arg2: memref<2x256x768xbf16, #tpu.memory_space<vmem>>, %arg3: memref<2x1x768xf32, #tpu.memory_space<vmem>>, %arg4: memref<2x256x256xbf16, #tpu.memory_space<vmem>>, %arg5: memref<2x256x512xbf16, #tpu.memory_space<vmem>>, %arg6: memref<2x512x256xbf16, #tpu.memory_space<vmem>>, %arg7: memref<2x7x512xf32, #tpu.memory_space<vmem>>, %arg8: memref<16x256xf32, #tpu.memory_space<vmem>>) attributes {dimension_semantics = [#tpu.dimension_semantics<arbitrary>], iteration_bounds = array<i64: 1>, scalar_prefetch = 0 : i64, scratch_operands = 0 : i64, tpu.core_type = #tpu.core_type<tc>, window_params = [{pipeline_mode = #tpu.pipeline_mode<synchronous>, transform_indices = @transform_0, window_bounds = array<i64: 16, 256>}, {pipeline_mode = #tpu.pipeline_mode<synchronous>, transform_indices = @transform_1, window_bounds = array<i64: 2, 256, 768>}, {pipeline_mode = #tpu.pipeline_mode<synchronous>, transform_indices = @transform_2, window_bounds = array<i64: 2, 1, 768>}, {pipeline_mode = #tpu.pipeline_mode<synchronous>, transform_indices = @transform_3, window_bounds = array<i64: 2, 256, 256>}, {pipeline_mode = #tpu.pipeline_mode<synchronous>, transform_indices = @transform_4, window_bounds = array<i64: 2, 256, 512>}, {pipeline_mode = #tpu.pipeline_mode<synchronous>, transform_indices = @transform_5, window_bounds = array<i64: 2, 512, 256>}, {pipeline_mode = #tpu.pipeline_mode<synchronous>, transform_indices = @transform_6, window_bounds = array<i64: 2, 7, 512>}, {pipeline_mode = #tpu.pipeline_mode<synchronous>, transform_indices = @transform_7, window_bounds = array<i64: 16, 256>}]} {
    %0 = tpu.iota {dimensions = array<i32: 0>} : vector<16x16xi32>
    %c2_i32 = arith.constant 2 : i32
    %c0_i32 = arith.constant 0 : i32
    %1 = arith.cmpi eq, %c2_i32, %c0_i32 : i32
    %c1_i32 = arith.constant 1 : i32
    %2 = arith.select %1, %c1_i32, %c2_i32 : i32
    %3 = vector.broadcast %2 : i32 to vector<16x16xi32>
    %4 = arith.remsi %0, %3 : vector<16x16xi32>
    %c0_i32_0 = arith.constant 0 : i32
    %5 = vector.broadcast %c0_i32_0 : i32 to vector<16x16xi32>
    %6 = arith.cmpi ne, %4, %5 : vector<16x16xi32>
    %c0_i32_1 = arith.constant 0 : i32
    %7 = vector.broadcast %c0_i32_1 : i32 to vector<16x16xi32>
    %8 = arith.cmpi slt, %4, %7 : vector<16x16xi32>
    %c0_i32_2 = arith.constant 0 : i32
    %9 = arith.cmpi slt, %2, %c0_i32_2 : i32
    %10 = vector.broadcast %9 : i1 to vector<16x16xi1>
    %11 = vector.broadcast %10 : vector<16x16xi1> to vector<16x16xi1>
    %12 = arith.xori %8, %11 : vector<16x16xi1>
    %13 = arith.andi %12, %6 : vector<16x16xi1>
    %14 = vector.broadcast %2 : i32 to vector<16x16xi32>
    %15 = arith.addi %4, %14 : vector<16x16xi32>
    %16 = arith.select %13, %15, %4 : vector<16x16xi1>, vector<16x16xi32>
    %17 = tpu.iota {dimensions = array<i32: 1>} : vector<16x16xi32>
    %c2_i32_3 = arith.constant 2 : i32
    %c0_i32_4 = arith.constant 0 : i32
    %18 = arith.cmpi eq, %c2_i32_3, %c0_i32_4 : i32
    %c1_i32_5 = arith.constant 1 : i32
    %19 = arith.select %18, %c1_i32_5, %c2_i32_3 : i32
    %20 = vector.broadcast %19 : i32 to vector<16x16xi32>
    %21 = arith.remsi %17, %20 : vector<16x16xi32>
    %c0_i32_6 = arith.constant 0 : i32
    %22 = vector.broadcast %c0_i32_6 : i32 to vector<16x16xi32>
    %23 = arith.cmpi ne, %21, %22 : vector<16x16xi32>
    %c0_i32_7 = arith.constant 0 : i32
    %24 = vector.broadcast %c0_i32_7 : i32 to vector<16x16xi32>
    %25 = arith.cmpi slt, %21, %24 : vector<16x16xi32>
    %c0_i32_8 = arith.constant 0 : i32
    %26 = arith.cmpi slt, %19, %c0_i32_8 : i32
    %27 = vector.broadcast %26 : i1 to vector<16x16xi1>
    %28 = vector.broadcast %27 : vector<16x16xi1> to vector<16x16xi1>
    %29 = arith.xori %25, %28 : vector<16x16xi1>
    %30 = arith.andi %29, %23 : vector<16x16xi1>
    %31 = vector.broadcast %19 : i32 to vector<16x16xi32>
    %32 = arith.addi %21, %31 : vector<16x16xi32>
    %33 = arith.select %30, %32, %21 : vector<16x16xi1>, vector<16x16xi32>
    %34 = arith.cmpi eq, %16, %33 : vector<16x16xi32>
    %c0 = arith.constant 0 : index
    %c0_9 = arith.constant 0 : index
    %35 = vector.load %arg1[%c0, %c0_9] : memref<16x256xf32, #tpu.memory_space<vmem>>, vector<16x256xf32>
    %c0_10 = arith.constant 0 : index
    %c0_11 = arith.constant 0 : index
    %c0_12 = arith.constant 0 : index
    %36 = vector.load %arg7[%c0_10, %c0_11, %c0_12] : memref<2x7x512xf32, #tpu.memory_space<vmem>>, vector<1x7x512xf32>
    %37 = vector.shape_cast %36 : vector<1x7x512xf32> to vector<7x512xf32>
    %38 = vector.extract_strided_slice %37 {offsets = [0, 0], sizes = [1, 256], strides = [1, 1]} : vector<7x512xf32> to vector<1x256xf32>
    %39 = vector.extract_strided_slice %37 {offsets = [1, 0], sizes = [1, 512], strides = [1, 1]} : vector<7x512xf32> to vector<1x512xf32>
    %40 = vector.extract_strided_slice %37 {offsets = [2, 0], sizes = [1, 256], strides = [1, 1]} : vector<7x512xf32> to vector<1x256xf32>
    %41 = vector.extract_strided_slice %37 {offsets = [3, 0], sizes = [1, 256], strides = [1, 1]} : vector<7x512xf32> to vector<1x256xf32>
    %42 = vector.extract_strided_slice %37 {offsets = [4, 0], sizes = [1, 256], strides = [1, 1]} : vector<7x512xf32> to vector<1x256xf32>
    %43 = vector.extract_strided_slice %37 {offsets = [5, 0], sizes = [1, 256], strides = [1, 1]} : vector<7x512xf32> to vector<1x256xf32>
    %44 = vector.extract_strided_slice %37 {offsets = [6, 0], sizes = [1, 256], strides = [1, 1]} : vector<7x512xf32> to vector<1x256xf32>
    %45 = arith.truncf %35 : vector<16x256xf32> to vector<16x256xbf16>
    %c0_13 = arith.constant 0 : index
    %c0_14 = arith.constant 0 : index
    %c0_15 = arith.constant 0 : index
    %46 = vector.load %arg2[%c0_13, %c0_14, %c0_15] : memref<2x256x768xbf16, #tpu.memory_space<vmem>>, vector<1x256x768xbf16>
    %47 = vector.shape_cast %46 : vector<1x256x768xbf16> to vector<256x768xbf16>
    %cst = arith.constant dense<0.000000e+00> : vector<16x768xf32>
    %48 = tpu.matmul %45, %47, %cst {dimension_numbers = #tpu.dot_dimension_numbers<[1], [0], [0], [1], [0, 0, 1, 1], [], []>} : vector<16x256xbf16>, vector<256x768xbf16>, vector<16x768xf32> -> vector<16x768xf32>
    %c0_16 = arith.constant 0 : index
    %c0_17 = arith.constant 0 : index
    %c0_18 = arith.constant 0 : index
    %49 = vector.load %arg3[%c0_16, %c0_17, %c0_18] : memref<2x1x768xf32, #tpu.memory_space<vmem>>, vector<1x1x768xf32>
    %50 = vector.shape_cast %49 : vector<1x1x768xf32> to vector<1x768xf32>
    %51 = vector.broadcast %50 : vector<1x768xf32> to vector<16x768xf32>
    %52 = arith.addf %48, %51 : vector<16x768xf32>
    %53 = vector.extract_strided_slice %52 {offsets = [0, 0], sizes = [16, 32], strides = [1, 1]} : vector<16x768xf32> to vector<16x32xf32>
    %54 = arith.truncf %53 : vector<16x32xf32> to vector<16x32xbf16>
    %55 = vector.extract_strided_slice %52 {offsets = [0, 256], sizes = [16, 32], strides = [1, 1]} : vector<16x768xf32> to vector<16x32xf32>
    %56 = arith.truncf %55 : vector<16x32xf32> to vector<16x32xbf16>
    %57 = vector.extract_strided_slice %52 {offsets = [0, 512], sizes = [16, 32], strides = [1, 1]} : vector<16x768xf32> to vector<16x32xf32>
    %58 = arith.truncf %57 : vector<16x32xf32> to vector<16x32xbf16>
    %cst_19 = arith.constant dense<0.000000e+00> : vector<16x16xf32>
    %59 = tpu.matmul %54, %56, %cst_19 {dimension_numbers = #tpu.dot_dimension_numbers<[1], [1], [0], [0], [0, 0, 1, 0], [], []>} : vector<16x32xbf16>, vector<16x32xbf16>, vector<16x16xf32> -> vector<16x16xf32>
    %cst_20 = arith.constant -1.000000e+30 : f32
    %60 = vector.broadcast %cst_20 : f32 to vector<16x16xf32>
    %61 = arith.select %34, %59, %60 : vector<16x16xi1>, vector<16x16xf32>
    %cst_21 = arith.constant dense<0xFF800000> : vector<16xf32>
    %62 = vector.multi_reduction <maximumf>, %61, %cst_21 [1] : vector<16x16xf32> to vector<16xf32>
    %63 = vector.shape_cast %62 : vector<16xf32> to vector<16x1xf32>
    %64 = vector.broadcast %63 : vector<16x1xf32> to vector<16x16xf32>
    %65 = arith.subf %61, %64 : vector<16x16xf32>
    %66 = math.exp %65 : vector<16x16xf32>
    %cst_22 = arith.constant dense<0.000000e+00> : vector<16xf32>
    %67 = vector.multi_reduction <add>, %66, %cst_22 [1] : vector<16x16xf32> to vector<16xf32>
    %68 = vector.shape_cast %67 : vector<16xf32> to vector<16x1xf32>
    %69 = tpu.reciprocal %68 : vector<16x1xf32> -> vector<16x1xf32>
    %70 = vector.broadcast %69 : vector<16x1xf32> to vector<16x16xf32>
    %71 = arith.mulf %66, %70 : vector<16x16xf32>
    %72 = arith.truncf %71 : vector<16x16xf32> to vector<16x16xbf16>
    %cst_23 = arith.constant dense<0.000000e+00> : vector<16x32xf32>
    %73 = tpu.matmul %72, %58, %cst_23 {dimension_numbers = #tpu.dot_dimension_numbers<[1], [0], [0], [1], [0, 0, 1, 1], [], []>} : vector<16x16xbf16>, vector<16x32xbf16>, vector<16x32xf32> -> vector<16x32xf32>
    %74 = vector.extract_strided_slice %52 {offsets = [0, 32], sizes = [16, 32], strides = [1, 1]} : vector<16x768xf32> to vector<16x32xf32>
    %75 = arith.truncf %74 : vector<16x32xf32> to vector<16x32xbf16>
    %76 = vector.extract_strided_slice %52 {offsets = [0, 288], sizes = [16, 32], strides = [1, 1]} : vector<16x768xf32> to vector<16x32xf32>
    %77 = arith.truncf %76 : vector<16x32xf32> to vector<16x32xbf16>
    %78 = vector.extract_strided_slice %52 {offsets = [0, 544], sizes = [16, 32], strides = [1, 1]} : vector<16x768xf32> to vector<16x32xf32>
    %79 = arith.truncf %78 : vector<16x32xf32> to vector<16x32xbf16>
    %cst_24 = arith.constant dense<0.000000e+00> : vector<16x16xf32>
    %80 = tpu.matmul %75, %77, %cst_24 {dimension_numbers = #tpu.dot_dimension_numbers<[1], [1], [0], [0], [0, 0, 1, 0], [], []>} : vector<16x32xbf16>, vector<16x32xbf16>, vector<16x16xf32> -> vector<16x16xf32>
    %cst_25 = arith.constant -1.000000e+30 : f32
    %81 = vector.broadcast %cst_25 : f32 to vector<16x16xf32>
    %82 = arith.select %34, %80, %81 : vector<16x16xi1>, vector<16x16xf32>
    %cst_26 = arith.constant dense<0xFF800000> : vector<16xf32>
    %83 = vector.multi_reduction <maximumf>, %82, %cst_26 [1] : vector<16x16xf32> to vector<16xf32>
    %84 = vector.shape_cast %83 : vector<16xf32> to vector<16x1xf32>
    %85 = vector.broadcast %84 : vector<16x1xf32> to vector<16x16xf32>
    %86 = arith.subf %82, %85 : vector<16x16xf32>
    %87 = math.exp %86 : vector<16x16xf32>
    %cst_27 = arith.constant dense<0.000000e+00> : vector<16xf32>
    %88 = vector.multi_reduction <add>, %87, %cst_27 [1] : vector<16x16xf32> to vector<16xf32>
    %89 = vector.shape_cast %88 : vector<16xf32> to vector<16x1xf32>
    %90 = tpu.reciprocal %89 : vector<16x1xf32> -> vector<16x1xf32>
    %91 = vector.broadcast %90 : vector<16x1xf32> to vector<16x16xf32>
    %92 = arith.mulf %87, %91 : vector<16x16xf32>
    %93 = arith.truncf %92 : vector<16x16xf32> to vector<16x16xbf16>
    %cst_28 = arith.constant dense<0.000000e+00> : vector<16x32xf32>
    %94 = tpu.matmul %93, %79, %cst_28 {dimension_numbers = #tpu.dot_dimension_numbers<[1], [0], [0], [1], [0, 0, 1, 1], [], []>} : vector<16x16xbf16>, vector<16x32xbf16>, vector<16x32xf32> -> vector<16x32xf32>
    %95 = vector.extract_strided_slice %52 {offsets = [0, 64], sizes = [16, 32], strides = [1, 1]} : vector<16x768xf32> to vector<16x32xf32>
    %96 = arith.truncf %95 : vector<16x32xf32> to vector<16x32xbf16>
    %97 = vector.extract_strided_slice %52 {offsets = [0, 320], sizes = [16, 32], strides = [1, 1]} : vector<16x768xf32> to vector<16x32xf32>
    %98 = arith.truncf %97 : vector<16x32xf32> to vector<16x32xbf16>
    %99 = vector.extract_strided_slice %52 {offsets = [0, 576], sizes = [16, 32], strides = [1, 1]} : vector<16x768xf32> to vector<16x32xf32>
    %100 = arith.truncf %99 : vector<16x32xf32> to vector<16x32xbf16>
    %cst_29 = arith.constant dense<0.000000e+00> : vector<16x16xf32>
    %101 = tpu.matmul %96, %98, %cst_29 {dimension_numbers = #tpu.dot_dimension_numbers<[1], [1], [0], [0], [0, 0, 1, 0], [], []>} : vector<16x32xbf16>, vector<16x32xbf16>, vector<16x16xf32> -> vector<16x16xf32>
    %cst_30 = arith.constant -1.000000e+30 : f32
    %102 = vector.broadcast %cst_30 : f32 to vector<16x16xf32>
    %103 = arith.select %34, %101, %102 : vector<16x16xi1>, vector<16x16xf32>
    %cst_31 = arith.constant dense<0xFF800000> : vector<16xf32>
    %104 = vector.multi_reduction <maximumf>, %103, %cst_31 [1] : vector<16x16xf32> to vector<16xf32>
    %105 = vector.shape_cast %104 : vector<16xf32> to vector<16x1xf32>
    %106 = vector.broadcast %105 : vector<16x1xf32> to vector<16x16xf32>
    %107 = arith.subf %103, %106 : vector<16x16xf32>
    %108 = math.exp %107 : vector<16x16xf32>
    %cst_32 = arith.constant dense<0.000000e+00> : vector<16xf32>
    %109 = vector.multi_reduction <add>, %108, %cst_32 [1] : vector<16x16xf32> to vector<16xf32>
    %110 = vector.shape_cast %109 : vector<16xf32> to vector<16x1xf32>
    %111 = tpu.reciprocal %110 : vector<16x1xf32> -> vector<16x1xf32>
    %112 = vector.broadcast %111 : vector<16x1xf32> to vector<16x16xf32>
    %113 = arith.mulf %108, %112 : vector<16x16xf32>
    %114 = arith.truncf %113 : vector<16x16xf32> to vector<16x16xbf16>
    %cst_33 = arith.constant dense<0.000000e+00> : vector<16x32xf32>
    %115 = tpu.matmul %114, %100, %cst_33 {dimension_numbers = #tpu.dot_dimension_numbers<[1], [0], [0], [1], [0, 0, 1, 1], [], []>} : vector<16x16xbf16>, vector<16x32xbf16>, vector<16x32xf32> -> vector<16x32xf32>
    %116 = vector.extract_strided_slice %52 {offsets = [0, 96], sizes = [16, 32], strides = [1, 1]} : vector<16x768xf32> to vector<16x32xf32>
    %117 = arith.truncf %116 : vector<16x32xf32> to vector<16x32xbf16>
    %118 = vector.extract_strided_slice %52 {offsets = [0, 352], sizes = [16, 32], strides = [1, 1]} : vector<16x768xf32> to vector<16x32xf32>
    %119 = arith.truncf %118 : vector<16x32xf32> to vector<16x32xbf16>
    %120 = vector.extract_strided_slice %52 {offsets = [0, 608], sizes = [16, 32], strides = [1, 1]} : vector<16x768xf32> to vector<16x32xf32>
    %121 = arith.truncf %120 : vector<16x32xf32> to vector<16x32xbf16>
    %cst_34 = arith.constant dense<0.000000e+00> : vector<16x16xf32>
    %122 = tpu.matmul %117, %119, %cst_34 {dimension_numbers = #tpu.dot_dimension_numbers<[1], [1], [0], [0], [0, 0, 1, 0], [], []>} : vector<16x32xbf16>, vector<16x32xbf16>, vector<16x16xf32> -> vector<16x16xf32>
    %cst_35 = arith.constant -1.000000e+30 : f32
    %123 = vector.broadcast %cst_35 : f32 to vector<16x16xf32>
    %124 = arith.select %34, %122, %123 : vector<16x16xi1>, vector<16x16xf32>
    %cst_36 = arith.constant dense<0xFF800000> : vector<16xf32>
    %125 = vector.multi_reduction <maximumf>, %124, %cst_36 [1] : vector<16x16xf32> to vector<16xf32>
    %126 = vector.shape_cast %125 : vector<16xf32> to vector<16x1xf32>
    %127 = vector.broadcast %126 : vector<16x1xf32> to vector<16x16xf32>
    %128 = arith.subf %124, %127 : vector<16x16xf32>
    %129 = math.exp %128 : vector<16x16xf32>
    %cst_37 = arith.constant dense<0.000000e+00> : vector<16xf32>
    %130 = vector.multi_reduction <add>, %129, %cst_37 [1] : vector<16x16xf32> to vector<16xf32>
    %131 = vector.shape_cast %130 : vector<16xf32> to vector<16x1xf32>
    %132 = tpu.reciprocal %131 : vector<16x1xf32> -> vector<16x1xf32>
    %133 = vector.broadcast %132 : vector<16x1xf32> to vector<16x16xf32>
    %134 = arith.mulf %129, %133 : vector<16x16xf32>
    %135 = arith.truncf %134 : vector<16x16xf32> to vector<16x16xbf16>
    %cst_38 = arith.constant dense<0.000000e+00> : vector<16x32xf32>
    %136 = tpu.matmul %135, %121, %cst_38 {dimension_numbers = #tpu.dot_dimension_numbers<[1], [0], [0], [1], [0, 0, 1, 1], [], []>} : vector<16x16xbf16>, vector<16x32xbf16>, vector<16x32xf32> -> vector<16x32xf32>
    %137 = vector.extract_strided_slice %52 {offsets = [0, 128], sizes = [16, 32], strides = [1, 1]} : vector<16x768xf32> to vector<16x32xf32>
    %138 = arith.truncf %137 : vector<16x32xf32> to vector<16x32xbf16>
    %139 = vector.extract_strided_slice %52 {offsets = [0, 384], sizes = [16, 32], strides = [1, 1]} : vector<16x768xf32> to vector<16x32xf32>
    %140 = arith.truncf %139 : vector<16x32xf32> to vector<16x32xbf16>
    %141 = vector.extract_strided_slice %52 {offsets = [0, 640], sizes = [16, 32], strides = [1, 1]} : vector<16x768xf32> to vector<16x32xf32>
    %142 = arith.truncf %141 : vector<16x32xf32> to vector<16x32xbf16>
    %cst_39 = arith.constant dense<0.000000e+00> : vector<16x16xf32>
    %143 = tpu.matmul %138, %140, %cst_39 {dimension_numbers = #tpu.dot_dimension_numbers<[1], [1], [0], [0], [0, 0, 1, 0], [], []>} : vector<16x32xbf16>, vector<16x32xbf16>, vector<16x16xf32> -> vector<16x16xf32>
    %cst_40 = arith.constant -1.000000e+30 : f32
    %144 = vector.broadcast %cst_40 : f32 to vector<16x16xf32>
    %145 = arith.select %34, %143, %144 : vector<16x16xi1>, vector<16x16xf32>
    %cst_41 = arith.constant dense<0xFF800000> : vector<16xf32>
    %146 = vector.multi_reduction <maximumf>, %145, %cst_41 [1] : vector<16x16xf32> to vector<16xf32>
    %147 = vector.shape_cast %146 : vector<16xf32> to vector<16x1xf32>
    %148 = vector.broadcast %147 : vector<16x1xf32> to vector<16x16xf32>
    %149 = arith.subf %145, %148 : vector<16x16xf32>
    %150 = math.exp %149 : vector<16x16xf32>
    %cst_42 = arith.constant dense<0.000000e+00> : vector<16xf32>
    %151 = vector.multi_reduction <add>, %150, %cst_42 [1] : vector<16x16xf32> to vector<16xf32>
    %152 = vector.shape_cast %151 : vector<16xf32> to vector<16x1xf32>
    %153 = tpu.reciprocal %152 : vector<16x1xf32> -> vector<16x1xf32>
    %154 = vector.broadcast %153 : vector<16x1xf32> to vector<16x16xf32>
    %155 = arith.mulf %150, %154 : vector<16x16xf32>
    %156 = arith.truncf %155 : vector<16x16xf32> to vector<16x16xbf16>
    %cst_43 = arith.constant dense<0.000000e+00> : vector<16x32xf32>
    %157 = tpu.matmul %156, %142, %cst_43 {dimension_numbers = #tpu.dot_dimension_numbers<[1], [0], [0], [1], [0, 0, 1, 1], [], []>} : vector<16x16xbf16>, vector<16x32xbf16>, vector<16x32xf32> -> vector<16x32xf32>
    %158 = vector.extract_strided_slice %52 {offsets = [0, 160], sizes = [16, 32], strides = [1, 1]} : vector<16x768xf32> to vector<16x32xf32>
    %159 = arith.truncf %158 : vector<16x32xf32> to vector<16x32xbf16>
    %160 = vector.extract_strided_slice %52 {offsets = [0, 416], sizes = [16, 32], strides = [1, 1]} : vector<16x768xf32> to vector<16x32xf32>
    %161 = arith.truncf %160 : vector<16x32xf32> to vector<16x32xbf16>
    %162 = vector.extract_strided_slice %52 {offsets = [0, 672], sizes = [16, 32], strides = [1, 1]} : vector<16x768xf32> to vector<16x32xf32>
    %163 = arith.truncf %162 : vector<16x32xf32> to vector<16x32xbf16>
    %cst_44 = arith.constant dense<0.000000e+00> : vector<16x16xf32>
    %164 = tpu.matmul %159, %161, %cst_44 {dimension_numbers = #tpu.dot_dimension_numbers<[1], [1], [0], [0], [0, 0, 1, 0], [], []>} : vector<16x32xbf16>, vector<16x32xbf16>, vector<16x16xf32> -> vector<16x16xf32>
    %cst_45 = arith.constant -1.000000e+30 : f32
    %165 = vector.broadcast %cst_45 : f32 to vector<16x16xf32>
    %166 = arith.select %34, %164, %165 : vector<16x16xi1>, vector<16x16xf32>
    %cst_46 = arith.constant dense<0xFF800000> : vector<16xf32>
    %167 = vector.multi_reduction <maximumf>, %166, %cst_46 [1] : vector<16x16xf32> to vector<16xf32>
    %168 = vector.shape_cast %167 : vector<16xf32> to vector<16x1xf32>
    %169 = vector.broadcast %168 : vector<16x1xf32> to vector<16x16xf32>
    %170 = arith.subf %166, %169 : vector<16x16xf32>
    %171 = math.exp %170 : vector<16x16xf32>
    %cst_47 = arith.constant dense<0.000000e+00> : vector<16xf32>
    %172 = vector.multi_reduction <add>, %171, %cst_47 [1] : vector<16x16xf32> to vector<16xf32>
    %173 = vector.shape_cast %172 : vector<16xf32> to vector<16x1xf32>
    %174 = tpu.reciprocal %173 : vector<16x1xf32> -> vector<16x1xf32>
    %175 = vector.broadcast %174 : vector<16x1xf32> to vector<16x16xf32>
    %176 = arith.mulf %171, %175 : vector<16x16xf32>
    %177 = arith.truncf %176 : vector<16x16xf32> to vector<16x16xbf16>
    %cst_48 = arith.constant dense<0.000000e+00> : vector<16x32xf32>
    %178 = tpu.matmul %177, %163, %cst_48 {dimension_numbers = #tpu.dot_dimension_numbers<[1], [0], [0], [1], [0, 0, 1, 1], [], []>} : vector<16x16xbf16>, vector<16x32xbf16>, vector<16x32xf32> -> vector<16x32xf32>
    %179 = vector.extract_strided_slice %52 {offsets = [0, 192], sizes = [16, 32], strides = [1, 1]} : vector<16x768xf32> to vector<16x32xf32>
    %180 = arith.truncf %179 : vector<16x32xf32> to vector<16x32xbf16>
    %181 = vector.extract_strided_slice %52 {offsets = [0, 448], sizes = [16, 32], strides = [1, 1]} : vector<16x768xf32> to vector<16x32xf32>
    %182 = arith.truncf %181 : vector<16x32xf32> to vector<16x32xbf16>
    %183 = vector.extract_strided_slice %52 {offsets = [0, 704], sizes = [16, 32], strides = [1, 1]} : vector<16x768xf32> to vector<16x32xf32>
    %184 = arith.truncf %183 : vector<16x32xf32> to vector<16x32xbf16>
    %cst_49 = arith.constant dense<0.000000e+00> : vector<16x16xf32>
    %185 = tpu.matmul %180, %182, %cst_49 {dimension_numbers = #tpu.dot_dimension_numbers<[1], [1], [0], [0], [0, 0, 1, 0], [], []>} : vector<16x32xbf16>, vector<16x32xbf16>, vector<16x16xf32> -> vector<16x16xf32>
    %cst_50 = arith.constant -1.000000e+30 : f32
    %186 = vector.broadcast %cst_50 : f32 to vector<16x16xf32>
    %187 = arith.select %34, %185, %186 : vector<16x16xi1>, vector<16x16xf32>
    %cst_51 = arith.constant dense<0xFF800000> : vector<16xf32>
    %188 = vector.multi_reduction <maximumf>, %187, %cst_51 [1] : vector<16x16xf32> to vector<16xf32>
    %189 = vector.shape_cast %188 : vector<16xf32> to vector<16x1xf32>
    %190 = vector.broadcast %189 : vector<16x1xf32> to vector<16x16xf32>
    %191 = arith.subf %187, %190 : vector<16x16xf32>
    %192 = math.exp %191 : vector<16x16xf32>
    %cst_52 = arith.constant dense<0.000000e+00> : vector<16xf32>
    %193 = vector.multi_reduction <add>, %192, %cst_52 [1] : vector<16x16xf32> to vector<16xf32>
    %194 = vector.shape_cast %193 : vector<16xf32> to vector<16x1xf32>
    %195 = tpu.reciprocal %194 : vector<16x1xf32> -> vector<16x1xf32>
    %196 = vector.broadcast %195 : vector<16x1xf32> to vector<16x16xf32>
    %197 = arith.mulf %192, %196 : vector<16x16xf32>
    %198 = arith.truncf %197 : vector<16x16xf32> to vector<16x16xbf16>
    %cst_53 = arith.constant dense<0.000000e+00> : vector<16x32xf32>
    %199 = tpu.matmul %198, %184, %cst_53 {dimension_numbers = #tpu.dot_dimension_numbers<[1], [0], [0], [1], [0, 0, 1, 1], [], []>} : vector<16x16xbf16>, vector<16x32xbf16>, vector<16x32xf32> -> vector<16x32xf32>
    %200 = vector.extract_strided_slice %52 {offsets = [0, 224], sizes = [16, 32], strides = [1, 1]} : vector<16x768xf32> to vector<16x32xf32>
    %201 = arith.truncf %200 : vector<16x32xf32> to vector<16x32xbf16>
    %202 = vector.extract_strided_slice %52 {offsets = [0, 480], sizes = [16, 32], strides = [1, 1]} : vector<16x768xf32> to vector<16x32xf32>
    %203 = arith.truncf %202 : vector<16x32xf32> to vector<16x32xbf16>
    %204 = vector.extract_strided_slice %52 {offsets = [0, 736], sizes = [16, 32], strides = [1, 1]} : vector<16x768xf32> to vector<16x32xf32>
    %205 = arith.truncf %204 : vector<16x32xf32> to vector<16x32xbf16>
    %cst_54 = arith.constant dense<0.000000e+00> : vector<16x16xf32>
    %206 = tpu.matmul %201, %203, %cst_54 {dimension_numbers = #tpu.dot_dimension_numbers<[1], [1], [0], [0], [0, 0, 1, 0], [], []>} : vector<16x32xbf16>, vector<16x32xbf16>, vector<16x16xf32> -> vector<16x16xf32>
    %cst_55 = arith.constant -1.000000e+30 : f32
    %207 = vector.broadcast %cst_55 : f32 to vector<16x16xf32>
    %208 = arith.select %34, %206, %207 : vector<16x16xi1>, vector<16x16xf32>
    %cst_56 = arith.constant dense<0xFF800000> : vector<16xf32>
    %209 = vector.multi_reduction <maximumf>, %208, %cst_56 [1] : vector<16x16xf32> to vector<16xf32>
    %210 = vector.shape_cast %209 : vector<16xf32> to vector<16x1xf32>
    %211 = vector.broadcast %210 : vector<16x1xf32> to vector<16x16xf32>
    %212 = arith.subf %208, %211 : vector<16x16xf32>
    %213 = math.exp %212 : vector<16x16xf32>
    %cst_57 = arith.constant dense<0.000000e+00> : vector<16xf32>
    %214 = vector.multi_reduction <add>, %213, %cst_57 [1] : vector<16x16xf32> to vector<16xf32>
    %215 = vector.shape_cast %214 : vector<16xf32> to vector<16x1xf32>
    %216 = tpu.reciprocal %215 : vector<16x1xf32> -> vector<16x1xf32>
    %217 = vector.broadcast %216 : vector<16x1xf32> to vector<16x16xf32>
    %218 = arith.mulf %213, %217 : vector<16x16xf32>
    %219 = arith.truncf %218 : vector<16x16xf32> to vector<16x16xbf16>
    %cst_58 = arith.constant dense<0.000000e+00> : vector<16x32xf32>
    %220 = tpu.matmul %219, %205, %cst_58 {dimension_numbers = #tpu.dot_dimension_numbers<[1], [0], [0], [1], [0, 0, 1, 1], [], []>} : vector<16x16xbf16>, vector<16x32xbf16>, vector<16x32xf32> -> vector<16x32xf32>
    %221 = tpu.concatenate %73, %94, %115, %136, %157, %178, %199, %220 in 1 : vector<16x32xf32>, vector<16x32xf32>, vector<16x32xf32>, vector<16x32xf32>, vector<16x32xf32>, vector<16x32xf32>, vector<16x32xf32>, vector<16x32xf32> -> vector<16x256xf32>
    %222 = arith.truncf %221 : vector<16x256xf32> to vector<16x256xbf16>
    %c0_59 = arith.constant 0 : index
    %c0_60 = arith.constant 0 : index
    %c0_61 = arith.constant 0 : index
    %223 = vector.load %arg4[%c0_59, %c0_60, %c0_61] : memref<2x256x256xbf16, #tpu.memory_space<vmem>>, vector<1x256x256xbf16>
    %224 = vector.shape_cast %223 : vector<1x256x256xbf16> to vector<256x256xbf16>
    %cst_62 = arith.constant dense<0.000000e+00> : vector<16x256xf32>
    %225 = tpu.matmul %222, %224, %cst_62 {dimension_numbers = #tpu.dot_dimension_numbers<[1], [0], [0], [1], [0, 0, 1, 1], [], []>} : vector<16x256xbf16>, vector<256x256xbf16>, vector<16x256xf32> -> vector<16x256xf32>
    %226 = vector.broadcast %38 : vector<1x256xf32> to vector<16x256xf32>
    %227 = arith.addf %225, %226 : vector<16x256xf32>
    %228 = arith.addf %35, %227 : vector<16x256xf32>
    %cst_63 = arith.constant dense<0.000000e+00> : vector<16xf32>
    %229 = vector.multi_reduction <add>, %228, %cst_63 [1] : vector<16x256xf32> to vector<16xf32>
    %230 = vector.shape_cast %229 : vector<16xf32> to vector<16x1xf32>
    %cst_64 = arith.constant 2.560000e+02 : f32
    %231 = vector.broadcast %cst_64 : f32 to vector<16x1xf32>
    %232 = arith.divf %230, %231 : vector<16x1xf32>
    %233 = vector.broadcast %232 : vector<16x1xf32> to vector<16x256xf32>
    %234 = arith.subf %228, %233 : vector<16x256xf32>
    %235 = arith.mulf %234, %234 : vector<16x256xf32>
    %cst_65 = arith.constant dense<0.000000e+00> : vector<16xf32>
    %236 = vector.multi_reduction <add>, %235, %cst_65 [1] : vector<16x256xf32> to vector<16xf32>
    %237 = vector.shape_cast %236 : vector<16xf32> to vector<16x1xf32>
    %cst_66 = arith.constant 2.560000e+02 : f32
    %238 = vector.broadcast %cst_66 : f32 to vector<16x1xf32>
    %239 = arith.divf %237, %238 : vector<16x1xf32>
    %cst_67 = arith.constant 9.99999974E-6 : f32
    %240 = vector.broadcast %cst_67 : f32 to vector<16x1xf32>
    %241 = arith.addf %239, %240 : vector<16x1xf32>
    %242 = math.rsqrt %241 : vector<16x1xf32>
    %243 = vector.broadcast %242 : vector<16x1xf32> to vector<16x256xf32>
    %244 = arith.mulf %234, %243 : vector<16x256xf32>
    %245 = vector.broadcast %41 : vector<1x256xf32> to vector<16x256xf32>
    %246 = arith.mulf %244, %245 : vector<16x256xf32>
    %247 = vector.broadcast %42 : vector<1x256xf32> to vector<16x256xf32>
    %248 = arith.addf %246, %247 : vector<16x256xf32>
    %249 = arith.truncf %248 : vector<16x256xf32> to vector<16x256xbf16>
    %c0_68 = arith.constant 0 : index
    %c0_69 = arith.constant 0 : index
    %c0_70 = arith.constant 0 : index
    %250 = vector.load %arg5[%c0_68, %c0_69, %c0_70] : memref<2x256x512xbf16, #tpu.memory_space<vmem>>, vector<1x256x512xbf16>
    %251 = vector.shape_cast %250 : vector<1x256x512xbf16> to vector<256x512xbf16>
    %cst_71 = arith.constant dense<0.000000e+00> : vector<16x512xf32>
    %252 = tpu.matmul %249, %251, %cst_71 {dimension_numbers = #tpu.dot_dimension_numbers<[1], [0], [0], [1], [0, 0, 1, 1], [], []>} : vector<16x256xbf16>, vector<256x512xbf16>, vector<16x512xf32> -> vector<16x512xf32>
    %253 = vector.broadcast %39 : vector<1x512xf32> to vector<16x512xf32>
    %254 = arith.addf %252, %253 : vector<16x512xf32>
    %cst_72 = arith.constant 0.000000e+00 : f32
    %255 = vector.broadcast %cst_72 : f32 to vector<16x512xf32>
    %256 = arith.maximumf %254, %255 : vector<16x512xf32>
    %257 = arith.truncf %256 : vector<16x512xf32> to vector<16x512xbf16>
    %c0_73 = arith.constant 0 : index
    %c0_74 = arith.constant 0 : index
    %c0_75 = arith.constant 0 : index
    %258 = vector.load %arg6[%c0_73, %c0_74, %c0_75] : memref<2x512x256xbf16, #tpu.memory_space<vmem>>, vector<1x512x256xbf16>
    %259 = vector.shape_cast %258 : vector<1x512x256xbf16> to vector<512x256xbf16>
    %cst_76 = arith.constant dense<0.000000e+00> : vector<16x256xf32>
    %260 = tpu.matmul %257, %259, %cst_76 {dimension_numbers = #tpu.dot_dimension_numbers<[1], [0], [0], [1], [0, 0, 1, 1], [], []>} : vector<16x512xbf16>, vector<512x256xbf16>, vector<16x256xf32> -> vector<16x256xf32>
    %261 = vector.broadcast %40 : vector<1x256xf32> to vector<16x256xf32>
    %262 = arith.addf %260, %261 : vector<16x256xf32>
    %263 = arith.addf %248, %262 : vector<16x256xf32>
    %cst_77 = arith.constant dense<0.000000e+00> : vector<16xf32>
    %264 = vector.multi_reduction <add>, %263, %cst_77 [1] : vector<16x256xf32> to vector<16xf32>
    %265 = vector.shape_cast %264 : vector<16xf32> to vector<16x1xf32>
    %cst_78 = arith.constant 2.560000e+02 : f32
    %266 = vector.broadcast %cst_78 : f32 to vector<16x1xf32>
    %267 = arith.divf %265, %266 : vector<16x1xf32>
    %268 = vector.broadcast %267 : vector<16x1xf32> to vector<16x256xf32>
    %269 = arith.subf %263, %268 : vector<16x256xf32>
    %270 = arith.mulf %269, %269 : vector<16x256xf32>
    %cst_79 = arith.constant dense<0.000000e+00> : vector<16xf32>
    %271 = vector.multi_reduction <add>, %270, %cst_79 [1] : vector<16x256xf32> to vector<16xf32>
    %272 = vector.shape_cast %271 : vector<16xf32> to vector<16x1xf32>
    %cst_80 = arith.constant 2.560000e+02 : f32
    %273 = vector.broadcast %cst_80 : f32 to vector<16x1xf32>
    %274 = arith.divf %272, %273 : vector<16x1xf32>
    %cst_81 = arith.constant 9.99999974E-6 : f32
    %275 = vector.broadcast %cst_81 : f32 to vector<16x1xf32>
    %276 = arith.addf %274, %275 : vector<16x1xf32>
    %277 = math.rsqrt %276 : vector<16x1xf32>
    %278 = vector.broadcast %277 : vector<16x1xf32> to vector<16x256xf32>
    %279 = arith.mulf %269, %278 : vector<16x256xf32>
    %280 = vector.broadcast %43 : vector<1x256xf32> to vector<16x256xf32>
    %281 = arith.mulf %279, %280 : vector<16x256xf32>
    %282 = vector.broadcast %44 : vector<1x256xf32> to vector<16x256xf32>
    %283 = arith.addf %281, %282 : vector<16x256xf32>
    %c1 = arith.constant 1 : index
    %c0_82 = arith.constant 0 : index
    %c0_83 = arith.constant 0 : index
    %284 = vector.load %arg7[%c1, %c0_82, %c0_83] : memref<2x7x512xf32, #tpu.memory_space<vmem>>, vector<1x7x512xf32>
    %285 = vector.shape_cast %284 : vector<1x7x512xf32> to vector<7x512xf32>
    %286 = vector.extract_strided_slice %285 {offsets = [0, 0], sizes = [1, 256], strides = [1, 1]} : vector<7x512xf32> to vector<1x256xf32>
    %287 = vector.extract_strided_slice %285 {offsets = [1, 0], sizes = [1, 512], strides = [1, 1]} : vector<7x512xf32> to vector<1x512xf32>
    %288 = vector.extract_strided_slice %285 {offsets = [2, 0], sizes = [1, 256], strides = [1, 1]} : vector<7x512xf32> to vector<1x256xf32>
    %289 = vector.extract_strided_slice %285 {offsets = [3, 0], sizes = [1, 256], strides = [1, 1]} : vector<7x512xf32> to vector<1x256xf32>
    %290 = vector.extract_strided_slice %285 {offsets = [4, 0], sizes = [1, 256], strides = [1, 1]} : vector<7x512xf32> to vector<1x256xf32>
    %291 = vector.extract_strided_slice %285 {offsets = [5, 0], sizes = [1, 256], strides = [1, 1]} : vector<7x512xf32> to vector<1x256xf32>
    %292 = vector.extract_strided_slice %285 {offsets = [6, 0], sizes = [1, 256], strides = [1, 1]} : vector<7x512xf32> to vector<1x256xf32>
    %293 = arith.truncf %283 : vector<16x256xf32> to vector<16x256xbf16>
    %c1_84 = arith.constant 1 : index
    %c0_85 = arith.constant 0 : index
    %c0_86 = arith.constant 0 : index
    %294 = vector.load %arg2[%c1_84, %c0_85, %c0_86] : memref<2x256x768xbf16, #tpu.memory_space<vmem>>, vector<1x256x768xbf16>
    %295 = vector.shape_cast %294 : vector<1x256x768xbf16> to vector<256x768xbf16>
    %cst_87 = arith.constant dense<0.000000e+00> : vector<16x768xf32>
    %296 = tpu.matmul %293, %295, %cst_87 {dimension_numbers = #tpu.dot_dimension_numbers<[1], [0], [0], [1], [0, 0, 1, 1], [], []>} : vector<16x256xbf16>, vector<256x768xbf16>, vector<16x768xf32> -> vector<16x768xf32>
    %c1_88 = arith.constant 1 : index
    %c0_89 = arith.constant 0 : index
    %c0_90 = arith.constant 0 : index
    %297 = vector.load %arg3[%c1_88, %c0_89, %c0_90] : memref<2x1x768xf32, #tpu.memory_space<vmem>>, vector<1x1x768xf32>
    %298 = vector.shape_cast %297 : vector<1x1x768xf32> to vector<1x768xf32>
    %299 = vector.broadcast %298 : vector<1x768xf32> to vector<16x768xf32>
    %300 = arith.addf %296, %299 : vector<16x768xf32>
    %301 = vector.extract_strided_slice %300 {offsets = [0, 0], sizes = [16, 32], strides = [1, 1]} : vector<16x768xf32> to vector<16x32xf32>
    %302 = arith.truncf %301 : vector<16x32xf32> to vector<16x32xbf16>
    %303 = vector.extract_strided_slice %300 {offsets = [0, 256], sizes = [16, 32], strides = [1, 1]} : vector<16x768xf32> to vector<16x32xf32>
    %304 = arith.truncf %303 : vector<16x32xf32> to vector<16x32xbf16>
    %305 = vector.extract_strided_slice %300 {offsets = [0, 512], sizes = [16, 32], strides = [1, 1]} : vector<16x768xf32> to vector<16x32xf32>
    %306 = arith.truncf %305 : vector<16x32xf32> to vector<16x32xbf16>
    %cst_91 = arith.constant dense<0.000000e+00> : vector<16x16xf32>
    %307 = tpu.matmul %302, %304, %cst_91 {dimension_numbers = #tpu.dot_dimension_numbers<[1], [1], [0], [0], [0, 0, 1, 0], [], []>} : vector<16x32xbf16>, vector<16x32xbf16>, vector<16x16xf32> -> vector<16x16xf32>
    %cst_92 = arith.constant -1.000000e+30 : f32
    %308 = vector.broadcast %cst_92 : f32 to vector<16x16xf32>
    %309 = arith.select %34, %307, %308 : vector<16x16xi1>, vector<16x16xf32>
    %cst_93 = arith.constant dense<0xFF800000> : vector<16xf32>
    %310 = vector.multi_reduction <maximumf>, %309, %cst_93 [1] : vector<16x16xf32> to vector<16xf32>
    %311 = vector.shape_cast %310 : vector<16xf32> to vector<16x1xf32>
    %312 = vector.broadcast %311 : vector<16x1xf32> to vector<16x16xf32>
    %313 = arith.subf %309, %312 : vector<16x16xf32>
    %314 = math.exp %313 : vector<16x16xf32>
    %cst_94 = arith.constant dense<0.000000e+00> : vector<16xf32>
    %315 = vector.multi_reduction <add>, %314, %cst_94 [1] : vector<16x16xf32> to vector<16xf32>
    %316 = vector.shape_cast %315 : vector<16xf32> to vector<16x1xf32>
    %317 = tpu.reciprocal %316 : vector<16x1xf32> -> vector<16x1xf32>
    %318 = vector.broadcast %317 : vector<16x1xf32> to vector<16x16xf32>
    %319 = arith.mulf %314, %318 : vector<16x16xf32>
    %320 = arith.truncf %319 : vector<16x16xf32> to vector<16x16xbf16>
    %cst_95 = arith.constant dense<0.000000e+00> : vector<16x32xf32>
    %321 = tpu.matmul %320, %306, %cst_95 {dimension_numbers = #tpu.dot_dimension_numbers<[1], [0], [0], [1], [0, 0, 1, 1], [], []>} : vector<16x16xbf16>, vector<16x32xbf16>, vector<16x32xf32> -> vector<16x32xf32>
    %322 = vector.extract_strided_slice %300 {offsets = [0, 32], sizes = [16, 32], strides = [1, 1]} : vector<16x768xf32> to vector<16x32xf32>
    %323 = arith.truncf %322 : vector<16x32xf32> to vector<16x32xbf16>
    %324 = vector.extract_strided_slice %300 {offsets = [0, 288], sizes = [16, 32], strides = [1, 1]} : vector<16x768xf32> to vector<16x32xf32>
    %325 = arith.truncf %324 : vector<16x32xf32> to vector<16x32xbf16>
    %326 = vector.extract_strided_slice %300 {offsets = [0, 544], sizes = [16, 32], strides = [1, 1]} : vector<16x768xf32> to vector<16x32xf32>
    %327 = arith.truncf %326 : vector<16x32xf32> to vector<16x32xbf16>
    %cst_96 = arith.constant dense<0.000000e+00> : vector<16x16xf32>
    %328 = tpu.matmul %323, %325, %cst_96 {dimension_numbers = #tpu.dot_dimension_numbers<[1], [1], [0], [0], [0, 0, 1, 0], [], []>} : vector<16x32xbf16>, vector<16x32xbf16>, vector<16x16xf32> -> vector<16x16xf32>
    %cst_97 = arith.constant -1.000000e+30 : f32
    %329 = vector.broadcast %cst_97 : f32 to vector<16x16xf32>
    %330 = arith.select %34, %328, %329 : vector<16x16xi1>, vector<16x16xf32>
    %cst_98 = arith.constant dense<0xFF800000> : vector<16xf32>
    %331 = vector.multi_reduction <maximumf>, %330, %cst_98 [1] : vector<16x16xf32> to vector<16xf32>
    %332 = vector.shape_cast %331 : vector<16xf32> to vector<16x1xf32>
    %333 = vector.broadcast %332 : vector<16x1xf32> to vector<16x16xf32>
    %334 = arith.subf %330, %333 : vector<16x16xf32>
    %335 = math.exp %334 : vector<16x16xf32>
    %cst_99 = arith.constant dense<0.000000e+00> : vector<16xf32>
    %336 = vector.multi_reduction <add>, %335, %cst_99 [1] : vector<16x16xf32> to vector<16xf32>
    %337 = vector.shape_cast %336 : vector<16xf32> to vector<16x1xf32>
    %338 = tpu.reciprocal %337 : vector<16x1xf32> -> vector<16x1xf32>
    %339 = vector.broadcast %338 : vector<16x1xf32> to vector<16x16xf32>
    %340 = arith.mulf %335, %339 : vector<16x16xf32>
    %341 = arith.truncf %340 : vector<16x16xf32> to vector<16x16xbf16>
    %cst_100 = arith.constant dense<0.000000e+00> : vector<16x32xf32>
    %342 = tpu.matmul %341, %327, %cst_100 {dimension_numbers = #tpu.dot_dimension_numbers<[1], [0], [0], [1], [0, 0, 1, 1], [], []>} : vector<16x16xbf16>, vector<16x32xbf16>, vector<16x32xf32> -> vector<16x32xf32>
    %343 = vector.extract_strided_slice %300 {offsets = [0, 64], sizes = [16, 32], strides = [1, 1]} : vector<16x768xf32> to vector<16x32xf32>
    %344 = arith.truncf %343 : vector<16x32xf32> to vector<16x32xbf16>
    %345 = vector.extract_strided_slice %300 {offsets = [0, 320], sizes = [16, 32], strides = [1, 1]} : vector<16x768xf32> to vector<16x32xf32>
    %346 = arith.truncf %345 : vector<16x32xf32> to vector<16x32xbf16>
    %347 = vector.extract_strided_slice %300 {offsets = [0, 576], sizes = [16, 32], strides = [1, 1]} : vector<16x768xf32> to vector<16x32xf32>
    %348 = arith.truncf %347 : vector<16x32xf32> to vector<16x32xbf16>
    %cst_101 = arith.constant dense<0.000000e+00> : vector<16x16xf32>
    %349 = tpu.matmul %344, %346, %cst_101 {dimension_numbers = #tpu.dot_dimension_numbers<[1], [1], [0], [0], [0, 0, 1, 0], [], []>} : vector<16x32xbf16>, vector<16x32xbf16>, vector<16x16xf32> -> vector<16x16xf32>
    %cst_102 = arith.constant -1.000000e+30 : f32
    %350 = vector.broadcast %cst_102 : f32 to vector<16x16xf32>
    %351 = arith.select %34, %349, %350 : vector<16x16xi1>, vector<16x16xf32>
    %cst_103 = arith.constant dense<0xFF800000> : vector<16xf32>
    %352 = vector.multi_reduction <maximumf>, %351, %cst_103 [1] : vector<16x16xf32> to vector<16xf32>
    %353 = vector.shape_cast %352 : vector<16xf32> to vector<16x1xf32>
    %354 = vector.broadcast %353 : vector<16x1xf32> to vector<16x16xf32>
    %355 = arith.subf %351, %354 : vector<16x16xf32>
    %356 = math.exp %355 : vector<16x16xf32>
    %cst_104 = arith.constant dense<0.000000e+00> : vector<16xf32>
    %357 = vector.multi_reduction <add>, %356, %cst_104 [1] : vector<16x16xf32> to vector<16xf32>
    %358 = vector.shape_cast %357 : vector<16xf32> to vector<16x1xf32>
    %359 = tpu.reciprocal %358 : vector<16x1xf32> -> vector<16x1xf32>
    %360 = vector.broadcast %359 : vector<16x1xf32> to vector<16x16xf32>
    %361 = arith.mulf %356, %360 : vector<16x16xf32>
    %362 = arith.truncf %361 : vector<16x16xf32> to vector<16x16xbf16>
    %cst_105 = arith.constant dense<0.000000e+00> : vector<16x32xf32>
    %363 = tpu.matmul %362, %348, %cst_105 {dimension_numbers = #tpu.dot_dimension_numbers<[1], [0], [0], [1], [0, 0, 1, 1], [], []>} : vector<16x16xbf16>, vector<16x32xbf16>, vector<16x32xf32> -> vector<16x32xf32>
    %364 = vector.extract_strided_slice %300 {offsets = [0, 96], sizes = [16, 32], strides = [1, 1]} : vector<16x768xf32> to vector<16x32xf32>
    %365 = arith.truncf %364 : vector<16x32xf32> to vector<16x32xbf16>
    %366 = vector.extract_strided_slice %300 {offsets = [0, 352], sizes = [16, 32], strides = [1, 1]} : vector<16x768xf32> to vector<16x32xf32>
    %367 = arith.truncf %366 : vector<16x32xf32> to vector<16x32xbf16>
    %368 = vector.extract_strided_slice %300 {offsets = [0, 608], sizes = [16, 32], strides = [1, 1]} : vector<16x768xf32> to vector<16x32xf32>
    %369 = arith.truncf %368 : vector<16x32xf32> to vector<16x32xbf16>
    %cst_106 = arith.constant dense<0.000000e+00> : vector<16x16xf32>
    %370 = tpu.matmul %365, %367, %cst_106 {dimension_numbers = #tpu.dot_dimension_numbers<[1], [1], [0], [0], [0, 0, 1, 0], [], []>} : vector<16x32xbf16>, vector<16x32xbf16>, vector<16x16xf32> -> vector<16x16xf32>
    %cst_107 = arith.constant -1.000000e+30 : f32
    %371 = vector.broadcast %cst_107 : f32 to vector<16x16xf32>
    %372 = arith.select %34, %370, %371 : vector<16x16xi1>, vector<16x16xf32>
    %cst_108 = arith.constant dense<0xFF800000> : vector<16xf32>
    %373 = vector.multi_reduction <maximumf>, %372, %cst_108 [1] : vector<16x16xf32> to vector<16xf32>
    %374 = vector.shape_cast %373 : vector<16xf32> to vector<16x1xf32>
    %375 = vector.broadcast %374 : vector<16x1xf32> to vector<16x16xf32>
    %376 = arith.subf %372, %375 : vector<16x16xf32>
    %377 = math.exp %376 : vector<16x16xf32>
    %cst_109 = arith.constant dense<0.000000e+00> : vector<16xf32>
    %378 = vector.multi_reduction <add>, %377, %cst_109 [1] : vector<16x16xf32> to vector<16xf32>
    %379 = vector.shape_cast %378 : vector<16xf32> to vector<16x1xf32>
    %380 = tpu.reciprocal %379 : vector<16x1xf32> -> vector<16x1xf32>
    %381 = vector.broadcast %380 : vector<16x1xf32> to vector<16x16xf32>
    %382 = arith.mulf %377, %381 : vector<16x16xf32>
    %383 = arith.truncf %382 : vector<16x16xf32> to vector<16x16xbf16>
    %cst_110 = arith.constant dense<0.000000e+00> : vector<16x32xf32>
    %384 = tpu.matmul %383, %369, %cst_110 {dimension_numbers = #tpu.dot_dimension_numbers<[1], [0], [0], [1], [0, 0, 1, 1], [], []>} : vector<16x16xbf16>, vector<16x32xbf16>, vector<16x32xf32> -> vector<16x32xf32>
    %385 = vector.extract_strided_slice %300 {offsets = [0, 128], sizes = [16, 32], strides = [1, 1]} : vector<16x768xf32> to vector<16x32xf32>
    %386 = arith.truncf %385 : vector<16x32xf32> to vector<16x32xbf16>
    %387 = vector.extract_strided_slice %300 {offsets = [0, 384], sizes = [16, 32], strides = [1, 1]} : vector<16x768xf32> to vector<16x32xf32>
    %388 = arith.truncf %387 : vector<16x32xf32> to vector<16x32xbf16>
    %389 = vector.extract_strided_slice %300 {offsets = [0, 640], sizes = [16, 32], strides = [1, 1]} : vector<16x768xf32> to vector<16x32xf32>
    %390 = arith.truncf %389 : vector<16x32xf32> to vector<16x32xbf16>
    %cst_111 = arith.constant dense<0.000000e+00> : vector<16x16xf32>
    %391 = tpu.matmul %386, %388, %cst_111 {dimension_numbers = #tpu.dot_dimension_numbers<[1], [1], [0], [0], [0, 0, 1, 0], [], []>} : vector<16x32xbf16>, vector<16x32xbf16>, vector<16x16xf32> -> vector<16x16xf32>
    %cst_112 = arith.constant -1.000000e+30 : f32
    %392 = vector.broadcast %cst_112 : f32 to vector<16x16xf32>
    %393 = arith.select %34, %391, %392 : vector<16x16xi1>, vector<16x16xf32>
    %cst_113 = arith.constant dense<0xFF800000> : vector<16xf32>
    %394 = vector.multi_reduction <maximumf>, %393, %cst_113 [1] : vector<16x16xf32> to vector<16xf32>
    %395 = vector.shape_cast %394 : vector<16xf32> to vector<16x1xf32>
    %396 = vector.broadcast %395 : vector<16x1xf32> to vector<16x16xf32>
    %397 = arith.subf %393, %396 : vector<16x16xf32>
    %398 = math.exp %397 : vector<16x16xf32>
    %cst_114 = arith.constant dense<0.000000e+00> : vector<16xf32>
    %399 = vector.multi_reduction <add>, %398, %cst_114 [1] : vector<16x16xf32> to vector<16xf32>
    %400 = vector.shape_cast %399 : vector<16xf32> to vector<16x1xf32>
    %401 = tpu.reciprocal %400 : vector<16x1xf32> -> vector<16x1xf32>
    %402 = vector.broadcast %401 : vector<16x1xf32> to vector<16x16xf32>
    %403 = arith.mulf %398, %402 : vector<16x16xf32>
    %404 = arith.truncf %403 : vector<16x16xf32> to vector<16x16xbf16>
    %cst_115 = arith.constant dense<0.000000e+00> : vector<16x32xf32>
    %405 = tpu.matmul %404, %390, %cst_115 {dimension_numbers = #tpu.dot_dimension_numbers<[1], [0], [0], [1], [0, 0, 1, 1], [], []>} : vector<16x16xbf16>, vector<16x32xbf16>, vector<16x32xf32> -> vector<16x32xf32>
    %406 = vector.extract_strided_slice %300 {offsets = [0, 160], sizes = [16, 32], strides = [1, 1]} : vector<16x768xf32> to vector<16x32xf32>
    %407 = arith.truncf %406 : vector<16x32xf32> to vector<16x32xbf16>
    %408 = vector.extract_strided_slice %300 {offsets = [0, 416], sizes = [16, 32], strides = [1, 1]} : vector<16x768xf32> to vector<16x32xf32>
    %409 = arith.truncf %408 : vector<16x32xf32> to vector<16x32xbf16>
    %410 = vector.extract_strided_slice %300 {offsets = [0, 672], sizes = [16, 32], strides = [1, 1]} : vector<16x768xf32> to vector<16x32xf32>
    %411 = arith.truncf %410 : vector<16x32xf32> to vector<16x32xbf16>
    %cst_116 = arith.constant dense<0.000000e+00> : vector<16x16xf32>
    %412 = tpu.matmul %407, %409, %cst_116 {dimension_numbers = #tpu.dot_dimension_numbers<[1], [1], [0], [0], [0, 0, 1, 0], [], []>} : vector<16x32xbf16>, vector<16x32xbf16>, vector<16x16xf32> -> vector<16x16xf32>
    %cst_117 = arith.constant -1.000000e+30 : f32
    %413 = vector.broadcast %cst_117 : f32 to vector<16x16xf32>
    %414 = arith.select %34, %412, %413 : vector<16x16xi1>, vector<16x16xf32>
    %cst_118 = arith.constant dense<0xFF800000> : vector<16xf32>
    %415 = vector.multi_reduction <maximumf>, %414, %cst_118 [1] : vector<16x16xf32> to vector<16xf32>
    %416 = vector.shape_cast %415 : vector<16xf32> to vector<16x1xf32>
    %417 = vector.broadcast %416 : vector<16x1xf32> to vector<16x16xf32>
    %418 = arith.subf %414, %417 : vector<16x16xf32>
    %419 = math.exp %418 : vector<16x16xf32>
    %cst_119 = arith.constant dense<0.000000e+00> : vector<16xf32>
    %420 = vector.multi_reduction <add>, %419, %cst_119 [1] : vector<16x16xf32> to vector<16xf32>
    %421 = vector.shape_cast %420 : vector<16xf32> to vector<16x1xf32>
    %422 = tpu.reciprocal %421 : vector<16x1xf32> -> vector<16x1xf32>
    %423 = vector.broadcast %422 : vector<16x1xf32> to vector<16x16xf32>
    %424 = arith.mulf %419, %423 : vector<16x16xf32>
    %425 = arith.truncf %424 : vector<16x16xf32> to vector<16x16xbf16>
    %cst_120 = arith.constant dense<0.000000e+00> : vector<16x32xf32>
    %426 = tpu.matmul %425, %411, %cst_120 {dimension_numbers = #tpu.dot_dimension_numbers<[1], [0], [0], [1], [0, 0, 1, 1], [], []>} : vector<16x16xbf16>, vector<16x32xbf16>, vector<16x32xf32> -> vector<16x32xf32>
    %427 = vector.extract_strided_slice %300 {offsets = [0, 192], sizes = [16, 32], strides = [1, 1]} : vector<16x768xf32> to vector<16x32xf32>
    %428 = arith.truncf %427 : vector<16x32xf32> to vector<16x32xbf16>
    %429 = vector.extract_strided_slice %300 {offsets = [0, 448], sizes = [16, 32], strides = [1, 1]} : vector<16x768xf32> to vector<16x32xf32>
    %430 = arith.truncf %429 : vector<16x32xf32> to vector<16x32xbf16>
    %431 = vector.extract_strided_slice %300 {offsets = [0, 704], sizes = [16, 32], strides = [1, 1]} : vector<16x768xf32> to vector<16x32xf32>
    %432 = arith.truncf %431 : vector<16x32xf32> to vector<16x32xbf16>
    %cst_121 = arith.constant dense<0.000000e+00> : vector<16x16xf32>
    %433 = tpu.matmul %428, %430, %cst_121 {dimension_numbers = #tpu.dot_dimension_numbers<[1], [1], [0], [0], [0, 0, 1, 0], [], []>} : vector<16x32xbf16>, vector<16x32xbf16>, vector<16x16xf32> -> vector<16x16xf32>
    %cst_122 = arith.constant -1.000000e+30 : f32
    %434 = vector.broadcast %cst_122 : f32 to vector<16x16xf32>
    %435 = arith.select %34, %433, %434 : vector<16x16xi1>, vector<16x16xf32>
    %cst_123 = arith.constant dense<0xFF800000> : vector<16xf32>
    %436 = vector.multi_reduction <maximumf>, %435, %cst_123 [1] : vector<16x16xf32> to vector<16xf32>
    %437 = vector.shape_cast %436 : vector<16xf32> to vector<16x1xf32>
    %438 = vector.broadcast %437 : vector<16x1xf32> to vector<16x16xf32>
    %439 = arith.subf %435, %438 : vector<16x16xf32>
    %440 = math.exp %439 : vector<16x16xf32>
    %cst_124 = arith.constant dense<0.000000e+00> : vector<16xf32>
    %441 = vector.multi_reduction <add>, %440, %cst_124 [1] : vector<16x16xf32> to vector<16xf32>
    %442 = vector.shape_cast %441 : vector<16xf32> to vector<16x1xf32>
    %443 = tpu.reciprocal %442 : vector<16x1xf32> -> vector<16x1xf32>
    %444 = vector.broadcast %443 : vector<16x1xf32> to vector<16x16xf32>
    %445 = arith.mulf %440, %444 : vector<16x16xf32>
    %446 = arith.truncf %445 : vector<16x16xf32> to vector<16x16xbf16>
    %cst_125 = arith.constant dense<0.000000e+00> : vector<16x32xf32>
    %447 = tpu.matmul %446, %432, %cst_125 {dimension_numbers = #tpu.dot_dimension_numbers<[1], [0], [0], [1], [0, 0, 1, 1], [], []>} : vector<16x16xbf16>, vector<16x32xbf16>, vector<16x32xf32> -> vector<16x32xf32>
    %448 = vector.extract_strided_slice %300 {offsets = [0, 224], sizes = [16, 32], strides = [1, 1]} : vector<16x768xf32> to vector<16x32xf32>
    %449 = arith.truncf %448 : vector<16x32xf32> to vector<16x32xbf16>
    %450 = vector.extract_strided_slice %300 {offsets = [0, 480], sizes = [16, 32], strides = [1, 1]} : vector<16x768xf32> to vector<16x32xf32>
    %451 = arith.truncf %450 : vector<16x32xf32> to vector<16x32xbf16>
    %452 = vector.extract_strided_slice %300 {offsets = [0, 736], sizes = [16, 32], strides = [1, 1]} : vector<16x768xf32> to vector<16x32xf32>
    %453 = arith.truncf %452 : vector<16x32xf32> to vector<16x32xbf16>
    %cst_126 = arith.constant dense<0.000000e+00> : vector<16x16xf32>
    %454 = tpu.matmul %449, %451, %cst_126 {dimension_numbers = #tpu.dot_dimension_numbers<[1], [1], [0], [0], [0, 0, 1, 0], [], []>} : vector<16x32xbf16>, vector<16x32xbf16>, vector<16x16xf32> -> vector<16x16xf32>
    %cst_127 = arith.constant -1.000000e+30 : f32
    %455 = vector.broadcast %cst_127 : f32 to vector<16x16xf32>
    %456 = arith.select %34, %454, %455 : vector<16x16xi1>, vector<16x16xf32>
    %cst_128 = arith.constant dense<0xFF800000> : vector<16xf32>
    %457 = vector.multi_reduction <maximumf>, %456, %cst_128 [1] : vector<16x16xf32> to vector<16xf32>
    %458 = vector.shape_cast %457 : vector<16xf32> to vector<16x1xf32>
    %459 = vector.broadcast %458 : vector<16x1xf32> to vector<16x16xf32>
    %460 = arith.subf %456, %459 : vector<16x16xf32>
    %461 = math.exp %460 : vector<16x16xf32>
    %cst_129 = arith.constant dense<0.000000e+00> : vector<16xf32>
    %462 = vector.multi_reduction <add>, %461, %cst_129 [1] : vector<16x16xf32> to vector<16xf32>
    %463 = vector.shape_cast %462 : vector<16xf32> to vector<16x1xf32>
    %464 = tpu.reciprocal %463 : vector<16x1xf32> -> vector<16x1xf32>
    %465 = vector.broadcast %464 : vector<16x1xf32> to vector<16x16xf32>
    %466 = arith.mulf %461, %465 : vector<16x16xf32>
    %467 = arith.truncf %466 : vector<16x16xf32> to vector<16x16xbf16>
    %cst_130 = arith.constant dense<0.000000e+00> : vector<16x32xf32>
    %468 = tpu.matmul %467, %453, %cst_130 {dimension_numbers = #tpu.dot_dimension_numbers<[1], [0], [0], [1], [0, 0, 1, 1], [], []>} : vector<16x16xbf16>, vector<16x32xbf16>, vector<16x32xf32> -> vector<16x32xf32>
    %469 = tpu.concatenate %321, %342, %363, %384, %405, %426, %447, %468 in 1 : vector<16x32xf32>, vector<16x32xf32>, vector<16x32xf32>, vector<16x32xf32>, vector<16x32xf32>, vector<16x32xf32>, vector<16x32xf32>, vector<16x32xf32> -> vector<16x256xf32>
    %470 = arith.truncf %469 : vector<16x256xf32> to vector<16x256xbf16>
    %c1_131 = arith.constant 1 : index
    %c0_132 = arith.constant 0 : index
    %c0_133 = arith.constant 0 : index
    %471 = vector.load %arg4[%c1_131, %c0_132, %c0_133] : memref<2x256x256xbf16, #tpu.memory_space<vmem>>, vector<1x256x256xbf16>
    %472 = vector.shape_cast %471 : vector<1x256x256xbf16> to vector<256x256xbf16>
    %cst_134 = arith.constant dense<0.000000e+00> : vector<16x256xf32>
    %473 = tpu.matmul %470, %472, %cst_134 {dimension_numbers = #tpu.dot_dimension_numbers<[1], [0], [0], [1], [0, 0, 1, 1], [], []>} : vector<16x256xbf16>, vector<256x256xbf16>, vector<16x256xf32> -> vector<16x256xf32>
    %474 = vector.broadcast %286 : vector<1x256xf32> to vector<16x256xf32>
    %475 = arith.addf %473, %474 : vector<16x256xf32>
    %476 = arith.addf %283, %475 : vector<16x256xf32>
    %cst_135 = arith.constant dense<0.000000e+00> : vector<16xf32>
    %477 = vector.multi_reduction <add>, %476, %cst_135 [1] : vector<16x256xf32> to vector<16xf32>
    %478 = vector.shape_cast %477 : vector<16xf32> to vector<16x1xf32>
    %cst_136 = arith.constant 2.560000e+02 : f32
    %479 = vector.broadcast %cst_136 : f32 to vector<16x1xf32>
    %480 = arith.divf %478, %479 : vector<16x1xf32>
    %481 = vector.broadcast %480 : vector<16x1xf32> to vector<16x256xf32>
    %482 = arith.subf %476, %481 : vector<16x256xf32>
    %483 = arith.mulf %482, %482 : vector<16x256xf32>
    %cst_137 = arith.constant dense<0.000000e+00> : vector<16xf32>
    %484 = vector.multi_reduction <add>, %483, %cst_137 [1] : vector<16x256xf32> to vector<16xf32>
    %485 = vector.shape_cast %484 : vector<16xf32> to vector<16x1xf32>
    %cst_138 = arith.constant 2.560000e+02 : f32
    %486 = vector.broadcast %cst_138 : f32 to vector<16x1xf32>
    %487 = arith.divf %485, %486 : vector<16x1xf32>
    %cst_139 = arith.constant 9.99999974E-6 : f32
    %488 = vector.broadcast %cst_139 : f32 to vector<16x1xf32>
    %489 = arith.addf %487, %488 : vector<16x1xf32>
    %490 = math.rsqrt %489 : vector<16x1xf32>
    %491 = vector.broadcast %490 : vector<16x1xf32> to vector<16x256xf32>
    %492 = arith.mulf %482, %491 : vector<16x256xf32>
    %493 = vector.broadcast %289 : vector<1x256xf32> to vector<16x256xf32>
    %494 = arith.mulf %492, %493 : vector<16x256xf32>
    %495 = vector.broadcast %290 : vector<1x256xf32> to vector<16x256xf32>
    %496 = arith.addf %494, %495 : vector<16x256xf32>
    %497 = arith.truncf %496 : vector<16x256xf32> to vector<16x256xbf16>
    %c1_140 = arith.constant 1 : index
    %c0_141 = arith.constant 0 : index
    %c0_142 = arith.constant 0 : index
    %498 = vector.load %arg5[%c1_140, %c0_141, %c0_142] : memref<2x256x512xbf16, #tpu.memory_space<vmem>>, vector<1x256x512xbf16>
    %499 = vector.shape_cast %498 : vector<1x256x512xbf16> to vector<256x512xbf16>
    %cst_143 = arith.constant dense<0.000000e+00> : vector<16x512xf32>
    %500 = tpu.matmul %497, %499, %cst_143 {dimension_numbers = #tpu.dot_dimension_numbers<[1], [0], [0], [1], [0, 0, 1, 1], [], []>} : vector<16x256xbf16>, vector<256x512xbf16>, vector<16x512xf32> -> vector<16x512xf32>
    %501 = vector.broadcast %287 : vector<1x512xf32> to vector<16x512xf32>
    %502 = arith.addf %500, %501 : vector<16x512xf32>
    %cst_144 = arith.constant 0.000000e+00 : f32
    %503 = vector.broadcast %cst_144 : f32 to vector<16x512xf32>
    %504 = arith.maximumf %502, %503 : vector<16x512xf32>
    %505 = arith.truncf %504 : vector<16x512xf32> to vector<16x512xbf16>
    %c1_145 = arith.constant 1 : index
    %c0_146 = arith.constant 0 : index
    %c0_147 = arith.constant 0 : index
    %506 = vector.load %arg6[%c1_145, %c0_146, %c0_147] : memref<2x512x256xbf16, #tpu.memory_space<vmem>>, vector<1x512x256xbf16>
    %507 = vector.shape_cast %506 : vector<1x512x256xbf16> to vector<512x256xbf16>
    %cst_148 = arith.constant dense<0.000000e+00> : vector<16x256xf32>
    %508 = tpu.matmul %505, %507, %cst_148 {dimension_numbers = #tpu.dot_dimension_numbers<[1], [0], [0], [1], [0, 0, 1, 1], [], []>} : vector<16x512xbf16>, vector<512x256xbf16>, vector<16x256xf32> -> vector<16x256xf32>
    %509 = vector.broadcast %288 : vector<1x256xf32> to vector<16x256xf32>
    %510 = arith.addf %508, %509 : vector<16x256xf32>
    %511 = arith.addf %496, %510 : vector<16x256xf32>
    %cst_149 = arith.constant dense<0.000000e+00> : vector<16xf32>
    %512 = vector.multi_reduction <add>, %511, %cst_149 [1] : vector<16x256xf32> to vector<16xf32>
    %513 = vector.shape_cast %512 : vector<16xf32> to vector<16x1xf32>
    %cst_150 = arith.constant 2.560000e+02 : f32
    %514 = vector.broadcast %cst_150 : f32 to vector<16x1xf32>
    %515 = arith.divf %513, %514 : vector<16x1xf32>
    %516 = vector.broadcast %515 : vector<16x1xf32> to vector<16x256xf32>
    %517 = arith.subf %511, %516 : vector<16x256xf32>
    %518 = arith.mulf %517, %517 : vector<16x256xf32>
    %cst_151 = arith.constant dense<0.000000e+00> : vector<16xf32>
    %519 = vector.multi_reduction <add>, %518, %cst_151 [1] : vector<16x256xf32> to vector<16xf32>
    %520 = vector.shape_cast %519 : vector<16xf32> to vector<16x1xf32>
    %cst_152 = arith.constant 2.560000e+02 : f32
    %521 = vector.broadcast %cst_152 : f32 to vector<16x1xf32>
    %522 = arith.divf %520, %521 : vector<16x1xf32>
    %cst_153 = arith.constant 9.99999974E-6 : f32
    %523 = vector.broadcast %cst_153 : f32 to vector<16x1xf32>
    %524 = arith.addf %522, %523 : vector<16x1xf32>
    %525 = math.rsqrt %524 : vector<16x1xf32>
    %526 = vector.broadcast %525 : vector<16x1xf32> to vector<16x256xf32>
    %527 = arith.mulf %517, %526 : vector<16x256xf32>
    %528 = vector.broadcast %291 : vector<1x256xf32> to vector<16x256xf32>
    %529 = arith.mulf %527, %528 : vector<16x256xf32>
    %530 = vector.broadcast %292 : vector<1x256xf32> to vector<16x256xf32>
    %531 = arith.addf %529, %530 : vector<16x256xf32>
    %c0_154 = arith.constant 0 : index
    %c0_155 = arith.constant 0 : index
    %532 = vector.load %arg8[%c0_154, %c0_155] : memref<16x256xf32, #tpu.memory_space<vmem>>, vector<16x256xf32>
    tpu.vector_store %arg8[%c0_154, %c0_155], %531 {strides = array<i32>} : memref<16x256xf32, #tpu.memory_space<vmem>>, vector<16x256xf32>,
    return
  }
  func.func @transform_0(%arg0: i32) -> (i32, i32) {
    %c0_i32 = arith.constant 0 : i32
    %c0_i32_0 = arith.constant 0 : i32
    %c0_i32_1 = arith.constant 0 : i32
    return %c0_i32, %c0_i32_0 : i32, i32
  }
  func.func @transform_1(%arg0: i32) -> (i32, i32, i32) {
    %c0_i32 = arith.constant 0 : i32
    %c0_i32_0 = arith.constant 0 : i32
    %c0_i32_1 = arith.constant 0 : i32
    %c0_i32_2 = arith.constant 0 : i32
    return %c0_i32, %c0_i32_0, %c0_i32_1 : i32, i32, i32
  }
  func.func @transform_2(%arg0: i32) -> (i32, i32, i32) {
    %c0_i32 = arith.constant 0 : i32
    %c0_i32_0 = arith.constant 0 : i32
    %c0_i32_1 = arith.constant 0 : i32
    %c0_i32_2 = arith.constant 0 : i32
    return %c0_i32, %c0_i32_0, %c0_i32_1 : i32, i32, i32
  }
  func.func @transform_3(%arg0: i32) -> (i32, i32, i32) {
    %c0_i32 = arith.constant 0 : i32
    %c0_i32_0 = arith.constant 0 : i32
    %c0_i32_1 = arith.constant 0 : i32
    %c0_i32_2 = arith.constant 0 : i32
    return %c0_i32, %c0_i32_0, %c0_i32_1 : i32, i32, i32
  }
  func.func @transform_4(%arg0: i32) -> (i32, i32, i32) {
    %c0_i32 = arith.constant 0 : i32
    %c0_i32_0 = arith.constant 0 : i32
    %c0_i32_1 = arith.constant 0 : i32
    %c0_i32_2 = arith.constant 0 : i32
    return %c0_i32, %c0_i32_0, %c0_i32_1 : i32, i32, i32
  }
  func.func @transform_5(%arg0: i32) -> (i32, i32, i32) {
    %c0_i32 = arith.constant 0 : i32
    %c0_i32_0 = arith.constant 0 : i32
    %c0_i32_1 = arith.constant 0 : i32
    %c0_i32_2 = arith.constant 0 : i32
    return %c0_i32, %c0_i32_0, %c0_i32_1 : i32, i32, i32
  }
  func.func @transform_6(%arg0: i32) -> (i32, i32, i32) {
    %c0_i32 = arith.constant 0 : i32
    %c0_i32_0 = arith.constant 0 : i32
    %c0_i32_1 = arith.constant 0 : i32
    %c0_i32_2 = arith.constant 0 : i32
    return %c0_i32, %c0_i32_0, %c0_i32_1 : i32, i32, i32
  }
  func.func @transform_7(%arg0: i32) -> (i32, i32) {
    %c0_i32 = arith.constant 0 : i32
    %c0_i32_0 = arith.constant 0 : i32
    %c0_i32_1 = arith.constant 0 : i32
    return %c0_i32, %c0_i32_0 : i32, i32
  }
}

</mosaic_0001>

<bundles_post_ra>
// kernel: object_encoder_forward.1
= control target key start
LH: loop header
LB: loop body
LE: loop exit
PB: predicated region body
PF: predicated region fallthrough
CT: control target
= control target key end

     0   :  { %12 = vsyncpa [#allocation3], 0  ;;  %s9313_s0 = inlined_call_operand.vmem [shape: f32[16,256], index: 0, kind: input, shape index: {}]   ;;  %s9314_s1 = inlined_call_operand.hbm [shape: bf16[2,256,768], index: 1, kind: input, shape index: {}]   ;;  %s9315_s2 = inlined_call_operand.vmem [shape: f32[2,1,768], index: 2, kind: input, shape index: {}]   ;;  %s9316_s3 = inlined_call_operand.hbm [shape: bf16[2,256,256], index: 3, kind: input, shape index: {}]   ;;  %s9317_s4 = inlined_call_operand.hbm [shape: bf16[2,256,512], index: 4, kind: input, shape index: {}]   ;;  %s9318_s5 = inlined_call_operand.hbm [shape: bf16[2,512,256], index: 5, kind: input, shape index: {}]   ;;  %s9319_s6 = inlined_call_operand.vmem [shape: f32[2,7,512], index: 6, kind: input, shape index: {}]   ;;  %s9320_s7 = inlined_call_operand.vmem [shape: f32[16,256], index: 7, kind: output, shape index: {}]  }
   0x1   :  { %13 = vsyncpa [#allocation5], 0 }
   0x2   :  { %14 = vsyncpa [#allocation8], 0  ;;  %s8291_s24 = smov [#allocation4]  }
   0x3   :  { %s36_s25 = sshll.u32 %s8291_s24, 4  ;;  %s37_s25 = int_to_ptr.vmem [resolvable:$true] %s36_s25 }
   0x4   :  { %s8213_s26 = scalar_lea.vmem %s37_s25, 8192  ;;  %p8218_p1 = scmp.lt.s32.totalorder %s37_s25, %s37_s25 }
   0x5   :  { %p8214_p0 = scmp.ne.s32.totalorder %s37_s25, %s8213_s26  ;;  %p8219_p2 = scmp.lt.s32.totalorder %s8213_s26, %s8213_s26 }
   0x7   :  { %p8220_p3 = por %p8219_p2, %p8218_p1 }
   0x9   :  { %p8221_p4 = pnand %p8220_p3, %p8214_p0 }
   0xb   :  { %8224 = shalt.err (!%p8221_p4)
}
   0xc   :  { %s8292_s27 = smov 128   ;;  %s8293_s28 = smov 8  }
   0xd   :  { %42 = dma.hbm_to_vmem [thread:$0]  %s9316_s3, 8192, %s37_s25, [#allocation5], %s8292_s27, %s8292_s27, %s8293_s28  }
   0xe   :  { %s8294_s8 = smov [#allocation2]  }
   0xf   :  { %s22_s9 = sshll.u32 %s8294_s8, 4  ;;  %s23_s9 = int_to_ptr.vmem [resolvable:$true] %s22_s9 }
  0x10   :  { %s8233_s10 = scalar_lea.vmem %s23_s9, 24576  ;;  %p8238_p6 = scmp.lt.s32.totalorder %s23_s9, %s23_s9 }
  0x11   :  { %p8234_p5 = scmp.ne.s32.totalorder %s23_s9, %s8233_s10  ;;  %p8239_p7 = scmp.lt.s32.totalorder %s8233_s10, %s8233_s10 }
  0x13   :  { %p8240_p8 = por %p8239_p7, %p8238_p6 }
  0x15   :  { %p8241_p9 = pnand %p8240_p8, %p8234_p5 }
  0x17   :  { %8244 = shalt.err (!%p8241_p9)
}
  0x18   :  { %s8295_s11 = smov 384   ;;  %s8296_s12 = smov 24  }
  0x19   :  { %28 = dma.hbm_to_vmem [thread:$0]  %s9314_s1, 24576, %s23_s9, [#allocation3], %s8295_s11, %s8295_s11, %s8296_s12  }
  0x1a   :  { %s8297_s15 = smov [#allocation6]  }
  0x1b   :  { %s48_s16 = sshll.u32 %s8297_s15, 4  ;;  %s49_s16 = int_to_ptr.vmem [resolvable:$true] %s48_s16 }
  0x1c   :  { %s8253_s3 = scalar_lea.vmem %s49_s16, 16384  ;;  %p8258_p11 = scmp.lt.s32.totalorder %s49_s16, %s49_s16 }
  0x1d   :  { %p8254_p10 = scmp.ne.s32.totalorder %s49_s16, %s8253_s3  ;;  %p8259_p12 = scmp.lt.s32.totalorder %s8253_s3, %s8253_s3 }
  0x1f   :  { %p8260_p13 = por %p8259_p12, %p8258_p11 }
  0x21   :  { %p8261_p0 = pnand %p8260_p13, %p8254_p10 }
  0x23   :  { %8264 = shalt.err (!%p8261_p0)
}
  0x24   :  { %s8298_s17 = smov 256   ;;  %s8299_s18 = smov 16  }
  0x25   :  { %54 = dma.hbm_to_vmem [thread:$0]  %s9317_s4, 16384, %s49_s16, [#allocation5], %s8298_s17, %s8298_s17, %s8299_s18  }
  0x26   :  { %s8300_s21 = smov [#allocation7]  }
  0x27   :  { %s60_s22 = sshll.u32 %s8300_s21, 4  ;;  %s61_s22 = int_to_ptr.vmem [resolvable:$true] %s60_s22 }
  0x28   :  { %s8273_s1 = scalar_lea.vmem %s61_s22, 16384  ;;  %p8278_p2 = scmp.lt.s32.totalorder %s61_s22, %s61_s22 }
  0x29   :  { %p8274_p1 = scmp.ne.s32.totalorder %s61_s22, %s8273_s1  ;;  %p8279_p3 = scmp.lt.s32.totalorder %s8273_s1, %s8273_s1 }
  0x2b   :  { %p8280_p4 = por %p8279_p3, %p8278_p2 }
  0x2d   :  { %p8281_p5 = pnand %p8280_p4, %p8274_p1 }
  0x2f   :  { %8284 = shalt.err (!%p8281_p5)
}
  0x30   :  { %66 = dma.hbm_to_vmem [thread:$0]  %s9318_s5, 16384, %s61_s22, [#allocation8], %s8292_s27, %s8292_s27, %s8293_s28  }
  0x31   :  { %8285 = dma.done.wait [#allocation3], 24576  }
  0x32   :  { %8286 = vsyncadd [#allocation3], 4294942720 }
  0x33   :  { %8287 = dma.done.wait [#allocation5], 24576  }
  0x34   :  { %8288 = vsyncadd [#allocation5], 4294942720 }
  0x35   :  { %8289 = dma.done.wait [#allocation8], 16384  }
  0x36   :  { %8290 = vsyncadd [#allocation8], 4294950912  ;;  %v7287_v0 = vld [vmem:[#allocation2 + $0x15c] ss:$24 sps:$4 sm:$0xff]   ;;  %v7289_v1 = vld [vmem:[#allocation2 + $0x158] ss:$24 sps:$4 sm:$0xff]  }
  0x37   :  { %786 = vmatprep.subr.bf16.mxu1 %v7287_v0  ;;  %v7290_v2 = vld [vmem:[#allocation2 + $0x154] ss:$24 sps:$4 sm:$0xff]   ;;  %v7292_v3 = vld [vmem:[#allocation2 + $0x150] ss:$24 sps:$4 sm:$0xff]   ;;  %v7296_v6 = vld [vmem:[#allocation2 + $0x124] ss:$24 sps:$4 sm:$0xff]  }
  0x38   :  { %787 = vmatpush1.bf16.msra.mxu1 %v7289_v1  ;;  %v7293_v4 = vld [vmem:[#allocation2 + $0x12c] ss:$24 sps:$4 sm:$0xff]   ;;  %v7295_v5 = vld [vmem:[#allocation2 + $0x128] ss:$24 sps:$4 sm:$0xff]   ;;  %743 = vmatprep.subr.bf16.mxu0 %v7290_v2  ;;  %v7299_v8 = vld [vmem:[#allocation2 + $0xfc] ss:$24 sps:$4 sm:$0xff]  }
  0x39   :  { %744 = vmatpush1.bf16.msra.mxu0 %v7292_v3  ;;  %788 = vmatprep.subr.bf16.mxu1 %v7293_v4  ;;  %v7298_v7 = vld [vmem:[#allocation2 + $0x120] ss:$24 sps:$4 sm:$0xff]   ;;  %v7302_v10 = vld [vmem:[#allocation2 + $0xf4] ss:$24 sps:$4 sm:$0xff]   ;;  %v7304_v12 = vld [vmem:[#allocation2 + $0xf0] ss:$24 sps:$4 sm:$0xff]  }
  0x3a   :  { %745 = vmatprep.subr.bf16.mxu0 %v7296_v6  ;;  %v7301_v9 = vld [vmem:[#allocation2 + $0xf8] ss:$24 sps:$4 sm:$0xff]   ;;  %v7305_v11 = vld [vmem:[#allocation2 + $0xcc] ss:$24 sps:$4 sm:$0xff]   ;;  %v7307_v14 = vld [vmem:[#allocation2 + $0xc8] ss:$24 sps:$4 sm:$0xff]  }
  0x3b   :  { %v7308_v13 = vld [vmem:[#allocation2 + $0xc4] ss:$24 sps:$4 sm:$0xff]   ;;  %v7310_v16 = vld [vmem:[#allocation2 + $0xc0] ss:$24 sps:$4 sm:$0xff]   ;;  %v7314_v17 = vld [vmem:[#allocation2 + $0x94] ss:$24 sps:$4 sm:$0xff]  }
  0x3c   :  { %789 = vmatpush1.bf16.msra.mxu1 %v7295_v5  ;;  %v7311_v15 = vld [vmem:[#allocation2 + $0x9c] ss:$24 sps:$4 sm:$0xff]   ;;  %v7313_v18 = vld [vmem:[#allocation2 + $0x98] ss:$24 sps:$4 sm:$0xff]   ;;  %v7317_v19 = vld [vmem:[#allocation2 + $0x6c] ss:$24 sps:$4 sm:$0xff]  }
  0x3d   :  { %790 = vmatprep.subr.bf16.mxu1 %v7299_v8  ;;  %746 = vmatpush1.bf16.msra.mxu0 %v7298_v7  ;;  %v7316_v20 = vld [vmem:[#allocation2 + $0x90] ss:$24 sps:$4 sm:$0xff]   ;;  %v7320_v21 = vld [vmem:[#allocation2 + $0x64] ss:$24 sps:$4 sm:$0xff]   ;;  %v7322_v24 = vld [vmem:[#allocation2 + $0x60] ss:$24 sps:$4 sm:$0xff]   ;;  %v82_v7 = vlaneseq }
  0x3e   :  { %747 = vmatprep.subr.bf16.mxu0 %v7302_v10  ;;  %v7319_v22 = vld [vmem:[#allocation2 + $0x68] ss:$24 sps:$4 sm:$0xff]   ;;  %v7323_v23 = vld [vmem:[#allocation2 + $0x3c] ss:$24 sps:$4 sm:$0xff]   ;;  %v7325_v26 = vld [vmem:[#allocation2 + $0x38] ss:$24 sps:$4 sm:$0xff]  }
  0x3f   :  { %v7326_v25 = vld [vmem:[#allocation2 + $0x34] ss:$24 sps:$4 sm:$0xff]   ;;  %v7328_v28 = vld [vmem:[#allocation2 + $0x30] ss:$24 sps:$4 sm:$0xff]   ;;  %v7332_v29 = vld [vmem:[#allocation2 + $0x4] ss:$24 sps:$4 sm:$0xff]  }
  0x40   :  { %791 = vmatpush1.bf16.msra.mxu1 %v7301_v9  ;;  %v7329_v27 = vld [vmem:[#allocation2 + $0xc] ss:$24 sps:$4 sm:$0xff]   ;;  %v7331_v30 = vld [vmem:[#allocation2 + $0x8] ss:$24 sps:$4 sm:$0xff]   ;;  %v7335_v31 = vld [vmem:[#allocation2 + $0x2dc] ss:$24 sps:$4 sm:$0xff]  }
  0x41   :  { %792 = vmatprep.subr.bf16.mxu1 %v7305_v11  ;;  %748 = vmatpush1.bf16.msra.mxu0 %v7304_v12  ;;  %v7334_v32 = vld [vmem:[#allocation2] ss:$24 sps:$4 sm:$0xff]   ;;  %v7338_v33 = vld [vmem:[#allocation2 + $0x2d4] ss:$24 sps:$4 sm:$0xff]   ;;  %v7340_v36 = vld [vmem:[#allocation2 + $0x2d0] ss:$24 sps:$4 sm:$0xff]  }
  0x42   :  { %749 = vmatprep.subr.bf16.mxu0 %v7308_v13  ;;  %v7337_v34 = vld [vmem:[#allocation2 + $0x2d8] ss:$24 sps:$4 sm:$0xff]   ;;  %v7341_v35 = vld [vmem:[#allocation2 + $0x2ac] ss:$24 sps:$4 sm:$0xff]   ;;  %v7343_v38 = vld [vmem:[#allocation2 + $0x2a8] ss:$24 sps:$4 sm:$0xff]  }
  0x43   :  { %v7344_v37 = vld [vmem:[#allocation2 + $0x2a4] ss:$24 sps:$4 sm:$0xff]   ;;  %v7346_v40 = vld [vmem:[#allocation2 + $0x2a0] ss:$24 sps:$4 sm:$0xff]   ;;  %v7350_v41 = vld [vmem:[#allocation2 + $0x274] ss:$24 sps:$4 sm:$0xff]  }
  0x44   :  { %793 = vmatpush1.bf16.msra.mxu1 %v7307_v14  ;;  %v7347_v39 = vld [vmem:[#allocation2 + $0x27c] ss:$24 sps:$4 sm:$0xff]   ;;  %v7349_v42 = vld [vmem:[#allocation2 + $0x278] ss:$24 sps:$4 sm:$0xff]   ;;  %v7353_v43 = vld [vmem:[#allocation2 + $0x24c] ss:$24 sps:$4 sm:$0xff]  }
  0x45   :  { %794 = vmatprep.subr.bf16.mxu1 %v7311_v15  ;;  %750 = vmatpush1.bf16.msra.mxu0 %v7310_v16  ;;  %v7352_v44 = vld [vmem:[#allocation2 + $0x270] ss:$24 sps:$4 sm:$0xff]   ;;  %v7356_v46 = vld [vmem:[#allocation2 + $0x244] ss:$24 sps:$4 sm:$0xff]   ;;  %v7358_v48 = vld [vmem:[#allocation2 + $0x240] ss:$24 sps:$4 sm:$0xff]  }
  0x46   :  { %751 = vmatprep.subr.bf16.mxu0 %v7314_v17  ;;  %v7355_v45 = vld [vmem:[#allocation2 + $0x248] ss:$24 sps:$4 sm:$0xff]   ;;  %v7359_v49 = vld [vmem:[#allocation2 + $0x21c] ss:$24 sps:$4 sm:$0xff]   ;;  %v7361_v53 = vld [vmem:[#allocation2 + $0x218] ss:$24 sps:$4 sm:$0xff]  }
  0x47   :  { %v126_v47 = vld [vmem:[%s9313_s0 + $0x8] sm:$0xff]  ;;  %v128_v50 = vld [vmem:[%s9313_s0 + $0x18] sm:$0xff]  ;;  %v125_v2 = vld [vmem:[%s9313_s0] sm:$0xff]  ;;  %v8301_v6 = vmov 0.0   ;;  %vm8302_vm0 = vmmov 0   ;;  %v8384_v8 = vshrl.u32 %v82_v7, 7 }
  0x48   :  { %795 = vmatpush1.bf16.msra.mxu1 %v7313_v18  ;;  %v7362_v51 = vld [vmem:[#allocation2 + $0x214] ss:$24 sps:$4 sm:$0xff]   ;;  %v134_v52 = vpack.c.bf16 %v128_v50, %v126_v47  ;;  %v7364_v55 = vld [vmem:[#allocation2 + $0x210] ss:$24 sps:$4 sm:$0xff]   ;;  %v7368_v56 = vld [vmem:[#allocation2 + $0x1e4] ss:$24 sps:$4 sm:$0xff]  }
  0x49   :  { %796 = vmatprep.subr.bf16.mxu1 %v7317_v19  ;;  %752 = vmatpush1.bf16.msra.mxu0 %v7316_v20  ;;  %v7365_v54 = vld [vmem:[#allocation2 + $0x1ec] ss:$24 sps:$4 sm:$0xff]   ;;  %v7367_v57 = vld [vmem:[#allocation2 + $0x1e8] ss:$24 sps:$4 sm:$0xff]   ;;  %v7371_v58 = vld [vmem:[#allocation2 + $0x1bc] ss:$24 sps:$4 sm:$0xff]  }
  0x4a   :  { %753 = vmatprep.subr.bf16.mxu0 %v7320_v21  ;;  %818 = vmatprep.mubr.bf16.mxu1 %v134_v52  ;;  %v7370_v59 = vld [vmem:[#allocation2 + $0x1e0] ss:$24 sps:$4 sm:$0xff]   ;;  %v7374_v60 = vld [vmem:[#allocation2 + $0x1b4] ss:$24 sps:$4 sm:$0xff]   ;;  %v7376_v63 = vld [vmem:[#allocation2 + $0x1b0] ss:$24 sps:$4 sm:$0xff]  }
  0x4b   :  { %775 = vmatprep.mubr.bf16.mxu0 %v134_v52  ;;  %v7373_v61 = vld [vmem:[#allocation2 + $0x1b8] ss:$24 sps:$4 sm:$0xff]   ;;  %v7377_v62 = vld [vmem:[#allocation2 + $0x18c] ss:$24 sps:$4 sm:$0xff]   ;;  %v7379_v1 = vld [vmem:[#allocation2 + $0x188] ss:$24 sps:$4 sm:$0xff]  }
  0x4c   :  { %797 = vmatpush1.bf16.msra.mxu1 %v7319_v22  ;;  %v7380_v0 = vld [vmem:[#allocation2 + $0x184] ss:$24 sps:$4 sm:$0xff]   ;;  %v127_v3 = vld [vmem:[%s9313_s0 + $0x10] sm:$0xff]  ;;  %v7382_v4 = vld [vmem:[#allocation2 + $0x180] ss:$24 sps:$4 sm:$0xff]   ;;  %v8387_v9 = vsub.s32 2, %v8384_v8 }
  0x4d   :  { %798 = vmatprep.subr.bf16.mxu1 %v7323_v23  ;;  %754 = vmatpush1.bf16.msra.mxu0 %v7322_v24  ;;  %v8376_v5 = vpack.c.bf16 %v127_v3, %v125_v2  ;;  %v8392_v10 = vld [vmem:[%s9315_s2] sm:$0x3f]  ;;  %v8399_v15 = vsub.s32 0, %v8384_v8  ;;  %vm875_vm1 = vcmask 261120   ;;  %v7416_v50 = vld [vmem:[#allocation2 + $0x250] ss:$24 sps:$4 sm:$0xff]  }
  0x4e   :  { %755 = vmatprep.subr.bf16.mxu0 %v7326_v25  ;;  %v244_v12 = vrot.slane %v8392_v10, %v8387_v9  ;;  %v7415_v47 = vld [vmem:[#allocation2 + $0x284] ss:$24 sps:$4 sm:$0xff]   ;;  %vm925_vm3 = vcmask 130048   ;;  %s8303_s10 = smov 96   ;;  %s8304_s11 = smov 64   ;;  %vm1906_vm5 = vcmask 523264  }
  0x4f   :  { %v236_v20 = vrot.slane %v8392_v10, %v8399_v15  ;;  %s8305_s12 = smov 32   ;;  %vm1909_vm6 = vcmask 785408  }
  0x50   :  { %799 = vmatpush1.bf16.msra.mxu1 %v7325_v26 }
  0x51   :  { %800 = vmatprep.subr.bf16.mxu1 %v7329_v27  ;;  %756 = vmatpush1.bf16.msra.mxu0 %v7328_v28  ;;  %v7383_v27 = vld [vmem:[#allocation2 + $0x160] ss:$24 sps:$4 sm:$0xff]   ;;  %v7385_v28 = vld [vmem:[#allocation2 + $0x164] ss:$24 sps:$4 sm:$0xff]  }
  0x52   :  { %757 = vmatprep.subr.bf16.mxu0 %v7332_v29  ;;  %v7388_v29 = vld [vmem:[#allocation2 + $0x134] ss:$24 sps:$4 sm:$0xff]  }
  0x54   :  { %801 = vmatpush1.bf16.msra.mxu1 %v7331_v30  ;;  %v7386_v30 = vld [vmem:[#allocation2 + $0x130] ss:$24 sps:$4 sm:$0xff]  }
  0x55   :  { %802 = vmatprep.subr.bf16.mxu1 %v7335_v31  ;;  %758 = vmatpush1.bf16.msra.mxu0 %v7334_v32  ;;  %v7391_v31 = vld [vmem:[#allocation2 + $0x104] ss:$24 sps:$4 sm:$0xff]   ;;  %v7389_v32 = vld [vmem:[#allocation2 + $0x100] ss:$24 sps:$4 sm:$0xff]  }
  0x56   :  { %759 = vmatprep.subr.bf16.mxu0 %v7338_v33  ;;  %v7394_v33 = vld [vmem:[#allocation2 + $0xd4] ss:$24 sps:$4 sm:$0xff]  }
  0x58   :  { %803 = vmatpush2.bf16.msra.mxu1 %v7337_v34  ;;  %v7392_v34 = vld [vmem:[#allocation2 + $0xd0] ss:$24 sps:$4 sm:$0xff]  }
  0x59   :  { %804 = vmatprep.subr.bf16.mxu1 %v7341_v35  ;;  %760 = vmatpush2.bf16.msra.mxu0 %v7340_v36  ;;  %v7397_v35 = vld [vmem:[#allocation2 + $0xa4] ss:$24 sps:$4 sm:$0xff]   ;;  %v7395_v36 = vld [vmem:[#allocation2 + $0xa0] ss:$24 sps:$4 sm:$0xff]  }
  0x5a   :  { %761 = vmatprep.subr.bf16.mxu0 %v7344_v37  ;;  %v7400_v37 = vld [vmem:[#allocation2 + $0x74] ss:$24 sps:$4 sm:$0xff]  }
  0x5c   :  { %805 = vmatpush2.bf16.msra.mxu1 %v7343_v38  ;;  %v7398_v38 = vld [vmem:[#allocation2 + $0x70] ss:$24 sps:$4 sm:$0xff]  }
  0x5d   :  { %806 = vmatprep.subr.bf16.mxu1 %v7347_v39  ;;  %762 = vmatpush2.bf16.msra.mxu0 %v7346_v40  ;;  %v7403_v39 = vld [vmem:[#allocation2 + $0x44] ss:$24 sps:$4 sm:$0xff]   ;;  %v7401_v40 = vld [vmem:[#allocation2 + $0x40] ss:$24 sps:$4 sm:$0xff]  }
  0x5e   :  { %763 = vmatprep.subr.bf16.mxu0 %v7350_v41  ;;  %v7406_v41 = vld [vmem:[#allocation2 + $0x14] ss:$24 sps:$4 sm:$0xff]  }
  0x60   :  { %807 = vmatpush2.bf16.msra.mxu1 %v7349_v42  ;;  %v7404_v42 = vld [vmem:[#allocation2 + $0x10] ss:$24 sps:$4 sm:$0xff]  }
  0x61   :  { %808 = vmatprep.subr.bf16.mxu1 %v7353_v43  ;;  %764 = vmatpush2.bf16.msra.mxu0 %v7352_v44  ;;  %v7409_v43 = vld [vmem:[#allocation2 + $0x2e4] ss:$24 sps:$4 sm:$0xff]   ;;  %v7407_v44 = vld [vmem:[#allocation2 + $0x2e0] ss:$24 sps:$4 sm:$0xff]  }
  0x62   :  { %765 = vmatprep.subr.bf16.mxu0 %v7356_v46  ;;  %v7410_v46 = vld [vmem:[#allocation2 + $0x2b0] ss:$24 sps:$4 sm:$0xff]  }
  0x64   :  { %809 = vmatpush2.bf16.msra.mxu1 %v7355_v45  ;;  %v7412_v45 = vld [vmem:[#allocation2 + $0x2b4] ss:$24 sps:$4 sm:$0xff]  }
  0x65   :  { %810 = vmatprep.subr.bf16.mxu1 %v7359_v49  ;;  %766 = vmatpush2.bf16.msra.mxu0 %v7358_v48  ;;  %v7413_v48 = vld [vmem:[#allocation2 + $0x280] ss:$24 sps:$4 sm:$0xff]   ;;  %v7418_v49 = vld [vmem:[#allocation2 + $0x254] ss:$24 sps:$4 sm:$0xff]  }
  0x66   :  { %767 = vmatprep.subr.bf16.mxu0 %v7362_v51  ;;  %v7421_v51 = vld [vmem:[#allocation2 + $0x224] ss:$24 sps:$4 sm:$0xff]  }
  0x68   :  { %811 = vmatpush2.bf16.msra.mxu1 %v7361_v53  ;;  %v7424_v53 = vld [vmem:[#allocation2 + $0x1f4] ss:$24 sps:$4 sm:$0xff]  }
  0x69   :  { %812 = vmatprep.subr.bf16.mxu1 %v7365_v54  ;;  %768 = vmatpush2.bf16.msra.mxu0 %v7364_v55  ;;  %v7422_v54 = vld [vmem:[#allocation2 + $0x1f0] ss:$24 sps:$4 sm:$0xff]   ;;  %v7427_v55 = vld [vmem:[#allocation2 + $0x1c4] ss:$24 sps:$4 sm:$0xff]  }
  0x6a   :  { %769 = vmatprep.subr.bf16.mxu0 %v7368_v56  ;;  %v7425_v56 = vld [vmem:[#allocation2 + $0x1c0] ss:$24 sps:$4 sm:$0xff]  }
  0x6c   :  { %813 = vmatpush2.bf16.msra.mxu1 %v7367_v57  ;;  %v7430_v57 = vld [vmem:[#allocation2 + $0x194] ss:$24 sps:$4 sm:$0xff]  }
  0x6d   :  { %814 = vmatprep.subr.bf16.mxu1 %v7371_v58  ;;  %770 = vmatpush2.bf16.msra.mxu0 %v7370_v59  ;;  %v7428_v58 = vld [vmem:[#allocation2 + $0x190] ss:$24 sps:$4 sm:$0xff]   ;;  %v110_v59 = vand.u32 127, %v82_v7 }
  0x6e   :  { %771 = vmatprep.subr.bf16.mxu0 %v7374_v60 }
  0x6f   :  { %v115_v60 = vand.u32 1, %v110_v59 }
  0x70   :  { %815 = vmatpush2.bf16.msra.mxu1 %v7373_v61  ;;  %v89_v61 = vand.u32 1, %v8384_v8 }
  0x71   :  { %816 = vmatprep.subr.bf16.mxu1 %v7377_v62  ;;  %772 = vmatpush2.bf16.msra.mxu0 %v7376_v63  ;;  %v84_v62 = vadd.s32 8, %v8384_v8 }
  0x72   :  { %773 = vmatprep.subr.bf16.mxu0 %v7380_v0  ;;  %vm8422_vm2 = vcmp.eq.s32.totalorder %v89_v61, %v115_v60 }
  0x74   :  { %817 = vmatpush2.bf16.msra.mxu1 %v7379_v1  ;;  %v96_v1 = vand.u32 1, %v84_v62 }
  0x75   :  { %774 = vmatpush2.bf16.msra.mxu0 %v7382_v4  ;;  %7020 = vmatprep.subr.bf16.mxu1 %v8301_v6 }
  0x76   :  { %829 = vmatprep.subr.bf16.mxu0 %v7385_v28  ;;  %vm8429_vm4 = vcmp.eq.s32.totalorder %v96_v1, %v115_v60 }
  0x77   :  { %819 = vmatmul.mubr.bf16.vlgmr.msra.gmra.mxu1 %v8376_v5 }
  0x78   :  { %776 = vmatmul.mubr.bf16.vlgmr.msra.gmra.mxu0 %v8376_v5  ;;  %7022 = vmatprep.mubr.msk.bf16.mxu1 %vm8302_vm0, %v8301_v6 }
  0x79   :  { %861 = vmatprep.mubr.bf16.mxu0 %v134_v52  ;;  %830 = vmatpush1.bf16.msra.mxu0 %v7383_v27  ;;  %v7419_v52 = vld [vmem:[#allocation2 + $0x220] ss:$24 sps:$4 sm:$0xff]  }
  0x7a   :  { %831 = vmatprep.subr.bf16.mxu0 %v7388_v29 }
  0x7d   :  { %832 = vmatpush1.bf16.msra.mxu0 %v7386_v30 }
  0x7e   :  { %833 = vmatprep.subr.bf16.mxu0 %v7391_v31  ;;  %v8443_v31 = vsub.s32 4, %v8384_v8 }
  0x81   :  { %834 = vmatpush1.bf16.msra.mxu0 %v7389_v32 }
  0x82   :  { %835 = vmatprep.subr.bf16.mxu0 %v7394_v33  ;;  %v252_v33 = vrot.slane %v8392_v10, %v8443_v31 }
  0x85   :  { %836 = vmatpush1.bf16.msra.mxu0 %v7392_v34 }
  0x86   :  { %837 = vmatprep.subr.bf16.mxu0 %v7397_v35 }
  0x89   :  { %838 = vmatpush1.bf16.msra.mxu0 %v7395_v36 }
  0x8a   :  { %839 = vmatprep.subr.bf16.mxu0 %v7400_v37 }
  0x8d   :  { %840 = vmatpush1.bf16.msra.mxu0 %v7398_v38 }
  0x8e   :  { %841 = vmatprep.subr.bf16.mxu0 %v7403_v39 }
  0x91   :  { %842 = vmatpush1.bf16.msra.mxu0 %v7401_v40 }
  0x92   :  { %843 = vmatprep.subr.bf16.mxu0 %v7406_v41 }
  0x95   :  { %844 = vmatpush1.bf16.msra.mxu0 %v7404_v42 }
  0x96   :  { %845 = vmatprep.subr.bf16.mxu0 %v7409_v43 }
  0x99   :  { %846 = vmatpush2.bf16.msra.mxu0 %v7407_v44 }
  0x9a   :  { %847 = vmatprep.subr.bf16.mxu0 %v7412_v45 }
  0x9d   :  { %848 = vmatpush2.bf16.msra.mxu0 %v7410_v46 }
  0x9e   :  { %849 = vmatprep.subr.bf16.mxu0 %v7415_v47 }
  0xa1   :  { %850 = vmatpush2.bf16.msra.mxu0 %v7413_v48 }
  0xa2   :  { %851 = vmatprep.subr.bf16.mxu0 %v7418_v49 }
  0xa5   :  { %852 = vmatpush2.bf16.msra.mxu0 %v7416_v50 }
  0xa6   :  { %853 = vmatprep.subr.bf16.mxu0 %v7421_v51 }
  0xa9   :  { %854 = vmatpush2.bf16.msra.mxu0 %v7419_v52 }
  0xaa   :  { %855 = vmatprep.subr.bf16.mxu0 %v7424_v53 }
  0xad   :  { %856 = vmatpush2.bf16.msra.mxu0 %v7422_v54 }
  0xae   :  { %857 = vmatprep.subr.bf16.mxu0 %v7427_v55 }
  0xb1   :  { %858 = vmatpush2.bf16.msra.mxu0 %v7425_v56 }
  0xb2   :  { %859 = vmatprep.subr.bf16.mxu0 %v7430_v57 }
  0xb5   :  { %860 = vmatpush2.bf16.msra.mxu0 %v7428_v58 }
  0xb8   :  { %862 = vmatmul.mubr.bf16.vlgmr.msra.gmra.mxu0 %v8376_v5 }
 0x137   :  { %v820_v11 = vpop.f32.mrf.mxu1 }
 0x138   :  { %v777_v13 = vpop.f32.mrf.mxu0  ;;  %v821_v17 = vadd.f32 %v820_v11, %v244_v12 }
 0x139   :  { %v8396_v14 = vpop.f32.mrf.mxu1  ;;  %v778_v24 = vadd.f32 %v777_v13, %v236_v20 }
 0x13a   :  { %v8401_v19 = vpop.f32.mrf.mxu0 }
 0x13b   :  { %v824_v16 = vpop.f32.mrf.mxu1 }
 0x13c   :  { %v825_v18 = vadd.f32 %v824_v16, %v244_v12  ;;  %v781_v23 = vpop.f32.mrf.mxu0 }
 0x13d   :  { %v782_v25 = vadd.f32 %v781_v23, %v236_v20  ;;  %v8420_v63 = vpop.f32.mrf.mxu1 }
 0x13e   :  { %v8405_v21 = vpack.c.bf16 %v825_v18, %v821_v17  ;;  %v8440_v30 = vpop.f32.mrf.mxu0 }
 0x13f   :  { %v8410_v26 = vpack.c.bf16 %v782_v25, %v778_v24 }
 0x140   :  { %v880_v22 = vsel %vm875_vm1, %v8405_v21, 0 }
 0x141   :  { %7021 = vmatpush3.bf16.xpose.msra.mxu1 %v880_v22 }
 0x142   :  { %7026 = vmatprep.subr.bf16.mxu1 %v8301_v6 }
 0x148   :  { %7023 = vmatmul.mubr.msk.bf16.vlgmr.msra.gmra.mxu1 %vm875_vm1, %v8410_v26 }
 0x149   :  { %7028 = vmatprep.mubr.msk.bf16.mxu1 %vm8302_vm0, %v8301_v6 }
 0x178   :  { %v863_v32 = vpop.f32.mrf.mxu0 }
 0x179   :  { %v864_v35 = vadd.f32 %v863_v32, %v252_v33 }
 0x17a   :  { %v8447_v34 = vpop.f32.mrf.mxu0 }
 0x17c   :  { %v867_v36 = vpop.f32.mrf.mxu0 }
 0x17d   :  { %v868_v37 = vadd.f32 %v867_v36, %v252_v33 }
 0x17f   :  { %v8449_v38 = vpack.c.bf16 %v868_v37, %v864_v35 }
 0x181   :  { %7027 = vmatpush3.bf16.msra.mxu1 %v8449_v38 }
 0x182   :  { %7032 = vmatprep.subr.bf16.mxu1 %v8301_v6 }
 0x208   :  { %v916_v2 = vpop.f32.mrf.mxu1 }
 0x209   :  { %v923_v3 = vsel %vm8422_vm2, %v916_v2, -1e+30 }
 0x20a   :  { %v7024_v4 = vpop.f32.mrf.mxu1  ;;  %v926_v5 = vsel %vm925_vm3, %v923_v3, -inf }
 0x20b   :  { %927 = vmax.xlane.f32.xlu0 %v926_v5 }
 0x20c   :  { %v919_v11 = vpop.f32.mrf.mxu1 }
 0x20d   :  { %v924_v12 = vsel %vm8429_vm4, %v919_v11, -1e+30 }
 0x20e   :  { %v7025_v13 = vpop.f32.mrf.mxu1  ;;  %v929_v16 = vsel %vm925_vm3, %v924_v12, -inf }
 0x20f   :  { %930 = vmax.xlane.f32.xlu0 %v929_v16 }
 0x225   :  { %997 = vrot.lane.b32.xlu0 %v8405_v21, %s8303_s10 }
 0x294   :  { %v928_v17 = vpop.xlane.xlu0 %927 }
 0x295   :  { %v932_v18 = vsub.f32 %v923_v3, %v928_v17 }
 0x297   :  { %v934_v20 = vmul.f32 1.442695, %v932_v18 }
 0x298   :  { %v931_v22 = vpop.xlane.xlu0 %930 }
 0x299   :  { %8055 = vpow2.f32 %v934_v20  ;;  %v933_v23 = vsub.f32 %v924_v12, %v931_v22 }
 0x29b   :  { %v936_v24 = vmul.f32 1.442695, %v933_v23 }
 0x29c   :  { %v998_v45 = vpop.permute.xlu0 %997 }
 0x29d   :  { %8057 = vpow2.f32 %v936_v24  ;;  %v1003_v47 = vsel %vm875_vm1, %v998_v45, 0 }
 0x2a6   :  { %v8056_v25 = vpop.eup %8055 }
 0x2a7   :  { %v938_v27 = vsel %vm925_vm3, %v8056_v25, 0.0 }
 0x2a8   :  { %939 = vadd.xlane.f32.xlu1 %v938_v27 }
 0x2aa   :  { %v8058_v28 = vpop.eup %8057 }
 0x2ab   :  { %v941_v29 = vsel %vm925_vm3, %v8058_v28, 0.0 }
 0x2ac   :  { %942 = vadd.xlane.f32.xlu1 %v941_v29 }
 0x2bd   :  { %994 = vrot.lane.b32.xlu1 %v8410_v26, %s8303_s10 }
 0x331   :  { %v940_v39 = vpop.xlane.xlu1 %939 }
 0x332   :  { %8059 = vrcp.f32 %v940_v39 }
 0x335   :  { %v943_v40 = vpop.xlane.xlu1 %942 }
 0x336   :  { %8061 = vrcp.f32 %v943_v40 }
 0x339   :  { %v995_v48 = vpop.permute.xlu1 %994 }
 0x33f   :  { %v8060_v41 = vpop.eup %8059 }
 0x340   :  { %v946_v43 = vmul.f32 %v8060_v41, %v8056_v25 }
 0x343   :  { %v8062_v42 = vpop.eup %8061 }
 0x344   :  { %v947_v44 = vmul.f32 %v8062_v42, %v8058_v28 }
 0x346   :  { %v948_v46 = vpack.c.bf16 %v947_v44, %v946_v43 }
 0x348   :  { %7029 = vmatmul.mubr.msk.bf16.vlgmr.msra.gmra.mxu1 %vm925_vm3, %v948_v46 }
 0x349   :  { %7033 = vmatpush3.bf16.xpose.msra.mxu1 %v1003_v47  ;;  %7034 = vmatprep.mubr.msk.bf16.mxu1 %vm8302_vm0, %v8301_v6 }
 0x34a   :  { %7038 = vmatprep.subr.bf16.mxu1 %v8301_v6 }
 0x350   :  { %7035 = vmatmul.mubr.msk.bf16.vlgmr.msra.gmra.mxu1 %vm875_vm1, %v995_v48 }
 0x351   :  { %7040 = vmatprep.mubr.msk.bf16.mxu1 %vm8302_vm0, %v8301_v6 }
 0x408   :  { %v8463_v49 = vpop.f32.mrf.mxu1 }
 0x40a   :  { %v7030_v50 = vpop.f32.mrf.mxu1 }
 0x40c   :  { %v8465_v51 = vpop.f32.mrf.mxu1 }
 0x40e   :  { %v7031_v52 = vpop.f32.mrf.mxu1 }
 0x410   :  { %v1039_v53 = vpop.f32.mrf.mxu1 }
 0x411   :  { %v1046_v54 = vsel %vm8422_vm2, %v1039_v53, -1e+30 }
 0x412   :  { %v7036_v55 = vpop.f32.mrf.mxu1  ;;  %v1048_v56 = vsel %vm925_vm3, %v1046_v54, -inf }
 0x413   :  { %1049 = vmax.xlane.f32.xlu1 %v1048_v56 }
 0x414   :  { %v1042_v57 = vpop.f32.mrf.mxu1 }
 0x415   :  { %v1047_v58 = vsel %vm8429_vm4, %v1042_v57, -1e+30 }
 0x416   :  { %v7037_v59 = vpop.f32.mrf.mxu1  ;;  %v1051_v60 = vsel %vm925_vm3, %v1047_v58, -inf }
 0x417   :  { %1052 = vmax.xlane.f32.xlu0 %v1051_v60 }
 0x49c   :  { %v1050_v61 = vpop.xlane.xlu1 %1049 }
 0x49d   :  { %v1054_v62 = vsub.f32 %v1046_v54, %v1050_v61 }
 0x49f   :  { %v1056_v1 = vmul.f32 1.442695, %v1054_v62 }
 0x4a0   :  { %v1053_v2 = vpop.xlane.xlu0 %1052 }
 0x4a1   :  { %8063 = vpow2.f32 %v1056_v1  ;;  %v1055_v3 = vsub.f32 %v1047_v58, %v1053_v2 }
 0x4a3   :  { %v1058_v4 = vmul.f32 1.442695, %v1055_v3 }
 0x4a5   :  { %8065 = vpow2.f32 %v1058_v4 }
 0x4ae   :  { %v8064_v5 = vpop.eup %8063 }
 0x4af   :  { %v1060_v11 = vsel %vm925_vm3, %v8064_v5, 0.0 }
 0x4b0   :  { %1061 = vadd.xlane.f32.xlu0 %v1060_v11 }
 0x4b2   :  { %v8066_v12 = vpop.eup %8065 }
 0x4b3   :  { %v1063_v13 = vsel %vm925_vm3, %v8066_v12, 0.0 }
 0x4b4   :  { %1064 = vadd.xlane.f32.xlu1 %v1063_v13 }
 0x4c5   :  { %1121 = vrot.lane.b32.xlu1 %v8405_v21, %s8304_s11 }
 0x4c6   :  { %1072 = vrot.lane.b32.xlu0 %v8449_v38, %s8303_s10 }
 0x4c9   :  { %1119 = vrot.lane.b32.xlu1 %v8410_v26, %s8304_s11 }
 0x539   :  { %v1062_v16 = vpop.xlane.xlu0 %1061 }
 0x53a   :  { %8067 = vrcp.f32 %v1062_v16 }
 0x53d   :  { %v1065_v17 = vpop.xlane.xlu1 %1064  ;;  %v1073_v18 = vpop.permute.xlu0 %1072 }
 0x53e   :  { %8069 = vrcp.f32 %v1065_v17  ;;  %7039 = vmatpush3.bf16.msra.mxu1 %v1073_v18 }
 0x53f   :  { %7044 = vmatprep.subr.bf16.mxu1 %v8301_v6 }
 0x541   :  { %v1122_v25 = vpop.permute.xlu1 %1121 }
 0x542   :  { %v1127_v28 = vsel %vm875_vm1, %v1122_v25, 0 }
 0x545   :  { %v1120_v29 = vpop.permute.xlu1 %1119 }
 0x547   :  { %v8068_v20 = vpop.eup %8067 }
 0x548   :  { %v1068_v23 = vmul.f32 %v8068_v20, %v8064_v5 }
 0x54b   :  { %v8070_v22 = vpop.eup %8069 }
 0x54c   :  { %v1069_v24 = vmul.f32 %v8070_v22, %v8066_v12 }
 0x54e   :  { %v1070_v27 = vpack.c.bf16 %v1069_v24, %v1068_v23 }
 0x550   :  { %7041 = vmatmul.mubr.msk.bf16.vlgmr.msra.gmra.mxu1 %vm925_vm3, %v1070_v27 }
 0x551   :  { %7045 = vmatpush3.bf16.xpose.msra.mxu1 %v1127_v28  ;;  %7046 = vmatprep.mubr.msk.bf16.mxu1 %vm8302_vm0, %v8301_v6 }
 0x552   :  { %7050 = vmatprep.subr.bf16.mxu1 %v8301_v6 }
 0x558   :  { %7047 = vmatmul.mubr.msk.bf16.vlgmr.msra.gmra.mxu1 %vm875_vm1, %v1120_v29 }
 0x559   :  { %7052 = vmatprep.mubr.msk.bf16.mxu1 %vm8302_vm0, %v8301_v6 }
 0x610   :  { %v8490_v32 = vpop.f32.mrf.mxu1 }
 0x612   :  { %v7042_v33 = vpop.f32.mrf.mxu1 }
 0x614   :  { %v8492_v35 = vpop.f32.mrf.mxu1 }
 0x615   :  { %v7232_v36 = vpack.i.bf16 %v8492_v35, %v8490_v32 }
 0x616   :  { %v7043_v37 = vpop.f32.mrf.mxu1 }
 0x618   :  { %v1163_v39 = vpop.f32.mrf.mxu1 }
 0x619   :  { %v1170_v40 = vsel %vm8422_vm2, %v1163_v39, -1e+30 }
 0x61a   :  { %v7048_v41 = vpop.f32.mrf.mxu1  ;;  %v1172_v42 = vsel %vm925_vm3, %v1170_v40, -inf }
 0x61b   :  { %1173 = vmax.xlane.f32.xlu1 %v1172_v42 }
 0x61c   :  { %v1166_v43 = vpop.f32.mrf.mxu1 }
 0x61d   :  { %v1171_v44 = vsel %vm8429_vm4, %v1166_v43, -1e+30 }
 0x61e   :  { %v7049_v45 = vpop.f32.mrf.mxu1  ;;  %v1175_v46 = vsel %vm925_vm3, %v1171_v44, -inf }
 0x61f   :  { %1176 = vmax.xlane.f32.xlu0 %v1175_v46  ;;  %v8534_v46 = vsub.s32 1, %v8384_v8 }
 0x62c   :  { %1195 = vrot.lane.b32.xlu1 %v8449_v38, %s8304_s11 }
 0x630   :  { %1242 = vrot.lane.b32.xlu1 %v8410_v26, %s8305_s12 }
 0x6a4   :  { %v1174_v47 = vpop.xlane.xlu1 %1173 }
 0x6a5   :  { %v1178_v48 = vsub.f32 %v1170_v40, %v1174_v47  ;;  %v240_v47 = vrot.slane %v8392_v10, %v8534_v46 }
 0x6a7   :  { %v1180_v50 = vmul.f32 1.442695, %v1178_v48  ;;  %v780_v48 = vadd.f32 %v8401_v19, %v240_v47  ;;  %v8548_v19 = vsub.s32 3, %v8384_v8 }
 0x6a8   :  { %v1196_v52 = vpop.permute.xlu1 %1195  ;;  %v1177_v53 = vpop.xlane.xlu0 %1176 }
 0x6a9   :  { %8071 = vpow2.f32 %v1180_v50  ;;  %v1179_v54 = vsub.f32 %v1171_v44, %v1177_v53  ;;  %7051 = vmatpush3.bf16.msra.mxu1 %v1196_v52  ;;  %v784_v50 = vadd.f32 %v8440_v30, %v240_v47  ;;  %v248_v30 = vrot.slane %v8392_v10, %v8548_v19 }
 0x6aa   :  { %7056 = vmatprep.subr.bf16.mxu1 %v8301_v6 }
 0x6ab   :  { %v1182_v55 = vmul.f32 1.442695, %v1179_v54  ;;  %v8542_v52 = vpack.c.bf16 %v784_v50, %v780_v48 }
 0x6ad   :  { %8073 = vpow2.f32 %v1182_v55 }
 0x6b6   :  { %v8072_v56 = vpop.eup %8071 }
 0x6b7   :  { %v1184_v57 = vsel %vm925_vm3, %v8072_v56, 0.0 }
 0x6b8   :  { %1185 = vadd.xlane.f32.xlu0 %v1184_v57  ;;  %v823_v57 = vadd.f32 %v8396_v14, %v248_v30 }
 0x6ba   :  { %v8074_v58 = vpop.eup %8073 }
 0x6bb   :  { %v1187_v59 = vsel %vm925_vm3, %v8074_v58, 0.0 }
 0x6bc   :  { %1188 = vadd.xlane.f32.xlu0 %v1187_v59  ;;  %v8555_v59 = vsub.s32 5, %v8384_v8 }
 0x6d2   :  { %1244 = vrot.lane.b32.xlu0 %v8405_v21, %s8305_s12  ;;  %v1243_v21 = vpop.permute.xlu1 %1242 }
 0x741   :  { %v1186_v26 = vpop.xlane.xlu0 %1185 }
 0x742   :  { %8075 = vrcp.f32 %v1186_v26 }
 0x745   :  { %v1189_v60 = vpop.xlane.xlu0 %1188 }
 0x746   :  { %8077 = vrcp.f32 %v1189_v60 }
 0x749   :  { %v1245_v3 = vpop.permute.xlu0 %1244 }
 0x74a   :  { %v1250_v5 = vsel %vm875_vm1, %v1245_v3, 0 }
 0x74f   :  { %v8076_v61 = vpop.eup %8075 }
 0x750   :  { %v1192_v1 = vmul.f32 %v8076_v61, %v8072_v56 }
 0x753   :  { %v8078_v62 = vpop.eup %8077 }
 0x754   :  { %v1193_v2 = vmul.f32 %v8078_v62, %v8074_v58 }
 0x756   :  { %v1194_v4 = vpack.c.bf16 %v1193_v2, %v1192_v1  ;;  %v256_v1 = vrot.slane %v8392_v10, %v8555_v59  ;;  %v869_v2 = vpop.f32.mrf.mxu0 }
 0x758   :  { %7053 = vmatmul.mubr.msk.bf16.vlgmr.msra.gmra.mxu1 %vm925_vm3, %v1194_v4  ;;  %v866_v14 = vadd.f32 %v8447_v34, %v256_v1  ;;  %v870_v3 = vadd.f32 %v869_v2, %v256_v1 }
 0x759   :  { %7057 = vmatpush3.bf16.xpose.msra.mxu1 %v1250_v5  ;;  %7058 = vmatprep.mubr.msk.bf16.mxu1 %vm8302_vm0, %v8301_v6 }
 0x75a   :  { %7062 = vmatprep.subr.bf16.mxu1 %v8301_v6  ;;  %v8568_v4 = vpack.c.bf16 %v870_v3, %v866_v14 }
 0x760   :  { %7059 = vmatmul.mubr.msk.bf16.vlgmr.msra.gmra.mxu1 %vm875_vm1, %v1243_v21 }
 0x761   :  { %7064 = vmatprep.mubr.msk.bf16.mxu1 %vm8302_vm0, %v8301_v6 }
 0x818   :  { %v8519_v11 = vpop.f32.mrf.mxu1 }
 0x81a   :  { %v7054_v12 = vpop.f32.mrf.mxu1 }
 0x81c   :  { %v8521_v13 = vpop.f32.mrf.mxu1 }
 0x81d   :  { %v7242_v16 = vpack.i.bf16 %v8521_v13, %v8519_v11 }
 0x81e   :  { %v7055_v17 = vpop.f32.mrf.mxu1 }
 0x820   :  { %v1286_v18 = vpop.f32.mrf.mxu1 }
 0x821   :  { %v1293_v20 = vsel %vm8422_vm2, %v1286_v18, -1e+30 }
 0x822   :  { %v7060_v22 = vpop.f32.mrf.mxu1  ;;  %v1295_v23 = vsel %vm925_vm3, %v1293_v20, -inf }
 0x823   :  { %1296 = vmax.xlane.f32.xlu1 %v1295_v23 }
 0x824   :  { %v1289_v24 = vpop.f32.mrf.mxu1 }
 0x825   :  { %v1294_v25 = vsel %vm8429_vm4, %v1289_v24, -1e+30 }
 0x826   :  { %v7061_v27 = vpop.f32.mrf.mxu1  ;;  %v1298_v28 = vsel %vm925_vm3, %v1294_v25, -inf }
 0x827   :  { %1299 = vmax.xlane.f32.xlu0 %v1298_v28 }
 0x8ac   :  { %v1297_v29 = vpop.xlane.xlu1 %1296 }
 0x8ad   :  { %v1301_v33 = vsub.f32 %v1293_v20, %v1297_v29 }
 0x8af   :  { %v1303_v37 = vmul.f32 1.442695, %v1301_v33 }
 0x8b0   :  { %v1300_v39 = vpop.xlane.xlu0 %1299 }
 0x8b1   :  { %8079 = vpow2.f32 %v1303_v37  ;;  %v1302_v40 = vsub.f32 %v1294_v25, %v1300_v39 }
 0x8b3   :  { %v1305_v41 = vmul.f32 1.442695, %v1302_v40 }
 0x8b5   :  { %8081 = vpow2.f32 %v1305_v41 }
 0x8be   :  { %v8080_v42 = vpop.eup %8079 }
 0x8bf   :  { %v1307_v43 = vsel %vm925_vm3, %v8080_v42, 0.0 }
 0x8c0   :  { %1308 = vadd.xlane.f32.xlu0 %v1307_v43 }
 0x8c2   :  { %v8082_v44 = vpop.eup %8081 }
 0x8c3   :  { %v1310_v45 = vsel %vm925_vm3, %v8082_v44, 0.0 }
 0x8c4   :  { %1311 = vadd.xlane.f32.xlu1 %v1310_v45 }
 0x8d6   :  { %1318 = vrot.lane.b32.xlu0 %v8449_v38, %s8305_s12  ;;  %v827_v38 = vadd.f32 %v8420_v63, %v248_v30 }
 0x8d8   :  { %v8557_v26 = vpack.c.bf16 %v827_v38, %v823_v57 }
 0x8da   :  { %1485 = vrot.lane.b32.xlu0 %v8542_v52, %s8303_s10  ;;  %v1372_v63 = vsel %vm875_vm1, %v8557_v26, 0 }
 0x949   :  { %v1309_v53 = vpop.xlane.xlu0 %1308 }
 0x94a   :  { %8083 = vrcp.f32 %v1309_v53 }
 0x94d   :  { %v1312_v54 = vpop.xlane.xlu1 %1311  ;;  %v1319_v55 = vpop.permute.xlu0 %1318 }
 0x94e   :  { %8085 = vrcp.f32 %v1312_v54  ;;  %7063 = vmatpush3.bf16.msra.mxu1 %v1319_v55 }
 0x94f   :  { %7068 = vmatprep.subr.bf16.mxu1 %v8301_v6 }
 0x957   :  { %v8084_v56 = vpop.eup %8083 }
 0x958   :  { %v1315_v60 = vmul.f32 %v8084_v56, %v8080_v42  ;;  %v1486_v56 = vpop.permute.xlu0 %1485 }
 0x95b   :  { %v8086_v58 = vpop.eup %8085 }
 0x95c   :  { %v1316_v61 = vmul.f32 %v8086_v58, %v8082_v44 }
 0x95e   :  { %v1317_v62 = vpack.c.bf16 %v1316_v61, %v1315_v60 }
 0x960   :  { %7065 = vmatmul.mubr.msk.bf16.vlgmr.msra.gmra.mxu1 %vm925_vm3, %v1317_v62 }
 0x961   :  { %7069 = vmatpush3.bf16.xpose.msra.mxu1 %v1372_v63  ;;  %7070 = vmatprep.mubr.msk.bf16.mxu1 %vm8302_vm0, %v8301_v6 }
 0x962   :  { %7074 = vmatprep.subr.bf16.mxu1 %v8301_v6 }
 0x968   :  { %7071 = vmatmul.mubr.msk.bf16.vlgmr.msra.gmra.mxu1 %vm875_vm1, %v8542_v52 }
 0x969   :  { %7075 = vmatpush3.bf16.msra.mxu1 %v8568_v4  ;;  %7076 = vmatprep.mubr.msk.bf16.mxu1 %vm8302_vm0, %v8301_v6 }
 0x96a   :  { %7080 = vmatprep.subr.bf16.mxu1 %v8301_v6 }
 0xa20   :  { %v8576_v10 = vpop.f32.mrf.mxu1 }
 0xa22   :  { %v7066_v5 = vpop.f32.mrf.mxu1 }
 0xa24   :  { %v8578_v21 = vpop.f32.mrf.mxu1 }
 0xa25   :  { %v7252_v34 = vpack.i.bf16 %v8578_v21, %v8576_v10 }
 0xa26   :  { %v7067_v12 = vpop.f32.mrf.mxu1 }
 0xa28   :  { %v1408_v17 = vpop.f32.mrf.mxu1 }
 0xa29   :  { %v1415_v18 = vsel %vm8422_vm2, %v1408_v17, -1e+30 }
 0xa2a   :  { %v7072_v20 = vpop.f32.mrf.mxu1  ;;  %v1417_v22 = vsel %vm925_vm3, %v1415_v18, -inf }
 0xa2b   :  { %1418 = vmax.xlane.f32.xlu1 %v1417_v22 }
 0xa2c   :  { %v1411_v23 = vpop.f32.mrf.mxu1 }
 0xa2d   :  { %v1416_v24 = vsel %vm8429_vm4, %v1411_v23, -1e+30 }
 0xa2e   :  { %v7073_v25 = vpop.f32.mrf.mxu1  ;;  %v1420_v27 = vsel %vm925_vm3, %v1416_v24, -inf }
 0xa2f   :  { %1421 = vmax.xlane.f32.xlu1 %v1420_v27 }
 0xab4   :  { %v1419_v28 = vpop.xlane.xlu1 %1418 }
 0xab5   :  { %v1423_v29 = vsub.f32 %v1415_v18, %v1419_v28 }
 0xab7   :  { %v1425_v33 = vmul.f32 1.442695, %v1423_v29 }
 0xab8   :  { %v1422_v37 = vpop.xlane.xlu1 %1421 }
 0xab9   :  { %8087 = vpow2.f32 %v1425_v33  ;;  %v1424_v39 = vsub.f32 %v1416_v24, %v1422_v37 }
 0xabb   :  { %v1427_v40 = vmul.f32 1.442695, %v1424_v39 }
 0xabd   :  { %8089 = vpow2.f32 %v1427_v40 }
 0xac6   :  { %v8088_v41 = vpop.eup %8087 }
 0xac7   :  { %v1429_v42 = vsel %vm925_vm3, %v8088_v41, 0.0 }
 0xac8   :  { %1430 = vadd.xlane.f32.xlu1 %v1429_v42 }
 0xaca   :  { %v8090_v43 = vpop.eup %8089 }
 0xacb   :  { %v1432_v44 = vsel %vm925_vm3, %v8090_v43, 0.0 }
 0xacc   :  { %1433 = vadd.xlane.f32.xlu1 %v1432_v44 }
 0xadd   :  { %1488 = vrot.lane.b32.xlu1 %v8557_v26, %s8303_s10 }
 0xb51   :  { %v1431_v45 = vpop.xlane.xlu1 %1430 }
 0xb52   :  { %8091 = vrcp.f32 %v1431_v45 }
 0xb55   :  { %v1434_v47 = vpop.xlane.xlu1 %1433 }
 0xb56   :  { %8093 = vrcp.f32 %v1434_v47 }
 0xb59   :  { %v1489_v55 = vpop.permute.xlu1 %1488 }
 0xb5a   :  { %v1494_v38 = vsel %vm875_vm1, %v1489_v55, 0 }
 0xb5f   :  { %v8092_v48 = vpop.eup %8091 }
 0xb60   :  { %v1437_v53 = vmul.f32 %v8092_v48, %v8088_v41 }
 0xb63   :  { %v8094_v50 = vpop.eup %8093 }
 0xb64   :  { %v1438_v54 = vmul.f32 %v8094_v50, %v8090_v43 }
 0xb66   :  { %v1439_v30 = vpack.c.bf16 %v1438_v54, %v1437_v53 }
 0xb68   :  { %7077 = vmatmul.mubr.msk.bf16.vlgmr.msra.gmra.mxu1 %vm925_vm3, %v1439_v30 }
 0xb69   :  { %7081 = vmatpush3.bf16.xpose.msra.mxu1 %v1494_v38  ;;  %7082 = vmatprep.mubr.msk.bf16.mxu1 %vm8302_vm0, %v8301_v6 }
 0xb6a   :  { %7086 = vmatprep.subr.bf16.mxu1 %v8301_v6 }
 0xb70   :  { %7083 = vmatmul.mubr.msk.bf16.vlgmr.msra.gmra.mxu1 %vm875_vm1, %v1486_v56 }
 0xb71   :  { %7088 = vmatprep.mubr.msk.bf16.mxu1 %vm8302_vm0, %v8301_v6 }
 0xc28   :  { %v8600_v57 = vpop.f32.mrf.mxu1 }
 0xc2a   :  { %v7078_v58 = vpop.f32.mrf.mxu1 }
 0xc2c   :  { %v8602_v60 = vpop.f32.mrf.mxu1 }
 0xc2e   :  { %v7079_v61 = vpop.f32.mrf.mxu1 }
 0xc30   :  { %v1530_v62 = vpop.f32.mrf.mxu1 }
 0xc31   :  { %v1537_v1 = vsel %vm8422_vm2, %v1530_v62, -1e+30 }
 0xc32   :  { %v7084_v2 = vpop.f32.mrf.mxu1  ;;  %v1539_v63 = vsel %vm925_vm3, %v1537_v1, -inf }
 0xc33   :  { %1540 = vmax.xlane.f32.xlu0 %v1539_v63 }
 0xc34   :  { %v1533_v14 = vpop.f32.mrf.mxu1 }
 0xc35   :  { %v1538_v3 = vsel %vm8429_vm4, %v1533_v14, -1e+30 }
 0xc36   :  { %v7085_v5 = vpop.f32.mrf.mxu1  ;;  %v1542_v12 = vsel %vm925_vm3, %v1538_v3, -inf }
 0xc37   :  { %1543 = vmax.xlane.f32.xlu1 %v1542_v12 }
 0xc48   :  { %1612 = vrot.lane.b32.xlu1 %v8557_v26, %s8304_s11 }
 0xc4c   :  { %1610 = vrot.lane.b32.xlu1 %v8542_v52, %s8304_s11 }
 0xcbc   :  { %v1541_v17 = vpop.xlane.xlu0 %1540 }
 0xcbd   :  { %v1545_v18 = vsub.f32 %v1537_v1, %v1541_v17 }
 0xcbf   :  { %v1547_v20 = vmul.f32 1.442695, %v1545_v18 }
 0xcc0   :  { %v1544_v22 = vpop.xlane.xlu1 %1543 }
 0xcc1   :  { %8095 = vpow2.f32 %v1547_v20  ;;  %v1546_v23 = vsub.f32 %v1538_v3, %v1544_v22 }
 0xcc3   :  { %v1549_v24 = vmul.f32 1.442695, %v1546_v23 }
 0xcc4   :  { %v1613_v44 = vpop.permute.xlu1 %1612 }
 0xcc5   :  { %8097 = vpow2.f32 %v1549_v24  ;;  %v1618_v47 = vsel %vm875_vm1, %v1613_v44, 0 }
 0xcc8   :  { %v1611_v48 = vpop.permute.xlu1 %1610 }
 0xcce   :  { %v8096_v25 = vpop.eup %8095 }
 0xccf   :  { %v1551_v27 = vsel %vm925_vm3, %v8096_v25, 0.0 }
 0xcd0   :  { %1552 = vadd.xlane.f32.xlu0 %v1551_v27 }
 0xcd2   :  { %v8098_v28 = vpop.eup %8097 }
 0xcd3   :  { %v1554_v29 = vsel %vm925_vm3, %v8098_v28, 0.0 }
 0xcd4   :  { %1555 = vadd.xlane.f32.xlu0 %v1554_v29 }
 0xcea   :  { %1563 = vrot.lane.b32.xlu0 %v8568_v4, %s8303_s10 }
 0xd59   :  { %v1553_v33 = vpop.xlane.xlu0 %1552 }
 0xd5a   :  { %8099 = vrcp.f32 %v1553_v33 }
 0xd5d   :  { %v1556_v37 = vpop.xlane.xlu0 %1555 }
 0xd5e   :  { %8101 = vrcp.f32 %v1556_v37 }
 0xd61   :  { %v1564_v39 = vpop.permute.xlu0 %1563 }
 0xd62   :  { %7087 = vmatpush3.bf16.msra.mxu1 %v1564_v39 }
 0xd63   :  { %7092 = vmatprep.subr.bf16.mxu1 %v8301_v6 }
 0xd67   :  { %v8100_v40 = vpop.eup %8099 }
 0xd68   :  { %v1559_v42 = vmul.f32 %v8100_v40, %v8096_v25 }
 0xd6b   :  { %v8102_v41 = vpop.eup %8101 }
 0xd6c   :  { %v1560_v43 = vmul.f32 %v8102_v41, %v8098_v28 }
 0xd6e   :  { %v1561_v45 = vpack.c.bf16 %v1560_v43, %v1559_v42 }
 0xd70   :  { %7089 = vmatmul.mubr.msk.bf16.vlgmr.msra.gmra.mxu1 %vm925_vm3, %v1561_v45 }
 0xd71   :  { %7093 = vmatpush3.bf16.xpose.msra.mxu1 %v1618_v47  ;;  %7094 = vmatprep.mubr.msk.bf16.mxu1 %vm8302_vm0, %v8301_v6 }
 0xd72   :  { %7098 = vmatprep.subr.bf16.mxu1 %v8301_v6 }
 0xd78   :  { %7095 = vmatmul.mubr.msk.bf16.vlgmr.msra.gmra.mxu1 %vm875_vm1, %v1611_v48 }
 0xd79   :  { %7100 = vmatprep.mubr.msk.bf16.mxu1 %vm8302_vm0, %v8301_v6 }
 0xe30   :  { %v8627_v50 = vpop.f32.mrf.mxu1 }
 0xe32   :  { %v7090_v53 = vpop.f32.mrf.mxu1 }
 0xe34   :  { %v8629_v54 = vpop.f32.mrf.mxu1 }
 0xe35   :  { %v7227_v55 = vpack.i.bf16 %v8629_v54, %v8627_v50  ;;  %v7439_v50 = vld [vmem:[#allocation4 + $0x54] ss:$8 sps:$4 sm:$0xff]   ;;  %v7437_v54 = vld [vmem:[#allocation4 + $0x50] ss:$8 sps:$4 sm:$0xff]  }
 0xe36   :  { %v7091_v30 = vpop.f32.mrf.mxu1 }
 0xe38   :  { %v1654_v38 = vpop.f32.mrf.mxu1 }
 0xe39   :  { %v1661_v56 = vsel %vm8422_vm2, %v1654_v38, -1e+30 }
 0xe3a   :  { %v7096_v58 = vpop.f32.mrf.mxu1  ;;  %v1663_v61 = vsel %vm925_vm3, %v1661_v56, -inf }
 0xe3b   :  { %1664 = vmax.xlane.f32.xlu0 %v1663_v61 }
 0xe3c   :  { %v1657_v62 = vpop.f32.mrf.mxu1 }
 0xe3d   :  { %v1662_v1 = vsel %vm8429_vm4, %v1657_v62, -1e+30 }
 0xe3e   :  { %v7097_v2 = vpop.f32.mrf.mxu1  ;;  %v1666_v63 = vsel %vm925_vm3, %v1662_v1, -inf }
 0xe3f   :  { %1667 = vmax.xlane.f32.xlu1 %v1666_v63 }
 0xe50   :  { %1735 = vrot.lane.b32.xlu1 %v8557_v26, %s8305_s12 }
 0xe54   :  { %1733 = vrot.lane.b32.xlu1 %v8542_v52, %s8305_s12 }
 0xec4   :  { %v1665_v14 = vpop.xlane.xlu0 %1664 }
 0xec5   :  { %v1669_v3 = vsub.f32 %v1661_v56, %v1665_v14 }
 0xec7   :  { %v1671_v5 = vmul.f32 1.442695, %v1669_v3 }
 0xec8   :  { %v1668_v12 = vpop.xlane.xlu1 %1667 }
 0xec9   :  { %8103 = vpow2.f32 %v1671_v5  ;;  %v1670_v17 = vsub.f32 %v1662_v1, %v1668_v12 }
 0xecb   :  { %v1673_v18 = vmul.f32 1.442695, %v1670_v17 }
 0xecc   :  { %v1736_v37 = vpop.permute.xlu1 %1735 }
 0xecd   :  { %8105 = vpow2.f32 %v1673_v18  ;;  %v1741_v40 = vsel %vm875_vm1, %v1736_v37, 0  ;;  %v7431_v18 = vld [vmem:[#allocation4 + $0x70] ss:$8 sps:$4 sm:$0xff]   ;;  %v7452_v37 = vld [vmem:[#allocation4] ss:$8 sps:$4 sm:$0xff]  }
 0xed0   :  { %v1734_v41 = vpop.permute.xlu1 %1733 }
 0xed6   :  { %v8104_v20 = vpop.eup %8103 }
 0xed7   :  { %v1675_v22 = vsel %vm925_vm3, %v8104_v20, 0.0 }
 0xed8   :  { %1676 = vadd.xlane.f32.xlu0 %v1675_v22  ;;  %v7436_v22 = vld [vmem:[#allocation4 + $0x64] ss:$8 sps:$4 sm:$0xff]  }
 0xeda   :  { %v8106_v23 = vpop.eup %8105 }
 0xedb   :  { %v1678_v24 = vsel %vm925_vm3, %v8106_v23, 0.0 }
 0xedc   :  { %1679 = vadd.xlane.f32.xlu0 %v1678_v24  ;;  %v7440_v24 = vld [vmem:[#allocation4 + $0x40] ss:$8 sps:$4 sm:$0xff]  }
 0xef2   :  { %1686 = vrot.lane.b32.xlu0 %v8568_v4, %s8304_s11 }
 0xf61   :  { %v1677_v52 = vpop.xlane.xlu0 %1676 }
 0xf62   :  { %8107 = vrcp.f32 %v1677_v52  ;;  %v7445_v52 = vld [vmem:[#allocation4 + $0x34] ss:$8 sps:$4 sm:$0xff]  }
 0xf65   :  { %v1680_v26 = vpop.xlane.xlu0 %1679 }
 0xf66   :  { %8109 = vrcp.f32 %v1680_v26  ;;  %v7443_v26 = vld [vmem:[#allocation4 + $0x30] ss:$8 sps:$4 sm:$0xff]  }
 0xf69   :  { %v1687_v25 = vpop.permute.xlu0 %1686 }
 0xf6a   :  { %7099 = vmatpush3.bf16.msra.mxu1 %v1687_v25  ;;  %v7448_v25 = vld [vmem:[#allocation4 + $0x24] ss:$8 sps:$4 sm:$0xff]  }
 0xf6b   :  { %7104 = vmatprep.subr.bf16.mxu1 %v8301_v6 }
 0xf6f   :  { %v8108_v27 = vpop.eup %8107 }
 0xf70   :  { %v1683_v29 = vmul.f32 %v8108_v27, %v8104_v20  ;;  %v7433_v20 = vld [vmem:[#allocation4 + $0x74] ss:$8 sps:$4 sm:$0xff]   ;;  %v7446_v27 = vld [vmem:[#allocation4 + $0x20] ss:$8 sps:$4 sm:$0xff]  }
 0xf71   :  { %2120 = vmatprep.subr.bf16.mxu0 %v7433_v20 }
 0xf72   :  { %2121 = vmatpush1.bf16.msra.mxu0 %v7431_v18 }
 0xf73   :  { %v8110_v28 = vpop.eup %8109  ;;  %2122 = vmatprep.subr.bf16.mxu0 %v7436_v22 }
 0xf74   :  { %v1684_v33 = vmul.f32 %v8110_v28, %v8106_v23  ;;  %v7434_v23 = vld [vmem:[#allocation4 + $0x60] ss:$8 sps:$4 sm:$0xff]   ;;  %v7451_v28 = vld [vmem:[#allocation4 + $0x14] ss:$8 sps:$4 sm:$0xff]  }
 0xf76   :  { %v1685_v39 = vpack.c.bf16 %v1684_v33, %v1683_v29  ;;  %2123 = vmatpush1.bf16.msra.mxu0 %v7434_v23  ;;  %v7449_v29 = vld [vmem:[#allocation4 + $0x10] ss:$8 sps:$4 sm:$0xff]   ;;  %v7454_v33 = vld [vmem:[#allocation4 + $0x4] ss:$8 sps:$4 sm:$0xff]  }
 0xf77   :  { %2124 = vmatprep.subr.bf16.mxu0 %v7439_v50 }
 0xf78   :  { %7101 = vmatmul.mubr.msk.bf16.vlgmr.msra.gmra.mxu1 %vm925_vm3, %v1685_v39  ;;  %v7457_v39 = vld [vmem:[#allocation4 + $0xf4] ss:$8 sps:$4 sm:$0xff]  }
 0xf79   :  { %7105 = vmatpush3.bf16.xpose.msra.mxu1 %v1741_v40  ;;  %7106 = vmatprep.mubr.msk.bf16.mxu1 %vm8302_vm0, %v8301_v6  ;;  %v7455_v40 = vld [vmem:[#allocation4 + $0xf0] ss:$8 sps:$4 sm:$0xff]  }
 0xf7a   :  { %7110 = vmatprep.subr.bf16.mxu1 %v8301_v6  ;;  %2125 = vmatpush1.bf16.msra.mxu0 %v7437_v54 }
 0xf80   :  { %7107 = vmatmul.mubr.msk.bf16.vlgmr.msra.gmra.mxu1 %vm875_vm1, %v1734_v41  ;;  %v7460_v41 = vld [vmem:[#allocation4 + $0xe4] ss:$8 sps:$4 sm:$0xff]  }
 0xf81   :  { %7112 = vmatprep.mubr.msk.bf16.mxu1 %vm8302_vm0, %v8301_v6 }
0x1038   :  { %v1726_v42 = vpop.f32.mrf.mxu1 }
0x103a   :  { %v7102_v43 = vpop.f32.mrf.mxu1 }
0x103b   :  { %v7463_v43 = vld [vmem:[#allocation4 + $0xd4] ss:$8 sps:$4 sm:$0xff]  }
0x103c   :  { %v1729_v44 = vpop.f32.mrf.mxu1 }
0x103d   :  { %v7237_v62 = vpack.i.bf16 %v1729_v44, %v1726_v42  ;;  %v7458_v42 = vld [vmem:[#allocation4 + $0xe0] ss:$8 sps:$4 sm:$0xff]   ;;  %v7461_v44 = vld [vmem:[#allocation4 + $0xd0] ss:$8 sps:$4 sm:$0xff]  }
0x103e   :  { %v7103_v45 = vpop.f32.mrf.mxu1 }
0x103f   :  { %v7466_v45 = vld [vmem:[#allocation4 + $0xc4] ss:$8 sps:$4 sm:$0xff]  }
0x1040   :  { %v1777_v47 = vpop.f32.mrf.mxu1 }
0x1041   :  { %v1784_v48 = vsel %vm8422_vm2, %v1777_v47, -1e+30  ;;  %v7464_v47 = vld [vmem:[#allocation4 + $0xc0] ss:$8 sps:$4 sm:$0xff]  }
0x1042   :  { %v7108_v53 = vpop.f32.mrf.mxu1  ;;  %v1786_v30 = vsel %vm925_vm3, %v1784_v48, -inf }
0x1043   :  { %1787 = vmax.xlane.f32.xlu1 %v1786_v30  ;;  %v7467_v53 = vld [vmem:[#allocation4 + $0xb0] ss:$8 sps:$4 sm:$0xff]   ;;  %v7472_v30 = vld [vmem:[#allocation4 + $0xa4] ss:$8 sps:$4 sm:$0xff]  }
0x1044   :  { %v1780_v38 = vpop.f32.mrf.mxu1 }
0x1045   :  { %v1785_v56 = vsel %vm8429_vm4, %v1780_v38, -1e+30  ;;  %v7470_v38 = vld [vmem:[#allocation4 + $0xa0] ss:$8 sps:$4 sm:$0xff]  }
0x1046   :  { %v7109_v58 = vpop.f32.mrf.mxu1  ;;  %v1789_v61 = vsel %vm925_vm3, %v1785_v56, -inf }
0x1047   :  { %1790 = vmax.xlane.f32.xlu0 %v1789_v61  ;;  %v7473_v58 = vld [vmem:[#allocation4 + $0x90] ss:$8 sps:$4 sm:$0xff]   ;;  %v7476_v61 = vld [vmem:[#allocation4 + $0x80] ss:$8 sps:$4 sm:$0xff]  }
0x1054   :  { %1809 = vrot.lane.b32.xlu1 %v8568_v4, %s8305_s12 }
0x1058   :  { %7233 = vrot.lane.b32.xlu1 %v7232_v36, %s8305_s12 }
0x105c   :  { %7238 = vrot.lane.b32.xlu1 %v7237_v62, %s8304_s11  ;;  %v7478_v62 = vld [vmem:[#allocation4 + $0x84] ss:$8 sps:$4 sm:$0xff]  }
0x1060   :  { %7243 = vrot.lane.b32.xlu1 %v7242_v16, %s8304_s11 }
0x1064   :  { %7253 = vrot.lane.b32.xlu1 %v7252_v34, %s8303_s10 }
0x10cc   :  { %v1788_v1 = vpop.xlane.xlu1 %1787 }
0x10cd   :  { %v1792_v4 = vsub.f32 %v1784_v48, %v1788_v1  ;;  %v7469_v48 = vld [vmem:[#allocation4 + $0xb4] ss:$8 sps:$4 sm:$0xff]  }
0x10cf   :  { %v1794_v2 = vmul.f32 1.442695, %v1792_v4 }
0x10d0   :  { %v1810_v63 = vpop.permute.xlu1 %1809  ;;  %v1791_v14 = vpop.xlane.xlu0 %1790 }
0x10d1   :  { %8111 = vpow2.f32 %v1794_v2  ;;  %v1793_v32 = vsub.f32 %v1785_v56, %v1791_v14  ;;  %7111 = vmatpush3.bf16.msra.mxu1 %v1810_v63  ;;  %v7475_v56 = vld [vmem:[#allocation4 + $0x94] ss:$8 sps:$4 sm:$0xff]  }
0x10d3   :  { %v1796_v35 = vmul.f32 1.442695, %v1793_v32 }
0x10d4   :  { %v7234_v32 = vpop.permute.xlu1 %7233 }
0x10d5   :  { %8113 = vpow2.f32 %v1796_v35 }
0x10d8   :  { %v7239_v35 = vpop.permute.xlu1 %7238 }
0x10d9   :  { %v7241_v50 = vunpack.i.h.bf16 %v7239_v35  ;;  %v7240_v54 = vunpack.i.l.bf16 %v7239_v35  ;;  %v7481_v35 = vld [vmem:[#allocation6 + $0xe4] ss:$16 sps:$4 sm:$0xff]  }
0x10da   :  { %2626 = vmatprep.subr.bf16.mxu1 %v7481_v35  ;;  %v7538_v35 = vld [vmem:[#allocation6 + $0x1cc] ss:$16 sps:$4 sm:$0xff]  }
0x10de   :  { %v8112_v36 = vpop.eup %8111 }
0x10df   :  { %v1798_v3 = vsel %vm925_vm3, %v8112_v36, 0.0 }
0x10e0   :  { %1799 = vadd.xlane.f32.xlu0 %v1798_v3 }
0x10e2   :  { %v8114_v11 = vpop.eup %8113 }
0x10e3   :  { %v1801_v13 = vsel %vm925_vm3, %v8114_v11, 0.0 }
0x10e4   :  { %1802 = vadd.xlane.f32.xlu0 %v1801_v13 }
0x10fa   :  { %7228 = vrot.lane.b32.xlu0 %v7227_v55, %s8305_s12  ;;  %v7442_v55 = vld [vmem:[#allocation4 + $0x44] ss:$8 sps:$4 sm:$0xff]  }
0x10fb   :  { %2126 = vmatprep.subr.bf16.mxu0 %v7442_v55 }
0x10fc   :  { %2127 = vmatpush1.bf16.msra.mxu0 %v7440_v24 }
0x10fd   :  { %2128 = vmatprep.subr.bf16.mxu0 %v7445_v52 }
0x1100   :  { %2129 = vmatpush1.bf16.msra.mxu0 %v7443_v26 }
0x1101   :  { %2130 = vmatprep.subr.bf16.mxu0 %v7448_v25 }
0x1104   :  { %2131 = vmatpush1.bf16.msra.mxu0 %v7446_v27 }
0x1105   :  { %2132 = vmatprep.subr.bf16.mxu0 %v7451_v28 }
0x1108   :  { %2133 = vmatpush1.bf16.msra.mxu0 %v7449_v29 }
0x1109   :  { %2134 = vmatprep.subr.bf16.mxu0 %v7454_v33 }
0x110c   :  { %2135 = vmatpush1.bf16.msra.mxu0 %v7452_v37  ;;  %v8704_v37 = vld [vmem:[%s9319_s6] sm:$0x7f] }
0x110d   :  { %2136 = vmatprep.subr.bf16.mxu0 %v7457_v39  ;;  %v8709_v39 = vld [vmem:[%s9319_s6 + $0x8] sm:$0x7f] }
0x1110   :  { %2137 = vmatpush2.bf16.msra.mxu0 %v7455_v40  ;;  %v1955_v40 = vrot.slane %v8704_v37, %v8399_v15 }
0x1111   :  { %2138 = vmatprep.subr.bf16.mxu0 %v7460_v41  ;;  %v1959_v41 = vrot.slane %v8709_v39, %v8399_v15 }
0x1114   :  { %2139 = vmatpush2.bf16.msra.mxu0 %v7458_v42 }
0x1115   :  { %2140 = vmatprep.subr.bf16.mxu0 %v7463_v43 }
0x1118   :  { %2141 = vmatpush2.bf16.msra.mxu0 %v7461_v44 }
0x1119   :  { %2142 = vmatprep.subr.bf16.mxu0 %v7466_v45 }
0x111c   :  { %2143 = vmatpush2.bf16.msra.mxu0 %v7464_v47 }
0x111d   :  { %2144 = vmatprep.subr.bf16.mxu0 %v7469_v48  ;;  %v8199_v48 = vld [vmem:[%s9313_s0] sm:$0xff] }
0x1120   :  { %2145 = vmatpush2.bf16.msra.mxu0 %v7467_v53 }
0x1121   :  { %2146 = vmatprep.subr.bf16.mxu0 %v7472_v30  ;;  %v8200_v30 = vld [vmem:[%s9313_s0 + $0x8] sm:$0xff] }
0x1124   :  { %2147 = vmatpush2.bf16.msra.mxu0 %v7470_v38 }
0x1125   :  { %2148 = vmatprep.subr.bf16.mxu0 %v7475_v56 }
0x1128   :  { %2149 = vmatpush2.bf16.msra.mxu0 %v7473_v58 }
0x1129   :  { %2150 = vmatprep.subr.bf16.mxu0 %v7478_v62 }
0x112c   :  { %2151 = vmatpush2.bf16.msra.mxu0 %v7476_v61 }
0x1169   :  { %v1800_v16 = vpop.xlane.xlu0 %1799 }
0x116a   :  { %8115 = vrcp.f32 %v1800_v16 }
0x116d   :  { %v1803_v10 = vpop.xlane.xlu0 %1802 }
0x116e   :  { %8117 = vrcp.f32 %v1803_v10  ;;  %v7236_v10 = vunpack.i.h.bf16 %v7234_v32 }
0x1170   :  { %v1905_v22 = vsel %vm875_vm1, %v8465_v51, %v7236_v10  ;;  %v7488_v10 = vld [vmem:[#allocation6 + $0xc8] ss:$16 sps:$4 sm:$0xff]  }
0x1171   :  { %v7229_v3 = vpop.permute.xlu0 %7228 }
0x1172   :  { %v7231_v13 = vunpack.i.h.bf16 %v7229_v3  ;;  %v7230_v16 = vunpack.i.l.bf16 %v7229_v3  ;;  %v7484_v3 = vld [vmem:[#allocation6 + $0xec] ss:$16 sps:$4 sm:$0xff]  }
0x1173   :  { %2669 = vmatprep.subr.bf16.mxu0 %v7484_v3  ;;  %v7536_v3 = vld [vmem:[#allocation6 + $0x1c8] ss:$16 sps:$4 sm:$0xff]  }
0x1174   :  { %v1913_v18 = vsel %vm875_vm1, %v8602_v60, %v7231_v13  ;;  %v1912_v20 = vsel %vm875_vm1, %v8600_v57, %v7230_v16  ;;  %v7490_v13 = vld [vmem:[#allocation6 + $0xcc] ss:$16 sps:$4 sm:$0xff]   ;;  %v7485_v16 = vld [vmem:[#allocation6 + $0xc0] ss:$16 sps:$4 sm:$0xff]  }
0x1175   :  { %v1914_v57 = vsel %vm1906_vm5, %v1912_v20, %v7240_v54  ;;  %v1915_v51 = vsel %vm1906_vm5, %v1913_v18, %v7241_v50  ;;  %v7502_v18 = vld [vmem:[#allocation6 + $0x8c] ss:$16 sps:$4 sm:$0xff]   ;;  %v7497_v20 = vld [vmem:[#allocation6 + $0x80] ss:$16 sps:$4 sm:$0xff]  }
0x1176   :  { %v7508_v50 = vld [vmem:[#allocation6 + $0x6c] ss:$16 sps:$4 sm:$0xff]   ;;  %v7503_v54 = vld [vmem:[#allocation6 + $0x60] ss:$16 sps:$4 sm:$0xff]  }
0x1177   :  { %v8116_v21 = vpop.eup %8115 }
0x1178   :  { %v1806_v5 = vmul.f32 %v8116_v21, %v8112_v36  ;;  %v7244_v36 = vpop.permute.xlu1 %7243  ;;  %v7235_v21 = vunpack.i.l.bf16 %v7234_v32  ;;  %v7479_v32 = vld [vmem:[#allocation6 + $0xe0] ss:$16 sps:$4 sm:$0xff]  }
0x117a   :  { %v1904_v23 = vsel %vm875_vm1, %v8463_v49, %v7235_v21  ;;  %v7493_v21 = vld [vmem:[#allocation6 + $0xa4] ss:$16 sps:$4 sm:$0xff]  }
0x117b   :  { %v8118_v34 = vpop.eup %8117 }
0x117c   :  { %v1807_v12 = vmul.f32 %v8118_v34, %v8114_v11  ;;  %v7254_v11 = vpop.permute.xlu1 %7253  ;;  %v7246_v34 = vunpack.i.h.bf16 %v7244_v36 }
0x117e   :  { %v1808_v17 = vpack.c.bf16 %v1807_v12, %v1806_v5  ;;  %v7245_v5 = vunpack.i.l.bf16 %v7244_v36  ;;  %v7256_v12 = vunpack.i.h.bf16 %v7254_v11  ;;  %v1908_v52 = vsel %vm1906_vm5, %v1905_v22, %v7246_v34  ;;  %v7482_v36 = vld [vmem:[#allocation6 + $0xe8] ss:$16 sps:$4 sm:$0xff]   ;;  %v7496_v34 = vld [vmem:[#allocation6 + $0xac] ss:$16 sps:$4 sm:$0xff]  }
0x117f   :  { %v7500_v22 = vld [vmem:[#allocation6 + $0x88] ss:$16 sps:$4 sm:$0xff]  }
0x1180   :  { %7113 = vmatmul.mubr.msk.bf16.vlgmr.msra.gmra.mxu1 %vm925_vm3, %v1808_v17  ;;  %v7255_v17 = vunpack.i.l.bf16 %v7254_v11  ;;  %v1907_v24 = vsel %vm1906_vm5, %v1904_v23, %v7245_v5  ;;  %v1911_v27 = vsel %vm1909_vm6, %v1908_v52, %v7256_v12  ;;  %v7487_v11 = vld [vmem:[#allocation6 + $0xc4] ss:$16 sps:$4 sm:$0xff]   ;;  %v7491_v5 = vld [vmem:[#allocation6 + $0xa0] ss:$16 sps:$4 sm:$0xff]   ;;  %v7494_v12 = vld [vmem:[#allocation6 + $0xa8] ss:$16 sps:$4 sm:$0xff]  }
0x1181   :  { %2627 = vmatpush1.bf16.msra.mxu1 %v7479_v32  ;;  %v7505_v23 = vld [vmem:[#allocation6 + $0x64] ss:$16 sps:$4 sm:$0xff]   ;;  %v7514_v52 = vld [vmem:[#allocation6 + $0x4c] ss:$16 sps:$4 sm:$0xff]  }
0x1182   :  { %v1910_v60 = vsel %vm1909_vm6, %v1907_v24, %v7255_v17  ;;  %2628 = vmatprep.subr.bf16.mxu1 %v7487_v11  ;;  %v7499_v17 = vld [vmem:[#allocation6 + $0x84] ss:$16 sps:$4 sm:$0xff]   ;;  %v7539_v11 = vld [vmem:[#allocation6 + $0x1a0] ss:$16 sps:$4 sm:$0xff]  }
0x1183   :  { %v1918_v33 = vpack.c.bf16 %v1911_v27, %v1910_v60  ;;  %v7511_v24 = vld [vmem:[#allocation6 + $0x44] ss:$16 sps:$4 sm:$0xff]   ;;  %v7520_v27 = vld [vmem:[#allocation6 + $0x2c] ss:$16 sps:$4 sm:$0xff]  }
0x1184   :  { %v7517_v60 = vld [vmem:[#allocation6 + $0x24] ss:$16 sps:$4 sm:$0xff]  }
0x1185   :  { %2629 = vmatpush1.bf16.msra.mxu1 %v7485_v16  ;;  %v7535_v32 = vld [vmem:[#allocation6 + $0x1c4] ss:$16 sps:$4 sm:$0xff]  }
0x1186   :  { %2630 = vmatprep.subr.bf16.mxu1 %v7493_v21  ;;  %v7547_v16 = vld [vmem:[#allocation6 + $0x184] ss:$16 sps:$4 sm:$0xff]   ;;  %v7548_v21 = vld [vmem:[#allocation6 + $0x188] ss:$16 sps:$4 sm:$0xff]  }
0x1189   :  { %2631 = vmatpush1.bf16.msra.mxu1 %v7491_v5  ;;  %v7553_v5 = vld [vmem:[#allocation6 + $0x164] ss:$16 sps:$4 sm:$0xff]  }
0x118a   :  { %2632 = vmatprep.subr.bf16.mxu1 %v7499_v17  ;;  %v7551_v17 = vld [vmem:[#allocation6 + $0x160] ss:$16 sps:$4 sm:$0xff]  }
0x118d   :  { %2633 = vmatpush1.bf16.msra.mxu1 %v7497_v20  ;;  %v7559_v20 = vld [vmem:[#allocation6 + $0x144] ss:$16 sps:$4 sm:$0xff]  }
0x118e   :  { %2634 = vmatprep.subr.bf16.mxu1 %v7505_v23  ;;  %v7557_v23 = vld [vmem:[#allocation6 + $0x140] ss:$16 sps:$4 sm:$0xff]  }
0x1191   :  { %2635 = vmatpush1.bf16.msra.mxu1 %v7503_v54  ;;  %v7565_v54 = vld [vmem:[#allocation6 + $0x124] ss:$16 sps:$4 sm:$0xff]  }
0x1192   :  { %2636 = vmatprep.subr.bf16.mxu1 %v7511_v24  ;;  %v7563_v24 = vld [vmem:[#allocation6 + $0x120] ss:$16 sps:$4 sm:$0xff]  }
0x1240   :  { %v1849_v1 = vpop.f32.mrf.mxu1 }
0x1242   :  { %v7114_v4 = vpop.f32.mrf.mxu1 }
0x1244   :  { %v1852_v2 = vpop.f32.mrf.mxu1 }
0x1245   :  { %v7247_v63 = vpack.i.bf16 %v1852_v2, %v1849_v1  ;;  %v8201_v1 = vld [vmem:[%s9313_s0 + $0x10] sm:$0xff]  ;;  %v8202_v2 = vld [vmem:[%s9313_s0 + $0x18] sm:$0xff] }
0x1246   :  { %v7115_v14 = vpop.f32.mrf.mxu1 }
0x1247   :  { %7248 = vrot.lane.b32.xlu0 %v7247_v63, %s8303_s10 }
0x12b9   :  { %v7249_v55 = vpop.permute.xlu0 %7248 }
0x12ba   :  { %v7251_v26 = vunpack.i.h.bf16 %v7249_v55  ;;  %v7250_v25 = vunpack.i.l.bf16 %v7249_v55  ;;  %v7506_v55 = vld [vmem:[#allocation6 + $0x68] ss:$16 sps:$4 sm:$0xff]  }
0x12bc   :  { %v1916_v28 = vsel %vm1909_vm6, %v1914_v57, %v7250_v25  ;;  %v1917_v49 = vsel %vm1909_vm6, %v1915_v51, %v7251_v26  ;;  %v7509_v26 = vld [vmem:[#allocation6 + $0x40] ss:$16 sps:$4 sm:$0xff]   ;;  %v7512_v25 = vld [vmem:[#allocation6 + $0x48] ss:$16 sps:$4 sm:$0xff]  }
0x12bd   :  { %v1919_v29 = vpack.c.bf16 %v1917_v49, %v1916_v28  ;;  %2637 = vmatpush1.bf16.msra.mxu1 %v7509_v26  ;;  %v7515_v57 = vld [vmem:[#allocation6 + $0x20] ss:$16 sps:$4 sm:$0xff]   ;;  %v7518_v51 = vld [vmem:[#allocation6 + $0x28] ss:$16 sps:$4 sm:$0xff]   ;;  %v7523_v28 = vld [vmem:[#allocation6 + $0x4] ss:$16 sps:$4 sm:$0xff]  }
0x12be   :  { %2638 = vmatprep.subr.bf16.mxu1 %v7517_v60  ;;  %v7526_v49 = vld [vmem:[#allocation6 + $0xc] ss:$16 sps:$4 sm:$0xff]   ;;  %v7571_v26 = vld [vmem:[#allocation6 + $0x104] ss:$16 sps:$4 sm:$0xff]   ;;  %v7569_v60 = vld [vmem:[#allocation6 + $0x100] ss:$16 sps:$4 sm:$0xff]  }
0x12bf   :  { %2152 = vmatprep.mubr.bf16.mxu0 %v1919_v29  ;;  %v7521_v29 = vld [vmem:[#allocation6] ss:$16 sps:$4 sm:$0xff]  }
0x12c0   :  { %2153 = vmatmul.mubr.bf16.vlgmr.msra.gmra.mxu0 %v1918_v33  ;;  %v7524_v33 = vld [vmem:[#allocation6 + $0x8] ss:$16 sps:$4 sm:$0xff]  }
0x12c1   :  { %2670 = vmatpush1.bf16.msra.mxu0 %v7482_v36  ;;  %2639 = vmatpush1.bf16.msra.mxu1 %v7515_v57  ;;  %v7533_v36 = vld [vmem:[#allocation6 + $0x1c0] ss:$16 sps:$4 sm:$0xff]   ;;  %v7577_v57 = vld [vmem:[#allocation7 + $0x74] ss:$8 sps:$4 sm:$0xff]  }
0x12c2   :  { %2671 = vmatprep.subr.bf16.mxu0 %v7490_v13  ;;  %2640 = vmatprep.subr.bf16.mxu1 %v7523_v28  ;;  %v7542_v13 = vld [vmem:[#allocation6 + $0x1a8] ss:$16 sps:$4 sm:$0xff]  }
0x12c5   :  { %2672 = vmatpush1.bf16.msra.mxu0 %v7488_v10  ;;  %2641 = vmatpush1.bf16.msra.mxu1 %v7521_v29  ;;  %v7545_v10 = vld [vmem:[#allocation6 + $0x180] ss:$16 sps:$4 sm:$0xff]  }
0x12c6   :  { %2673 = vmatprep.subr.bf16.mxu0 %v7496_v34  ;;  %v7550_v34 = vld [vmem:[#allocation6 + $0x18c] ss:$16 sps:$4 sm:$0xff]  }
0x12c9   :  { %2674 = vmatpush1.bf16.msra.mxu0 %v7494_v12  ;;  %v7556_v12 = vld [vmem:[#allocation6 + $0x16c] ss:$16 sps:$4 sm:$0xff]  }
0x12ca   :  { %2675 = vmatprep.subr.bf16.mxu0 %v7502_v18  ;;  %v7554_v18 = vld [vmem:[#allocation6 + $0x168] ss:$16 sps:$4 sm:$0xff]  }
0x12cd   :  { %2676 = vmatpush1.bf16.msra.mxu0 %v7500_v22  ;;  %v7562_v22 = vld [vmem:[#allocation6 + $0x14c] ss:$16 sps:$4 sm:$0xff]  }
0x12ce   :  { %2677 = vmatprep.subr.bf16.mxu0 %v7508_v50  ;;  %v7560_v50 = vld [vmem:[#allocation6 + $0x148] ss:$16 sps:$4 sm:$0xff]  }
0x12d1   :  { %2678 = vmatpush1.bf16.msra.mxu0 %v7506_v55  ;;  %v7568_v55 = vld [vmem:[#allocation6 + $0x12c] ss:$16 sps:$4 sm:$0xff]  }
0x12d2   :  { %2679 = vmatprep.subr.bf16.mxu0 %v7514_v52  ;;  %v7566_v52 = vld [vmem:[#allocation6 + $0x128] ss:$16 sps:$4 sm:$0xff]  }
0x12d5   :  { %2680 = vmatpush1.bf16.msra.mxu0 %v7512_v25  ;;  %v7574_v25 = vld [vmem:[#allocation6 + $0x10c] ss:$16 sps:$4 sm:$0xff]  }
0x12d6   :  { %2681 = vmatprep.subr.bf16.mxu0 %v7520_v27  ;;  %v7572_v27 = vld [vmem:[#allocation6 + $0x108] ss:$16 sps:$4 sm:$0xff]  }
0x12d9   :  { %2682 = vmatpush1.bf16.msra.mxu0 %v7518_v51  ;;  %v7580_v51 = vld [vmem:[#allocation7 + $0x174] ss:$8 sps:$4 sm:$0xff]  }
0x12da   :  { %2683 = vmatprep.subr.bf16.mxu0 %v7526_v49 }
0x12dd   :  { %2684 = vmatpush1.bf16.msra.mxu0 %v7524_v33 }
0x1380   :  { %v2154_v42 = vpop.f32.mrf.mxu0 }
0x1381   :  { %v2155_v43 = vadd.f32 %v2154_v42, %v1955_v40  ;;  %v7527_v42 = vld [vmem:[#allocation6 + $0x1e0] ss:$16 sps:$4 sm:$0xff]  }
0x1382   :  { %v2156_v44 = vpop.f32.mrf.mxu0 }
0x1383   :  { %v2157_v45 = vadd.f32 %v2156_v44, %v1959_v41  ;;  %v8718_v53 = vadd.f32 %v8199_v48, %v2155_v43  ;;  %v7530_v43 = vld [vmem:[#allocation6 + $0x1e8] ss:$16 sps:$4 sm:$0xff]  }
0x1384   :  { %v2158_v47 = vpop.f32.mrf.mxu0 }
0x1385   :  { %v8723_v38 = vadd.f32 %v8200_v30, %v2157_v45  ;;  %v2159_v56 = vadd.f32 %v2158_v47, %v1955_v40  ;;  %v7529_v40 = vld [vmem:[#allocation6 + $0x1e4] ss:$16 sps:$4 sm:$0xff]  }
0x1386   :  { %v2160_v58 = vpop.f32.mrf.mxu0  ;;  %2642 = vmatprep.subr.bf16.mxu1 %v7529_v40 }
0x1387   :  { %v2161_v61 = vadd.f32 %v2160_v58, %v1959_v41  ;;  %v2167_v62 = vadd.f32 %v8723_v38, %v8718_v53  ;;  %v8730_v4 = vadd.f32 %v8201_v1, %v2159_v56  ;;  %v7532_v41 = vld [vmem:[#allocation6 + $0x1ec] ss:$16 sps:$4 sm:$0xff]   ;;  %2643 = vmatpush2.bf16.msra.mxu1 %v7527_v42 }
0x1388   :  { %2685 = vmatprep.subr.bf16.mxu0 %v7532_v41  ;;  %2644 = vmatprep.subr.bf16.mxu1 %v7535_v32 }
0x1389   :  { %v8735_v63 = vadd.f32 %v8202_v2, %v2161_v61  ;;  %2168 = vadd.xlane.f32.xlu0 %v2167_v62  ;;  %2686 = vmatpush2.bf16.msra.mxu0 %v7530_v43 }
0x138a   :  { %2687 = vmatprep.subr.bf16.mxu0 %v7538_v35 }
0x138b   :  { %v2170_v14 = vadd.f32 %v8735_v63, %v8730_v4  ;;  %2645 = vmatpush2.bf16.msra.mxu1 %v7533_v36 }
0x138d   :  { %2171 = vadd.xlane.f32.xlu1 %v2170_v14  ;;  %2688 = vmatpush2.bf16.msra.mxu0 %v7536_v3 }
0x1412   :  { %v2169_v44 = vpop.xlane.xlu0 %2168 }
0x1413   :  { %v2174_v45 = vmul.f32 0.00390625, %v2169_v44  ;;  %v2207_v44 = vrot.slane %v8709_v39, %v8548_v19 }
0x1415   :  { %v8740_v47 = vsub.f32 %v8718_v53, %v2174_v45  ;;  %v8743_v48 = vsub.f32 %v8723_v38, %v2174_v45 }
0x1416   :  { %v2172_v30 = vpop.xlane.xlu1 %2171 }
0x1417   :  { %v2175_v56 = vmul.f32 0.00390625, %v2172_v30  ;;  %v2180_v58 = vmul.f32 %v8740_v47, %v8740_v47  ;;  %v2181_v61 = vmul.f32 %v8743_v48, %v8743_v48  ;;  %v2203_v30 = vrot.slane %v8704_v37, %v8548_v19 }
0x1419   :  { %v8750_v62 = vsub.f32 %v8730_v4, %v2175_v56  ;;  %v8753_v1 = vsub.f32 %v8735_v63, %v2175_v56  ;;  %v2184_v2 = vadd.f32 %v2181_v61, %v2180_v58  ;;  %v7541_v4 = vld [vmem:[#allocation6 + $0x1a4] ss:$16 sps:$4 sm:$0xff]   ;;  %v7544_v63 = vld [vmem:[#allocation6 + $0x1ac] ss:$16 sps:$4 sm:$0xff]   ;;  %v2219_v58 = vrot.slane %v8709_v39, %v8443_v31 }
0x141a   :  { %2646 = vmatprep.subr.bf16.mxu1 %v7541_v4  ;;  %2689 = vmatprep.subr.bf16.mxu0 %v7544_v63  ;;  %v2215_v61 = vrot.slane %v8704_v37, %v8443_v31  ;;  %v7575_v63 = vld [vmem:[#allocation7 + $0x70] ss:$8 sps:$4 sm:$0xff]  }
0x141b   :  { %2185 = vadd.xlane.f32.xlu0 %v2184_v2  ;;  %v2182_v53 = vmul.f32 %v8750_v62, %v8750_v62  ;;  %v2183_v38 = vmul.f32 %v8753_v1, %v8753_v1  ;;  %2647 = vmatpush2.bf16.msra.mxu1 %v7539_v11  ;;  %v7578_v11 = vld [vmem:[#allocation7 + $0x170] ss:$8 sps:$4 sm:$0xff]  }
0x141c   :  { %2690 = vmatpush2.bf16.msra.mxu0 %v7542_v13  ;;  %2648 = vmatprep.subr.bf16.mxu1 %v7547_v16  ;;  %v7586_v13 = vld [vmem:[#allocation7 + $0x164] ss:$8 sps:$4 sm:$0xff]   ;;  %v7581_v16 = vld [vmem:[#allocation7 + $0x60] ss:$8 sps:$4 sm:$0xff]  }
0x141d   :  { %v2187_v14 = vadd.f32 %v2183_v38, %v2182_v53  ;;  %2691 = vmatprep.subr.bf16.mxu0 %v7550_v34  ;;  %v7592_v34 = vld [vmem:[#allocation7 + $0x154] ss:$8 sps:$4 sm:$0xff]  }
0x141f   :  { %2188 = vadd.xlane.f32.xlu0 %v2187_v14  ;;  %2649 = vmatpush2.bf16.msra.mxu1 %v7545_v10  ;;  %v7584_v10 = vld [vmem:[#allocation7 + $0x160] ss:$8 sps:$4 sm:$0xff]  }
0x1420   :  { %2692 = vmatpush2.bf16.msra.mxu0 %v7548_v21  ;;  %2650 = vmatprep.subr.bf16.mxu1 %v7553_v5  ;;  %v7589_v21 = vld [vmem:[#allocation7 + $0x54] ss:$8 sps:$4 sm:$0xff]   ;;  %v7587_v5 = vld [vmem:[#allocation7 + $0x50] ss:$8 sps:$4 sm:$0xff]  }
0x1421   :  { %2693 = vmatprep.subr.bf16.mxu0 %v7556_v12  ;;  %v7590_v12 = vld [vmem:[#allocation7 + $0x150] ss:$8 sps:$4 sm:$0xff]  }
0x1423   :  { %2651 = vmatpush2.bf16.msra.mxu1 %v7551_v17  ;;  %v7595_v17 = vld [vmem:[#allocation7 + $0x44] ss:$8 sps:$4 sm:$0xff]  }
0x1424   :  { %2694 = vmatpush2.bf16.msra.mxu0 %v7554_v18  ;;  %2652 = vmatprep.subr.bf16.mxu1 %v7559_v20  ;;  %v7598_v18 = vld [vmem:[#allocation7 + $0x144] ss:$8 sps:$4 sm:$0xff]   ;;  %v7593_v20 = vld [vmem:[#allocation7 + $0x40] ss:$8 sps:$4 sm:$0xff]  }
0x1425   :  { %2695 = vmatprep.subr.bf16.mxu0 %v7562_v22  ;;  %v7596_v22 = vld [vmem:[#allocation7 + $0x140] ss:$8 sps:$4 sm:$0xff]  }
0x1427   :  { %2653 = vmatpush2.bf16.msra.mxu1 %v7557_v23  ;;  %v7601_v23 = vld [vmem:[#allocation7 + $0x34] ss:$8 sps:$4 sm:$0xff]  }
0x1428   :  { %2696 = vmatpush2.bf16.msra.mxu0 %v7560_v50  ;;  %2654 = vmatprep.subr.bf16.mxu1 %v7565_v54  ;;  %v7604_v50 = vld [vmem:[#allocation7 + $0x134] ss:$8 sps:$4 sm:$0xff]   ;;  %v7599_v54 = vld [vmem:[#allocation7 + $0x30] ss:$8 sps:$4 sm:$0xff]  }
0x1429   :  { %2697 = vmatprep.subr.bf16.mxu0 %v7568_v55  ;;  %v7602_v55 = vld [vmem:[#allocation7 + $0x130] ss:$8 sps:$4 sm:$0xff]  }
0x142b   :  { %2655 = vmatpush2.bf16.msra.mxu1 %v7563_v24  ;;  %v7607_v24 = vld [vmem:[#allocation7 + $0x24] ss:$8 sps:$4 sm:$0xff]  }
0x142c   :  { %2698 = vmatpush2.bf16.msra.mxu0 %v7566_v52  ;;  %2656 = vmatprep.subr.bf16.mxu1 %v7571_v26  ;;  %v7610_v52 = vld [vmem:[#allocation7 + $0x124] ss:$8 sps:$4 sm:$0xff]   ;;  %v7605_v26 = vld [vmem:[#allocation7 + $0x20] ss:$8 sps:$4 sm:$0xff]  }
0x142d   :  { %2699 = vmatprep.subr.bf16.mxu0 %v7574_v25  ;;  %v7608_v25 = vld [vmem:[#allocation7 + $0x120] ss:$8 sps:$4 sm:$0xff]  }
0x142f   :  { %2657 = vmatpush2.bf16.msra.mxu1 %v7569_v60  ;;  %v7613_v60 = vld [vmem:[#allocation7 + $0x14] ss:$8 sps:$4 sm:$0xff]  }
0x1430   :  { %2700 = vmatpush2.bf16.msra.mxu0 %v7572_v27  ;;  %3116 = vmatprep.subr.bf16.mxu1 %v7577_v57  ;;  %v7616_v27 = vld [vmem:[#allocation7 + $0x114] ss:$8 sps:$4 sm:$0xff]   ;;  %v7611_v57 = vld [vmem:[#allocation7 + $0x10] ss:$8 sps:$4 sm:$0xff]  }
0x1431   :  { %3159 = vmatprep.subr.bf16.mxu0 %v7580_v51  ;;  %v7614_v51 = vld [vmem:[#allocation7 + $0x110] ss:$8 sps:$4 sm:$0xff]  }
0x14a4   :  { %v2186_v28 = vpop.xlane.xlu0 %2185 }
0x14a5   :  { %v2190_v49 = vmul.f32 0.00390625, %v2186_v28  ;;  %v7619_v28 = vld [vmem:[#allocation7 + $0x4] ss:$8 sps:$4 sm:$0xff]  }
0x14a7   :  { %v2192_v29 = vadd.f32 1e-05, %v2190_v49  ;;  %v7622_v49 = vld [vmem:[#allocation7 + $0x104] ss:$8 sps:$4 sm:$0xff]  }
0x14a8   :  { %v2189_v33 = vpop.xlane.xlu0 %2188 }
0x14a9   :  { %8119 = vrsqrt.f32 %v2192_v29  ;;  %v2191_v40 = vmul.f32 0.00390625, %v2189_v33  ;;  %v7617_v29 = vld [vmem:[#allocation7] ss:$8 sps:$4 sm:$0xff]  }
0x14aa   :  { %v7620_v33 = vld [vmem:[#allocation7 + $0x100] ss:$8 sps:$4 sm:$0xff]  }
0x14ab   :  { %v2193_v41 = vadd.f32 1e-05, %v2191_v40  ;;  %v7625_v40 = vld [vmem:[#allocation7 + $0xf4] ss:$8 sps:$4 sm:$0xff]  }
0x14ad   :  { %8121 = vrsqrt.f32 %v2193_v41  ;;  %v7628_v41 = vld [vmem:[#allocation7 + $0x1f4] ss:$8 sps:$4 sm:$0xff]  }
0x14b6   :  { %v8120_v42 = vpop.eup %8119 }
0x14b7   :  { %v2197_v43 = vmul.f32 %v8120_v42, %v8743_v48  ;;  %v2196_v45 = vmul.f32 %v8120_v42, %v8740_v47  ;;  %v7623_v42 = vld [vmem:[#allocation7 + $0xf0] ss:$8 sps:$4 sm:$0xff]  }
0x14b9   :  { %v2209_v53 = vmul.f32 %v2207_v44, %v2197_v43  ;;  %v2208_v38 = vmul.f32 %v2203_v30, %v2196_v45  ;;  %v7626_v43 = vld [vmem:[#allocation7 + $0x1f0] ss:$8 sps:$4 sm:$0xff]   ;;  %v7634_v45 = vld [vmem:[#allocation7 + $0x1e4] ss:$8 sps:$4 sm:$0xff]  }
0x14ba   :  { %v8122_v56 = vpop.eup %8121 }
0x14bb   :  { %v2199_v2 = vmul.f32 %v8122_v56, %v8753_v1  ;;  %v2198_v48 = vmul.f32 %v8122_v56, %v8750_v62  ;;  %v8771_v35 = vadd.f32 %v2219_v58, %v2209_v53  ;;  %v8775_v36 = vadd.f32 %v2215_v61, %v2208_v38  ;;  %v7583_v62 = vld [vmem:[#allocation7 + $0x64] ss:$8 sps:$4 sm:$0xff]   ;;  %v7632_v56 = vld [vmem:[#allocation7 + $0x1e0] ss:$8 sps:$4 sm:$0xff]   ;;  %v7638_v53 = vld [vmem:[#allocation7 + $0x1d0] ss:$8 sps:$4 sm:$0xff]  }
0x14bc   :  { %v7646_v38 = vld [vmem:[#allocation7 + $0x1c4] ss:$8 sps:$4 sm:$0xff]  }
0x14bd   :  { %v2211_v14 = vmul.f32 %v2207_v44, %v2199_v2  ;;  %v2210_v32 = vmul.f32 %v2203_v30, %v2198_v48  ;;  %v7631_v44 = vld [vmem:[#allocation7 + $0xe4] ss:$8 sps:$4 sm:$0xff]   ;;  %v7629_v30 = vld [vmem:[#allocation7 + $0xe0] ss:$8 sps:$4 sm:$0xff]   ;;  %v7635_v2 = vld [vmem:[#allocation7 + $0xd0] ss:$8 sps:$4 sm:$0xff]  }
0x14be   :  { %v7643_v48 = vld [vmem:[#allocation7 + $0xc4] ss:$8 sps:$4 sm:$0xff]  }
0x14bf   :  { %v8773_v47 = vadd.f32 %v2219_v58, %v2211_v14  ;;  %v8777_v3 = vadd.f32 %v2215_v61, %v2210_v32  ;;  %v7637_v58 = vld [vmem:[#allocation7 + $0xd4] ss:$8 sps:$4 sm:$0xff]   ;;  %v7641_v14 = vld [vmem:[#allocation7 + $0xc0] ss:$8 sps:$4 sm:$0xff]  }
0x14c0   :  { %v7640_v61 = vld [vmem:[#allocation7 + $0x1d4] ss:$8 sps:$4 sm:$0xff]   ;;  %v7644_v32 = vld [vmem:[#allocation7 + $0x1c0] ss:$8 sps:$4 sm:$0xff]  }
0x14c1   :  { %v2225_v4 = vpack.c.bf16 %v8773_v47, %v8771_v35  ;;  %v2224_v1 = vpack.c.bf16 %v8777_v3, %v8775_v36 }
0x14c3   :  { %2658 = vmatprep.mubr.bf16.mxu1 %v2225_v4  ;;  %2701 = vmatprep.mubr.bf16.mxu0 %v2225_v4  ;;  %v7649_v4 = vld [vmem:[#allocation7 + $0xb4] ss:$8 sps:$4 sm:$0xff]  }
0x14c4   :  { %2659 = vmatmul.mubr.bf16.vlgmr.msra.gmra.mxu1 %v2224_v1  ;;  %2702 = vmatmul.mubr.bf16.vlgmr.msra.gmra.mxu0 %v2224_v1  ;;  %v7652_v1 = vld [vmem:[#allocation7 + $0x1b4] ss:$8 sps:$4 sm:$0xff]  }
0x14c5   :  { %3117 = vmatpush1.bf16.msra.mxu1 %v7575_v63  ;;  %3160 = vmatpush1.bf16.msra.mxu0 %v7578_v11  ;;  %v7647_v63 = vld [vmem:[#allocation7 + $0xb0] ss:$8 sps:$4 sm:$0xff]  }
0x14c6   :  { %3118 = vmatprep.subr.bf16.mxu1 %v7583_v62  ;;  %3161 = vmatprep.subr.bf16.mxu0 %v7586_v13  ;;  %v7650_v11 = vld [vmem:[#allocation7 + $0x1b0] ss:$8 sps:$4 sm:$0xff]   ;;  %v7655_v62 = vld [vmem:[#allocation7 + $0xa4] ss:$8 sps:$4 sm:$0xff]  }
0x14c7   :  { %v7658_v13 = vld [vmem:[#allocation7 + $0x1a4] ss:$8 sps:$4 sm:$0xff]  }
0x14c9   :  { %3119 = vmatpush1.bf16.msra.mxu1 %v7581_v16  ;;  %3162 = vmatpush1.bf16.msra.mxu0 %v7584_v10  ;;  %v7653_v16 = vld [vmem:[#allocation7 + $0xa0] ss:$8 sps:$4 sm:$0xff]  }
0x14ca   :  { %3120 = vmatprep.subr.bf16.mxu1 %v7589_v21  ;;  %3163 = vmatprep.subr.bf16.mxu0 %v7592_v34  ;;  %v7656_v10 = vld [vmem:[#allocation7 + $0x1a0] ss:$8 sps:$4 sm:$0xff]   ;;  %v7661_v21 = vld [vmem:[#allocation7 + $0x94] ss:$8 sps:$4 sm:$0xff]  }
0x14cb   :  { %v7664_v34 = vld [vmem:[#allocation7 + $0x194] ss:$8 sps:$4 sm:$0xff]  }
0x14cd   :  { %3121 = vmatpush1.bf16.msra.mxu1 %v7587_v5  ;;  %3164 = vmatpush1.bf16.msra.mxu0 %v7590_v12  ;;  %v7659_v5 = vld [vmem:[#allocation7 + $0x90] ss:$8 sps:$4 sm:$0xff]  }
0x14ce   :  { %3122 = vmatprep.subr.bf16.mxu1 %v7595_v17  ;;  %3165 = vmatprep.subr.bf16.mxu0 %v7598_v18  ;;  %v7662_v12 = vld [vmem:[#allocation7 + $0x190] ss:$8 sps:$4 sm:$0xff]   ;;  %v7667_v17 = vld [vmem:[#allocation7 + $0x84] ss:$8 sps:$4 sm:$0xff]  }
0x14cf   :  { %v7670_v18 = vld [vmem:[#allocation7 + $0x184] ss:$8 sps:$4 sm:$0xff]  }
0x14d1   :  { %3123 = vmatpush1.bf16.msra.mxu1 %v7593_v20  ;;  %3166 = vmatpush1.bf16.msra.mxu0 %v7596_v22  ;;  %v7665_v20 = vld [vmem:[#allocation7 + $0x80] ss:$8 sps:$4 sm:$0xff]  }
0x14d2   :  { %3124 = vmatprep.subr.bf16.mxu1 %v7601_v23  ;;  %3167 = vmatprep.subr.bf16.mxu0 %v7604_v50  ;;  %v7668_v22 = vld [vmem:[#allocation7 + $0x180] ss:$8 sps:$4 sm:$0xff]   ;;  %v132_v23 = vld [vmem:[%s9319_s6 + $0x18] sm:$0x7f]  ;;  %v131_v50 = vld [vmem:[%s9319_s6 + $0x10] sm:$0x7f] }
0x14d5   :  { %3125 = vmatpush1.bf16.msra.mxu1 %v7599_v54  ;;  %3168 = vmatpush1.bf16.msra.mxu0 %v7602_v55 }
0x14d6   :  { %3126 = vmatprep.subr.bf16.mxu1 %v7607_v24  ;;  %3169 = vmatprep.subr.bf16.mxu0 %v7610_v52  ;;  %v2297_v24 = vrot.slane %v8709_v39, %v8534_v46  ;;  %v2305_v52 = vrot.slane %v132_v23, %v8534_v46 }
0x14d9   :  { %3127 = vmatpush1.bf16.msra.mxu1 %v7605_v26  ;;  %3170 = vmatpush1.bf16.msra.mxu0 %v7608_v25  ;;  %v2293_v26 = vrot.slane %v8704_v37, %v8534_v46  ;;  %v2301_v25 = vrot.slane %v131_v50, %v8534_v46 }
0x14da   :  { %3128 = vmatprep.subr.bf16.mxu1 %v7613_v60  ;;  %3171 = vmatprep.subr.bf16.mxu0 %v7616_v27 }
0x14dd   :  { %3129 = vmatpush1.bf16.msra.mxu1 %v7611_v57  ;;  %3172 = vmatpush1.bf16.msra.mxu0 %v7614_v51 }
0x14de   :  { %3130 = vmatprep.subr.bf16.mxu1 %v7619_v28  ;;  %3173 = vmatprep.subr.bf16.mxu0 %v7622_v49 }
0x14e1   :  { %3131 = vmatpush1.bf16.msra.mxu1 %v7617_v29  ;;  %3174 = vmatpush1.bf16.msra.mxu0 %v7620_v33 }
0x14e2   :  { %3132 = vmatprep.subr.bf16.mxu1 %v7625_v40  ;;  %3175 = vmatprep.subr.bf16.mxu0 %v7628_v41 }
0x14e5   :  { %3133 = vmatpush2.bf16.msra.mxu1 %v7623_v42  ;;  %3176 = vmatpush2.bf16.msra.mxu0 %v7626_v43 }
0x14e6   :  { %3134 = vmatprep.subr.bf16.mxu1 %v7631_v44  ;;  %3177 = vmatprep.subr.bf16.mxu0 %v7634_v45 }
0x14e9   :  { %3135 = vmatpush2.bf16.msra.mxu1 %v7629_v30  ;;  %3178 = vmatpush2.bf16.msra.mxu0 %v7632_v56 }
0x14ea   :  { %3136 = vmatprep.subr.bf16.mxu1 %v7637_v58  ;;  %3179 = vmatprep.subr.bf16.mxu0 %v7640_v61 }
0x14ed   :  { %3137 = vmatpush2.bf16.msra.mxu1 %v7635_v2  ;;  %3180 = vmatpush2.bf16.msra.mxu0 %v7638_v53 }
0x14ee   :  { %3138 = vmatprep.subr.bf16.mxu1 %v7643_v48  ;;  %3181 = vmatprep.subr.bf16.mxu0 %v7646_v38 }
0x14f1   :  { %3139 = vmatpush2.bf16.msra.mxu1 %v7641_v14  ;;  %3182 = vmatpush2.bf16.msra.mxu0 %v7644_v32 }
0x14f2   :  { %3140 = vmatprep.subr.bf16.mxu1 %v7649_v4  ;;  %3183 = vmatprep.subr.bf16.mxu0 %v7652_v1 }
0x14f5   :  { %3141 = vmatpush2.bf16.msra.mxu1 %v7647_v63  ;;  %3184 = vmatpush2.bf16.msra.mxu0 %v7650_v11  ;;  %v2791_v63 = vrot.slane %v8704_v37, %v8387_v9  ;;  %v2795_v11 = vrot.slane %v8709_v39, %v8387_v9 }
0x14f6   :  { %3142 = vmatprep.subr.bf16.mxu1 %v7655_v62  ;;  %3185 = vmatprep.subr.bf16.mxu0 %v7658_v13 }
0x14f9   :  { %3143 = vmatpush2.bf16.msra.mxu1 %v7653_v16  ;;  %3186 = vmatpush2.bf16.msra.mxu0 %v7656_v10 }
0x14fa   :  { %3144 = vmatprep.subr.bf16.mxu1 %v7661_v21  ;;  %3187 = vmatprep.subr.bf16.mxu0 %v7664_v34 }
0x14fd   :  { %3145 = vmatpush2.bf16.msra.mxu1 %v7659_v5  ;;  %3188 = vmatpush2.bf16.msra.mxu0 %v7662_v12 }
0x14fe   :  { %3146 = vmatprep.subr.bf16.mxu1 %v7667_v17  ;;  %3189 = vmatprep.subr.bf16.mxu0 %v7670_v18 }
0x1501   :  { %3147 = vmatpush2.bf16.msra.mxu1 %v7665_v20  ;;  %3190 = vmatpush2.bf16.msra.mxu0 %v7668_v22 }
0x1584   :  { %v2660_v54 = vpop.f32.mrf.mxu1  ;;  %v2703_v55 = vpop.f32.mrf.mxu0 }
0x1585   :  { %v2661_v40 = vadd.f32 %v2660_v54, %v2293_v26  ;;  %v2704_v41 = vadd.f32 %v2703_v55, %v2301_v25 }
0x1586   :  { %v2662_v60 = vpop.f32.mrf.mxu1  ;;  %v2705_v27 = vpop.f32.mrf.mxu0 }
0x1587   :  { %v2663_v28 = vadd.f32 %v2662_v60, %v2297_v24  ;;  %v2706_v49 = vadd.f32 %v2705_v27, %v2305_v52  ;;  %v2712_v48 = vmax.f32 %v2661_v40, 0.0  ;;  %v2714_v38 = vmax.f32 %v2704_v41, 0.0  ;;  %v7674_v60 = vld [vmem:[#allocation2 + $0x458] ss:$24 sps:$4 sm:$0xff]   ;;  %v7676_v27 = vld [vmem:[#allocation2 + $0x45c] ss:$24 sps:$4 sm:$0xff]  }
0x1588   :  { %v2664_v57 = vpop.f32.mrf.mxu1  ;;  %v2707_v51 = vpop.f32.mrf.mxu0  ;;  %3922 = vmatprep.subr.bf16.mxu0 %v7676_v27  ;;  %v7691_v40 = vld [vmem:[#allocation2 + $0x3c4] ss:$24 sps:$4 sm:$0xff]   ;;  %v7734_v27 = vld [vmem:[#allocation2 + $0x578] ss:$24 sps:$4 sm:$0xff]  }
0x1589   :  { %v2665_v29 = vadd.f32 %v2664_v57, %v2293_v26  ;;  %v2708_v33 = vadd.f32 %v2707_v51, %v2301_v25  ;;  %v2713_v58 = vmax.f32 %v2663_v28, 0.0  ;;  %v2715_v61 = vmax.f32 %v2706_v49, 0.0  ;;  %v7673_v25 = vld [vmem:[#allocation2 + $0x454] ss:$24 sps:$4 sm:$0xff]   ;;  %v7679_v57 = vld [vmem:[#allocation2 + $0x424] ss:$24 sps:$4 sm:$0xff]  }
0x158a   :  { %v2666_v42 = vpop.f32.mrf.mxu1  ;;  %v2709_v43 = vpop.f32.mrf.mxu0  ;;  %3879 = vmatprep.subr.bf16.mxu1 %v7673_v25  ;;  %v7682_v51 = vld [vmem:[#allocation2 + $0x42c] ss:$24 sps:$4 sm:$0xff]   ;;  %v7677_v28 = vld [vmem:[#allocation2 + $0x420] ss:$24 sps:$4 sm:$0xff]   ;;  %v7688_v49 = vld [vmem:[#allocation2 + $0x3fc] ss:$24 sps:$4 sm:$0xff]  }
0x158b   :  { %v2667_v44 = vadd.f32 %v2666_v42, %v2297_v24  ;;  %v2710_v45 = vadd.f32 %v2709_v43, %v2305_v52  ;;  %v2716_v30 = vmax.f32 %v2665_v29, 0.0  ;;  %v2718_v56 = vmax.f32 %v2708_v33, 0.0  ;;  %v7683_v29 = vld [vmem:[#allocation2 + $0x3f0] ss:$24 sps:$4 sm:$0xff]   ;;  %v7694_v41 = vld [vmem:[#allocation2 + $0x3cc] ss:$24 sps:$4 sm:$0xff]  }
0x158c   :  { %v7686_v33 = vld [vmem:[#allocation2 + $0x3f8] ss:$24 sps:$4 sm:$0xff]   ;;  %v7692_v43 = vld [vmem:[#allocation2 + $0x3c8] ss:$24 sps:$4 sm:$0xff]  }
0x158d   :  { %v2717_v2 = vmax.f32 %v2667_v44, 0.0  ;;  %v2719_v53 = vmax.f32 %v2710_v45, 0.0  ;;  %v2720_v4 = vpack.c.bf16 %v2716_v30, %v2712_v48  ;;  %v2722_v1 = vpack.c.bf16 %v2718_v56, %v2714_v38  ;;  %v7689_v42 = vld [vmem:[#allocation2 + $0x3c0] ss:$24 sps:$4 sm:$0xff]   ;;  %v7697_v44 = vld [vmem:[#allocation2 + $0x394] ss:$24 sps:$4 sm:$0xff]  }
0x158e   :  { %v7700_v45 = vld [vmem:[#allocation2 + $0x39c] ss:$24 sps:$4 sm:$0xff]   ;;  %v7695_v30 = vld [vmem:[#allocation2 + $0x390] ss:$24 sps:$4 sm:$0xff]  }
0x158f   :  { %v2721_v14 = vpack.c.bf16 %v2717_v2, %v2713_v58  ;;  %v2723_v32 = vpack.c.bf16 %v2719_v53, %v2715_v61  ;;  %v7698_v56 = vld [vmem:[#allocation2 + $0x398] ss:$24 sps:$4 sm:$0xff]   ;;  %v7703_v58 = vld [vmem:[#allocation2 + $0x364] ss:$24 sps:$4 sm:$0xff]   ;;  %v7704_v53 = vld [vmem:[#allocation2 + $0x368] ss:$24 sps:$4 sm:$0xff]  }
0x1590   :  { %v7706_v61 = vld [vmem:[#allocation2 + $0x36c] ss:$24 sps:$4 sm:$0xff]   ;;  %v7701_v2 = vld [vmem:[#allocation2 + $0x360] ss:$24 sps:$4 sm:$0xff]   ;;  %v7712_v38 = vld [vmem:[#allocation2 + $0x33c] ss:$24 sps:$4 sm:$0xff]  }
0x1591   :  { %3148 = vmatprep.mubr.bf16.mxu1 %v2721_v14  ;;  %3191 = vmatprep.mubr.bf16.mxu0 %v2723_v32  ;;  %v7709_v48 = vld [vmem:[#allocation2 + $0x334] ss:$24 sps:$4 sm:$0xff]   ;;  %v7707_v14 = vld [vmem:[#allocation2 + $0x330] ss:$24 sps:$4 sm:$0xff]  }
0x1592   :  { %3149 = vmatmul.mubr.bf16.vlgmr.msra.gmra.mxu1 %v2720_v4  ;;  %3192 = vmatmul.mubr.bf16.vlgmr.msra.gmra.mxu0 %v2722_v1  ;;  %v7710_v32 = vld [vmem:[#allocation2 + $0x338] ss:$24 sps:$4 sm:$0xff]   ;;  %v7715_v4 = vld [vmem:[#allocation2 + $0x304] ss:$24 sps:$4 sm:$0xff]   ;;  %v7728_v25 = vld [vmem:[#allocation2 + $0x5a8] ss:$24 sps:$4 sm:$0xff]  }
0x1593   :  { %3923 = vmatpush1.bf16.msra.mxu0 %v7674_v60  ;;  %v7718_v1 = vld [vmem:[#allocation2 + $0x30c] ss:$24 sps:$4 sm:$0xff]   ;;  %v7736_v60 = vld [vmem:[#allocation2 + $0x57c] ss:$24 sps:$4 sm:$0xff]  }
0x1594   :  { %3924 = vmatprep.subr.bf16.mxu0 %v7682_v51  ;;  %v7739_v51 = vld [vmem:[#allocation2 + $0x544] ss:$24 sps:$4 sm:$0xff]  }
0x1652   :  { %v3150_v62 = vpop.f32.mrf.mxu1  ;;  %v3193_v13 = vpop.f32.mrf.mxu0 }
0x1653   :  { %v3151_v16 = vadd.f32 %v3150_v62, %v2791_v63  ;;  %v7721_v62 = vld [vmem:[#allocation2 + $0x5d4] ss:$24 sps:$4 sm:$0xff]  }
0x1654   :  { %v3152_v10 = vpop.f32.mrf.mxu1  ;;  %v3195_v21 = vpop.f32.mrf.mxu0 }
0x1655   :  { %v3194_v34 = vadd.f32 %v3193_v13, %v3151_v16  ;;  %v3153_v5 = vadd.f32 %v3152_v10, %v2795_v11  ;;  %v7724_v13 = vld [vmem:[#allocation2 + $0x5dc] ss:$24 sps:$4 sm:$0xff]   ;;  %v7719_v16 = vld [vmem:[#allocation2 + $0x5d0] ss:$24 sps:$4 sm:$0xff]  }
0x1656   :  { %v3154_v12 = vpop.f32.mrf.mxu1  ;;  %v3197_v17 = vpop.f32.mrf.mxu0  ;;  %v7722_v10 = vld [vmem:[#allocation2 + $0x5d8] ss:$24 sps:$4 sm:$0xff]  }
0x1657   :  { %v3196_v18 = vadd.f32 %v3195_v21, %v3153_v5  ;;  %v3155_v20 = vadd.f32 %v3154_v12, %v2791_v63  ;;  %v8800_v23 = vadd.f32 %v3194_v34, %v8775_v36  ;;  %v7713_v63 = vld [vmem:[#allocation2 + $0x300] ss:$24 sps:$4 sm:$0xff]  }
0x1658   :  { %v3156_v22 = vpop.f32.mrf.mxu1  ;;  %v3199_v54 = vpop.f32.mrf.mxu0 }
0x1659   :  { %v8803_v37 = vadd.f32 %v3196_v18, %v8771_v35  ;;  %v3198_v50 = vadd.f32 %v3197_v17, %v3155_v20  ;;  %v3157_v39 = vadd.f32 %v3156_v22, %v2795_v11  ;;  %v7671_v35 = vld [vmem:[#allocation2 + $0x450] ss:$24 sps:$4 sm:$0xff]  }
0x165a   :  { %3880 = vmatpush1.bf16.msra.mxu1 %v7671_v35  ;;  %v7716_v11 = vld [vmem:[#allocation2 + $0x308] ss:$24 sps:$4 sm:$0xff]   ;;  %v7730_v35 = vld [vmem:[#allocation2 + $0x5ac] ss:$24 sps:$4 sm:$0xff]  }
0x165b   :  { %v3200_v55 = vadd.f32 %v3199_v54, %v3157_v39  ;;  %v3206_v24 = vadd.f32 %v8803_v37, %v8800_v23  ;;  %v8808_v52 = vadd.f32 %v3198_v50, %v8777_v3  ;;  %3881 = vmatprep.subr.bf16.mxu1 %v7679_v57  ;;  %v7680_v3 = vld [vmem:[#allocation2 + $0x428] ss:$24 sps:$4 sm:$0xff]  }
0x165c   :  { %3925 = vmatpush1.bf16.msra.mxu0 %v7680_v3  ;;  %v7737_v57 = vld [vmem:[#allocation2 + $0x540] ss:$24 sps:$4 sm:$0xff]   ;;  %v7742_v3 = vld [vmem:[#allocation2 + $0x54c] ss:$24 sps:$4 sm:$0xff]  }
0x165d   :  { %v8811_v26 = vadd.f32 %v3200_v55, %v8773_v47  ;;  %3207 = vadd.xlane.f32.xlu0 %v3206_v24  ;;  %v7685_v47 = vld [vmem:[#allocation2 + $0x3f4] ss:$24 sps:$4 sm:$0xff]   ;;  %3926 = vmatprep.subr.bf16.mxu0 %v7688_v49  ;;  %v7727_v24 = vld [vmem:[#allocation2 + $0x5a4] ss:$24 sps:$4 sm:$0xff]  }
0x165e   :  { %3882 = vmatpush1.bf16.msra.mxu1 %v7677_v28  ;;  %v7740_v28 = vld [vmem:[#allocation2 + $0x548] ss:$24 sps:$4 sm:$0xff]   ;;  %v7748_v49 = vld [vmem:[#allocation2 + $0x51c] ss:$24 sps:$4 sm:$0xff]  }
0x165f   :  { %v3209_v36 = vadd.f32 %v8811_v26, %v8808_v52  ;;  %3883 = vmatprep.subr.bf16.mxu1 %v7685_v47  ;;  %v7745_v47 = vld [vmem:[#allocation2 + $0x514] ss:$24 sps:$4 sm:$0xff]  }
0x1660   :  { %3927 = vmatpush1.bf16.msra.mxu0 %v7686_v33  ;;  %v7746_v33 = vld [vmem:[#allocation2 + $0x518] ss:$24 sps:$4 sm:$0xff]  }
0x1661   :  { %3210 = vadd.xlane.f32.xlu1 %v3209_v36  ;;  %3928 = vmatprep.subr.bf16.mxu0 %v7694_v41  ;;  %v7725_v36 = vld [vmem:[#allocation2 + $0x5a0] ss:$24 sps:$4 sm:$0xff]   ;;  %v7754_v41 = vld [vmem:[#allocation2 + $0x4ec] ss:$24 sps:$4 sm:$0xff]  }
0x1662   :  { %3884 = vmatpush1.bf16.msra.mxu1 %v7683_v29  ;;  %v7743_v29 = vld [vmem:[#allocation2 + $0x510] ss:$24 sps:$4 sm:$0xff]  }
0x1663   :  { %3885 = vmatprep.subr.bf16.mxu1 %v7691_v40  ;;  %v7751_v40 = vld [vmem:[#allocation2 + $0x4e4] ss:$24 sps:$4 sm:$0xff]  }
0x1664   :  { %3929 = vmatpush1.bf16.msra.mxu0 %v7692_v43  ;;  %v7752_v43 = vld [vmem:[#allocation2 + $0x4e8] ss:$24 sps:$4 sm:$0xff]  }
0x1665   :  { %3930 = vmatprep.subr.bf16.mxu0 %v7700_v45  ;;  %v7760_v45 = vld [vmem:[#allocation2 + $0x4bc] ss:$24 sps:$4 sm:$0xff]  }
0x1666   :  { %3886 = vmatpush1.bf16.msra.mxu1 %v7689_v42  ;;  %v7749_v42 = vld [vmem:[#allocation2 + $0x4e0] ss:$24 sps:$4 sm:$0xff]  }
0x1667   :  { %3887 = vmatprep.subr.bf16.mxu1 %v7697_v44  ;;  %v7757_v44 = vld [vmem:[#allocation2 + $0x4b4] ss:$24 sps:$4 sm:$0xff]  }
0x1668   :  { %3931 = vmatpush1.bf16.msra.mxu0 %v7698_v56  ;;  %v7758_v56 = vld [vmem:[#allocation2 + $0x4b8] ss:$24 sps:$4 sm:$0xff]  }
0x1669   :  { %3932 = vmatprep.subr.bf16.mxu0 %v7706_v61  ;;  %v7766_v61 = vld [vmem:[#allocation2 + $0x48c] ss:$24 sps:$4 sm:$0xff]  }
0x166a   :  { %3888 = vmatpush1.bf16.msra.mxu1 %v7695_v30  ;;  %v7755_v30 = vld [vmem:[#allocation2 + $0x4b0] ss:$24 sps:$4 sm:$0xff]  }
0x166b   :  { %3889 = vmatprep.subr.bf16.mxu1 %v7703_v58  ;;  %v7763_v58 = vld [vmem:[#allocation2 + $0x484] ss:$24 sps:$4 sm:$0xff]  }
0x166c   :  { %3933 = vmatpush1.bf16.msra.mxu0 %v7704_v53  ;;  %v7764_v53 = vld [vmem:[#allocation2 + $0x488] ss:$24 sps:$4 sm:$0xff]  }
0x166d   :  { %3934 = vmatprep.subr.bf16.mxu0 %v7712_v38 }
0x166e   :  { %3890 = vmatpush1.bf16.msra.mxu1 %v7701_v2  ;;  %v7761_v2 = vld [vmem:[#allocation2 + $0x480] ss:$24 sps:$4 sm:$0xff]  }
0x166f   :  { %3891 = vmatprep.subr.bf16.mxu1 %v7709_v48  ;;  %v7769_v48 = vld [vmem:[#allocation2 + $0x464] ss:$24 sps:$4 sm:$0xff]  }
0x1670   :  { %3935 = vmatpush1.bf16.msra.mxu0 %v7710_v32 }
0x1671   :  { %3936 = vmatprep.subr.bf16.mxu0 %v7718_v1 }
0x1672   :  { %3892 = vmatpush1.bf16.msra.mxu1 %v7707_v14 }
0x1673   :  { %3893 = vmatprep.subr.bf16.mxu1 %v7715_v4 }
0x1674   :  { %3937 = vmatpush1.bf16.msra.mxu0 %v7716_v11 }
0x1675   :  { %3938 = vmatprep.subr.bf16.mxu0 %v7724_v13 }
0x1676   :  { %3894 = vmatpush1.bf16.msra.mxu1 %v7713_v63 }
0x1677   :  { %3895 = vmatprep.subr.bf16.mxu1 %v7721_v62  ;;  %v8837_v62 = vsub.s32 6, %v8384_v8 }
0x1678   :  { %3939 = vmatpush2.bf16.msra.mxu0 %v7722_v10 }
0x1679   :  { %3940 = vmatprep.subr.bf16.mxu0 %v7730_v35 }
0x167a   :  { %3896 = vmatpush2.bf16.msra.mxu1 %v7719_v16  ;;  %v8203_v16 = vld [vmem:[%s9319_s6 + $0x8] sm:$0x7f] }
0x167b   :  { %3897 = vmatprep.subr.bf16.mxu1 %v7727_v24  ;;  %v3245_v10 = vrot.slane %v8203_v16, %v8555_v59  ;;  %v3257_v8 = vrot.slane %v8203_v16, %v8837_v62 }
0x167c   :  { %3941 = vmatpush2.bf16.msra.mxu0 %v7728_v25 }
0x167d   :  { %3942 = vmatprep.subr.bf16.mxu0 %v7736_v60  ;;  %v7775_v60 = vld [vmem:[#allocation2 + $0x404] ss:$24 sps:$4 sm:$0xff]  }
0x167e   :  { %3898 = vmatpush2.bf16.msra.mxu1 %v7725_v36 }
0x1680   :  { %3943 = vmatpush2.bf16.msra.mxu0 %v7734_v27  ;;  %v7773_v27 = vld [vmem:[#allocation2 + $0x400] ss:$24 sps:$4 sm:$0xff]  }
0x1681   :  { %3944 = vmatprep.subr.bf16.mxu0 %v7742_v3  ;;  %v7779_v3 = vld [vmem:[#allocation2 + $0x3a0] ss:$24 sps:$4 sm:$0xff]  }
0x1684   :  { %3945 = vmatpush2.bf16.msra.mxu0 %v7740_v28  ;;  %v7781_v28 = vld [vmem:[#allocation2 + $0x3a4] ss:$24 sps:$4 sm:$0xff]  }
0x1685   :  { %3946 = vmatprep.subr.bf16.mxu0 %v7748_v49  ;;  %v7782_v49 = vld [vmem:[#allocation2 + $0x370] ss:$24 sps:$4 sm:$0xff]  }
0x1688   :  { %3947 = vmatpush2.bf16.msra.mxu0 %v7746_v33  ;;  %v7785_v33 = vld [vmem:[#allocation2 + $0x340] ss:$24 sps:$4 sm:$0xff]  }
0x1689   :  { %3948 = vmatprep.subr.bf16.mxu0 %v7754_v41  ;;  %v7788_v41 = vld [vmem:[#allocation2 + $0x310] ss:$24 sps:$4 sm:$0xff]  }
0x168c   :  { %3949 = vmatpush2.bf16.msra.mxu0 %v7752_v43  ;;  %v7791_v43 = vld [vmem:[#allocation2 + $0x5e0] ss:$24 sps:$4 sm:$0xff]  }
0x168d   :  { %3950 = vmatprep.subr.bf16.mxu0 %v7760_v45  ;;  %v7794_v45 = vld [vmem:[#allocation2 + $0x5b0] ss:$24 sps:$4 sm:$0xff]  }
0x1690   :  { %3951 = vmatpush2.bf16.msra.mxu0 %v7758_v56  ;;  %v7797_v56 = vld [vmem:[#allocation2 + $0x580] ss:$24 sps:$4 sm:$0xff]  }
0x1691   :  { %3952 = vmatprep.subr.bf16.mxu0 %v7766_v61  ;;  %v7800_v61 = vld [vmem:[#allocation2 + $0x550] ss:$24 sps:$4 sm:$0xff]  }
0x1694   :  { %3953 = vmatpush2.bf16.msra.mxu0 %v7764_v53  ;;  %v7803_v53 = vld [vmem:[#allocation2 + $0x520] ss:$24 sps:$4 sm:$0xff]  }
0x1695   :  { %7116 = vmatprep.subr.bf16.mxu0 %v8301_v6 }
0x16e6   :  { %v3208_v21 = vpop.xlane.xlu0 %3207 }
0x16e7   :  { %v3212_v34 = vmul.f32 0.00390625, %v3208_v21 }
0x16e9   :  { %v8816_v5 = vsub.f32 %v8800_v23, %v3212_v34  ;;  %v8819_v12 = vsub.f32 %v8803_v37, %v3212_v34  ;;  %v8204_v34 = vld [vmem:[%s9319_s6] sm:$0x7f] }
0x16ea   :  { %v3211_v17 = vpop.xlane.xlu1 %3210 }
0x16eb   :  { %v3213_v18 = vmul.f32 0.00390625, %v3211_v17  ;;  %v3218_v20 = vmul.f32 %v8816_v5, %v8816_v5  ;;  %v3219_v22 = vmul.f32 %v8819_v12, %v8819_v12  ;;  %v3241_v17 = vrot.slane %v8204_v34, %v8555_v59 }
0x16ed   :  { %v8826_v50 = vsub.f32 %v8808_v52, %v3213_v18  ;;  %v8829_v39 = vsub.f32 %v8811_v26, %v3213_v18  ;;  %v3222_v54 = vadd.f32 %v3219_v22, %v3218_v20  ;;  %v7733_v52 = vld [vmem:[#allocation2 + $0x574] ss:$24 sps:$4 sm:$0xff]   ;;  %v7731_v26 = vld [vmem:[#allocation2 + $0x570] ss:$24 sps:$4 sm:$0xff]   ;;  %v3253_v20 = vrot.slane %v8204_v34, %v8837_v62 }
0x16ee   :  { %3899 = vmatprep.subr.bf16.mxu1 %v7733_v52  ;;  %v7767_v52 = vld [vmem:[#allocation2 + $0x460] ss:$24 sps:$4 sm:$0xff]  }
0x16ef   :  { %3223 = vadd.xlane.f32.xlu0 %v3222_v54  ;;  %v3220_v23 = vmul.f32 %v8826_v50, %v8826_v50  ;;  %v3221_v37 = vmul.f32 %v8829_v39, %v8829_v39  ;;  %3900 = vmatpush2.bf16.msra.mxu1 %v7731_v26  ;;  %v7770_v26 = vld [vmem:[#allocation2 + $0x430] ss:$24 sps:$4 sm:$0xff]  }
0x16f0   :  { %3901 = vmatprep.subr.bf16.mxu1 %v7739_v51  ;;  %v7776_v51 = vld [vmem:[#allocation2 + $0x3d0] ss:$24 sps:$4 sm:$0xff]  }
0x16f1   :  { %v3225_v55 = vadd.f32 %v3221_v37, %v3220_v23 }
0x16f3   :  { %3226 = vadd.xlane.f32.xlu1 %v3225_v55  ;;  %3902 = vmatpush2.bf16.msra.mxu1 %v7737_v57  ;;  %v7778_v57 = vld [vmem:[#allocation2 + $0x3d4] ss:$24 sps:$4 sm:$0xff]  }
0x16f4   :  { %3903 = vmatprep.subr.bf16.mxu1 %v7745_v47  ;;  %v7784_v47 = vld [vmem:[#allocation2 + $0x374] ss:$24 sps:$4 sm:$0xff]  }
0x16f7   :  { %3904 = vmatpush2.bf16.msra.mxu1 %v7743_v29  ;;  %v7787_v29 = vld [vmem:[#allocation2 + $0x344] ss:$24 sps:$4 sm:$0xff]  }
0x16f8   :  { %3905 = vmatprep.subr.bf16.mxu1 %v7751_v40  ;;  %v7790_v40 = vld [vmem:[#allocation2 + $0x314] ss:$24 sps:$4 sm:$0xff]  }
0x16fb   :  { %3906 = vmatpush2.bf16.msra.mxu1 %v7749_v42  ;;  %v7793_v42 = vld [vmem:[#allocation2 + $0x5e4] ss:$24 sps:$4 sm:$0xff]  }
0x16fc   :  { %3907 = vmatprep.subr.bf16.mxu1 %v7757_v44  ;;  %v7796_v44 = vld [vmem:[#allocation2 + $0x5b4] ss:$24 sps:$4 sm:$0xff]  }
0x16ff   :  { %3908 = vmatpush2.bf16.msra.mxu1 %v7755_v30  ;;  %v7799_v30 = vld [vmem:[#allocation2 + $0x584] ss:$24 sps:$4 sm:$0xff]  }
0x1700   :  { %3909 = vmatprep.subr.bf16.mxu1 %v7763_v58  ;;  %v7802_v58 = vld [vmem:[#allocation2 + $0x554] ss:$24 sps:$4 sm:$0xff]  }
0x1703   :  { %3910 = vmatpush2.bf16.msra.mxu1 %v7761_v2  ;;  %v7805_v2 = vld [vmem:[#allocation2 + $0x524] ss:$24 sps:$4 sm:$0xff]  }
0x1704   :  { %3965 = vmatprep.subr.bf16.mxu1 %v7769_v48  ;;  %v7808_v48 = vld [vmem:[#allocation2 + $0x4f4] ss:$24 sps:$4 sm:$0xff]  }
0x1778   :  { %v3224_v38 = vpop.xlane.xlu0 %3223 }
0x1779   :  { %v3228_v14 = vmul.f32 0.00390625, %v3224_v38  ;;  %v7806_v38 = vld [vmem:[#allocation2 + $0x4f0] ss:$24 sps:$4 sm:$0xff]  }
0x177b   :  { %v3230_v32 = vadd.f32 1e-05, %v3228_v14  ;;  %v7811_v14 = vld [vmem:[#allocation2 + $0x4c4] ss:$24 sps:$4 sm:$0xff]  }
0x177c   :  { %v3227_v4 = vpop.xlane.xlu1 %3226 }
0x177d   :  { %8123 = vrsqrt.f32 %v3230_v32  ;;  %v3229_v1 = vmul.f32 0.00390625, %v3227_v4  ;;  %v7809_v32 = vld [vmem:[#allocation2 + $0x4c0] ss:$24 sps:$4 sm:$0xff]   ;;  %v7814_v4 = vld [vmem:[#allocation2 + $0x494] ss:$24 sps:$4 sm:$0xff]  }
0x177f   :  { %v3231_v63 = vadd.f32 1e-05, %v3229_v1  ;;  %v7812_v1 = vld [vmem:[#allocation2 + $0x490] ss:$24 sps:$4 sm:$0xff]  }
0x1781   :  { %8125 = vrsqrt.f32 %v3231_v63  ;;  %v8878_v63 = vld [vmem:[%s9315_s2 + $0x6] sm:$0x3f] }
0x1782   :  { %v3372_v16 = vrot.slane %v8878_v63, %v8399_v15 }
0x178a   :  { %v8124_v11 = vpop.eup %8123 }
0x178b   :  { %v3235_v13 = vmul.f32 %v8124_v11, %v8819_v12  ;;  %v3234_v21 = vmul.f32 %v8124_v11, %v8816_v5 }
0x178d   :  { %v3247_v22 = vmul.f32 %v3245_v10, %v3235_v13  ;;  %v3246_v23 = vmul.f32 %v3241_v17, %v3234_v21 }
0x178e   :  { %v8126_v18 = vpop.eup %8125 }
0x178f   :  { %v3237_v12 = vmul.f32 %v8126_v18, %v8829_v39  ;;  %v3236_v54 = vmul.f32 %v8126_v18, %v8826_v50  ;;  %v8853_v5 = vadd.f32 %v3257_v8, %v3247_v22  ;;  %v8857_v36 = vadd.f32 %v3253_v20, %v3246_v23  ;;  %v7772_v50 = vld [vmem:[#allocation2 + $0x434] ss:$24 sps:$4 sm:$0xff]  }
0x1791   :  { %v3249_v37 = vmul.f32 %v3245_v10, %v3237_v12  ;;  %v3248_v55 = vmul.f32 %v3241_v17, %v3236_v54  ;;  %v3380_v10 = vrot.slane %v8878_v63, %v8387_v9 }
0x1793   :  { %v8855_v24 = vadd.f32 %v3257_v8, %v3249_v37  ;;  %v8859_v35 = vadd.f32 %v3253_v20, %v3248_v55  ;;  %v3384_v55 = vrot.slane %v8878_v63, %v8548_v19 }
0x1795   :  { %v3268_v25 = vpack.c.bf16 %v8855_v24, %v8853_v5  ;;  %v8865_v39 = vpack.c.bf16 %v8859_v35, %v8857_v36 }
0x1797   :  { %3911 = vmatprep.mubr.bf16.mxu1 %v3268_v25  ;;  %3954 = vmatprep.mubr.bf16.mxu0 %v3268_v25 }
0x1798   :  { %3912 = vmatmul.mubr.bf16.vlgmr.msra.gmra.mxu1 %v8865_v39  ;;  %3955 = vmatmul.mubr.bf16.vlgmr.msra.gmra.mxu0 %v8865_v39 }
0x1799   :  { %3966 = vmatpush1.bf16.msra.mxu1 %v7767_v52  ;;  %3997 = vmatprep.mubr.bf16.mxu1 %v3268_v25 }
0x179a   :  { %3967 = vmatprep.subr.bf16.mxu1 %v7772_v50  ;;  %7118 = vmatprep.mubr.msk.bf16.mxu0 %vm8302_vm0, %v8301_v6 }
0x179d   :  { %3968 = vmatpush1.bf16.msra.mxu1 %v7770_v26 }
0x179e   :  { %3969 = vmatprep.subr.bf16.mxu1 %v7775_v60  ;;  %v3376_v60 = vrot.slane %v8878_v63, %v8534_v46 }
0x17a1   :  { %3970 = vmatpush1.bf16.msra.mxu1 %v7773_v27 }
0x17a2   :  { %3971 = vmatprep.subr.bf16.mxu1 %v7778_v57 }
0x17a5   :  { %3972 = vmatpush1.bf16.msra.mxu1 %v7776_v51 }
0x17a6   :  { %3973 = vmatprep.subr.bf16.mxu1 %v7781_v28 }
0x17a9   :  { %3974 = vmatpush1.bf16.msra.mxu1 %v7779_v3  ;;  %v3388_v3 = vrot.slane %v8878_v63, %v8443_v31 }
0x17aa   :  { %3975 = vmatprep.subr.bf16.mxu1 %v7784_v47 }
0x17ad   :  { %3976 = vmatpush1.bf16.msra.mxu1 %v7782_v49 }
0x17ae   :  { %3977 = vmatprep.subr.bf16.mxu1 %v7787_v29 }
0x17b1   :  { %3978 = vmatpush1.bf16.msra.mxu1 %v7785_v33 }
0x17b2   :  { %3979 = vmatprep.subr.bf16.mxu1 %v7790_v40 }
0x17b5   :  { %3980 = vmatpush1.bf16.msra.mxu1 %v7788_v41 }
0x17b6   :  { %3981 = vmatprep.subr.bf16.mxu1 %v7793_v42 }
0x17b9   :  { %3982 = vmatpush2.bf16.msra.mxu1 %v7791_v43 }
0x17ba   :  { %3983 = vmatprep.subr.bf16.mxu1 %v7796_v44 }
0x17bd   :  { %3984 = vmatpush2.bf16.msra.mxu1 %v7794_v45 }
0x17be   :  { %3985 = vmatprep.subr.bf16.mxu1 %v7799_v30 }
0x17c1   :  { %3986 = vmatpush2.bf16.msra.mxu1 %v7797_v56 }
0x17c2   :  { %3987 = vmatprep.subr.bf16.mxu1 %v7802_v58 }
0x17c5   :  { %3988 = vmatpush2.bf16.msra.mxu1 %v7800_v61 }
0x17c6   :  { %3989 = vmatprep.subr.bf16.mxu1 %v7805_v2 }
0x17c9   :  { %3990 = vmatpush2.bf16.msra.mxu1 %v7803_v53 }
0x17ca   :  { %3991 = vmatprep.subr.bf16.mxu1 %v7808_v48 }
0x17cd   :  { %3992 = vmatpush2.bf16.msra.mxu1 %v7806_v38 }
0x17ce   :  { %3993 = vmatprep.subr.bf16.mxu1 %v7811_v14 }
0x17d1   :  { %3994 = vmatpush2.bf16.msra.mxu1 %v7809_v32 }
0x17d2   :  { %3995 = vmatprep.subr.bf16.mxu1 %v7814_v4 }
0x17d5   :  { %3996 = vmatpush2.bf16.msra.mxu1 %v7812_v1 }
0x17d6   :  { %7122 = vmatprep.subr.bf16.mxu1 %v8301_v6 }
0x17d8   :  { %3998 = vmatmul.mubr.bf16.vlgmr.msra.gmra.mxu1 %v8865_v39 }
0x17d9   :  { %7124 = vmatprep.mubr.msk.bf16.mxu1 %vm8302_vm0, %v8301_v6 }
0x1858   :  { %v3913_v11 = vpop.f32.mrf.mxu1  ;;  %v3956_v13 = vpop.f32.mrf.mxu0 }
0x1859   :  { %v3914_v8 = vadd.f32 %v3913_v11, %v3372_v16  ;;  %v3957_v20 = vadd.f32 %v3956_v13, %v3380_v10 }
0x185a   :  { %v3915_v21 = vpop.f32.mrf.mxu1  ;;  %v3958_v34 = vpop.f32.mrf.mxu0 }
0x185b   :  { %v3959_v39 = vadd.f32 %v3958_v34, %v3384_v55  ;;  %v3916_v57 = vadd.f32 %v3915_v21, %v3376_v60 }
0x185c   :  { %v3917_v17 = vpop.f32.mrf.mxu1  ;;  %v3960_v18 = vpop.f32.mrf.mxu0 }
0x185d   :  { %v3918_v12 = vadd.f32 %v3917_v17, %v3372_v16  ;;  %v3961_v22 = vadd.f32 %v3960_v18, %v3380_v10 }
0x185e   :  { %v3962_v37 = vpop.f32.mrf.mxu0  ;;  %v3919_v26 = vpop.f32.mrf.mxu1 }
0x185f   :  { %v4008_v54 = vpack.c.bf16 %v3918_v12, %v3914_v8  ;;  %v4009_v23 = vpack.c.bf16 %v3961_v22, %v3957_v20  ;;  %v3963_v52 = vadd.f32 %v3962_v37, %v3384_v55  ;;  %v3920_v27 = vadd.f32 %v3919_v26, %v3376_v60 }
0x1861   :  { %4131 = vrot.lane.b32.xlu0 %v4009_v23, %s8303_s10  ;;  %4128 = vrot.lane.b32.xlu1 %v4008_v54, %s8303_s10  ;;  %v4015_v25 = vsel %vm875_vm1, %v4009_v23, 0  ;;  %v4500_v50 = vpack.c.bf16 %v3963_v52, %v3959_v39  ;;  %v4499_v51 = vpack.c.bf16 %v3920_v27, %v3916_v57 }
0x1862   :  { %7117 = vmatpush3.bf16.xpose.msra.mxu0 %v4015_v25 }
0x1863   :  { %7128 = vmatprep.subr.bf16.mxu0 %v8301_v6  ;;  %v4506_v2 = vsel %vm875_vm1, %v4500_v50, 0 }
0x1865   :  { %4378 = vrot.lane.b32.xlu0 %v4009_v23, %s8305_s12  ;;  %4255 = vrot.lane.b32.xlu1 %v4009_v23, %s8304_s11 }
0x1869   :  { %4622 = vrot.lane.b32.xlu0 %v4500_v50, %s8303_s10  ;;  %4253 = vrot.lane.b32.xlu1 %v4008_v54, %s8304_s11 }
0x186a   :  { %7119 = vmatmul.mubr.msk.bf16.vlgmr.msra.gmra.mxu0 %vm875_vm1, %v4008_v54 }
0x186b   :  { %7130 = vmatprep.mubr.msk.bf16.mxu0 %vm8302_vm0, %v8301_v6 }
0x186d   :  { %4746 = vrot.lane.b32.xlu0 %v4500_v50, %s8304_s11  ;;  %4376 = vrot.lane.b32.xlu1 %v4008_v54, %s8305_s12 }
0x1871   :  { %4869 = vrot.lane.b32.xlu0 %v4500_v50, %s8305_s12  ;;  %4619 = vrot.lane.b32.xlu1 %v4499_v51, %s8303_s10 }
0x1875   :  { %4744 = vrot.lane.b32.xlu1 %v4499_v51, %s8304_s11 }
0x1879   :  { %4867 = vrot.lane.b32.xlu1 %v4499_v51, %s8305_s12 }
0x1898   :  { %v3999_v28 = vpop.f32.mrf.mxu1 }
0x1899   :  { %v4000_v29 = vadd.f32 %v3999_v28, %v3388_v3 }
0x189a   :  { %v8907_v47 = vpop.f32.mrf.mxu1 }
0x189c   :  { %v4003_v49 = vpop.f32.mrf.mxu1 }
0x189d   :  { %v4004_v33 = vadd.f32 %v4003_v49, %v3388_v3 }
0x189f   :  { %v8909_v40 = vpack.c.bf16 %v4004_v33, %v4000_v29 }
0x18a1   :  { %7123 = vmatpush3.bf16.msra.mxu1 %v8909_v40 }
0x18a2   :  { %7134 = vmatprep.subr.bf16.mxu1 %v8301_v6 }
0x18d3   :  { %v4132_v41 = vpop.permute.xlu0 %4131  ;;  %v4129_v42 = vpop.permute.xlu1 %4128 }
0x18d4   :  { %v4137_v43 = vsel %vm875_vm1, %v4132_v41, 0 }
0x18d5   :  { %7129 = vmatpush3.bf16.xpose.msra.mxu0 %v4137_v43 }
0x18d6   :  { %7140 = vmatprep.subr.bf16.mxu0 %v8301_v6 }
0x18d7   :  { %v4256_v44 = vpop.permute.xlu1 %4255  ;;  %v4379_v30 = vpop.permute.xlu0 %4378 }
0x18d8   :  { %v4261_v45 = vsel %vm875_vm1, %v4256_v44, 0  ;;  %v4384_v58 = vsel %vm875_vm1, %v4379_v30, 0 }
0x18db   :  { %v4254_v56 = vpop.permute.xlu1 %4253  ;;  %v4623_v53 = vpop.permute.xlu0 %4622 }
0x18dc   :  { %7131 = vmatmul.mubr.msk.bf16.vlgmr.msra.gmra.mxu0 %vm875_vm1, %v4129_v42  ;;  %v4628_v48 = vsel %vm875_vm1, %v4623_v53, 0 }
0x18dd   :  { %7141 = vmatpush3.bf16.xpose.msra.mxu0 %v4261_v45  ;;  %7142 = vmatprep.mubr.msk.bf16.mxu0 %vm8302_vm0, %v8301_v6 }
0x18de   :  { %7152 = vmatprep.subr.bf16.mxu0 %v8301_v6 }
0x18df   :  { %v4377_v61 = vpop.permute.xlu1 %4376  ;;  %v4747_v38 = vpop.permute.xlu0 %4746 }
0x18e0   :  { %v4752_v32 = vsel %vm875_vm1, %v4747_v38, 0 }
0x18e3   :  { %v4620_v14 = vpop.permute.xlu1 %4619  ;;  %v4870_v4 = vpop.permute.xlu0 %4869 }
0x18e4   :  { %7143 = vmatmul.mubr.msk.bf16.vlgmr.msra.gmra.mxu0 %vm875_vm1, %v4254_v56  ;;  %v4875_v11 = vsel %vm875_vm1, %v4870_v4, 0 }
0x18e5   :  { %7153 = vmatpush3.bf16.xpose.msra.mxu0 %v4384_v58  ;;  %7154 = vmatprep.mubr.msk.bf16.mxu0 %vm8302_vm0, %v8301_v6 }
0x18e6   :  { %7164 = vmatprep.subr.bf16.mxu0 %v8301_v6 }
0x18e7   :  { %v4745_v1 = vpop.permute.xlu1 %4744 }
0x18eb   :  { %v4868_v13 = vpop.permute.xlu1 %4867 }
0x18ec   :  { %7155 = vmatmul.mubr.msk.bf16.vlgmr.msra.gmra.mxu0 %vm875_vm1, %v4377_v61 }
0x18ed   :  { %7165 = vmatpush3.bf16.xpose.msra.mxu0 %v4506_v2  ;;  %7166 = vmatprep.mubr.msk.bf16.mxu0 %vm8302_vm0, %v8301_v6 }
0x18ee   :  { %7176 = vmatprep.subr.bf16.mxu0 %v8301_v6 }
0x18f4   :  { %7167 = vmatmul.mubr.msk.bf16.vlgmr.msra.gmra.mxu0 %vm875_vm1, %v4499_v51 }
0x18f5   :  { %7177 = vmatpush3.bf16.xpose.msra.mxu0 %v4628_v48  ;;  %7178 = vmatprep.mubr.msk.bf16.mxu0 %vm8302_vm0, %v8301_v6 }
0x18f6   :  { %7188 = vmatprep.subr.bf16.mxu0 %v8301_v6 }
0x18fc   :  { %7179 = vmatmul.mubr.msk.bf16.vlgmr.msra.gmra.mxu0 %vm875_vm1, %v4620_v14 }
0x18fd   :  { %7189 = vmatpush3.bf16.xpose.msra.mxu0 %v4752_v32  ;;  %7190 = vmatprep.mubr.msk.bf16.mxu0 %vm8302_vm0, %v8301_v6 }
0x18fe   :  { %7200 = vmatprep.subr.bf16.mxu0 %v8301_v6 }
0x1904   :  { %7191 = vmatmul.mubr.msk.bf16.vlgmr.msra.gmra.mxu0 %vm875_vm1, %v4745_v1 }
0x1905   :  { %7201 = vmatpush3.bf16.xpose.msra.mxu0 %v4875_v11  ;;  %7202 = vmatprep.mubr.msk.bf16.mxu0 %vm8302_vm0, %v8301_v6 }
0x190c   :  { %7203 = vmatmul.mubr.msk.bf16.vlgmr.msra.gmra.mxu0 %vm875_vm1, %v4868_v13 }
0x192a   :  { %v4051_v16 = vpop.f32.mrf.mxu0 }
0x192b   :  { %v4058_v10 = vsel %vm8422_vm2, %v4051_v16, -1e+30 }
0x192c   :  { %v7120_v21 = vpop.f32.mrf.mxu0  ;;  %v4060_v34 = vsel %vm925_vm3, %v4058_v10, -inf }
0x192d   :  { %4061 = vmax.xlane.f32.xlu0 %v4060_v34 }
0x192e   :  { %v4054_v17 = vpop.f32.mrf.mxu0 }
0x192f   :  { %v4059_v18 = vsel %vm8429_vm4, %v4054_v17, -1e+30 }
0x1930   :  { %v7121_v8 = vpop.f32.mrf.mxu0  ;;  %v4063_v20 = vsel %vm925_vm3, %v4059_v18, -inf }
0x1931   :  { %4064 = vmax.xlane.f32.xlu1 %v4063_v20 }
0x199c   :  { %v4173_v12 = vpop.f32.mrf.mxu0 }
0x199d   :  { %v8953_v22 = vsel %vm8422_vm2, %v4173_v12, -1e+30 }
0x199e   :  { %v7132_v54 = vpop.f32.mrf.mxu0  ;;  %v4182_v23 = vsel %vm925_vm3, %v8953_v22, -inf }
0x199f   :  { %4183 = vmax.xlane.f32.xlu0 %v4182_v23 }
0x19a0   :  { %v4176_v37 = vpop.f32.mrf.mxu0 }
0x19a1   :  { %v8959_v55 = vsel %vm8429_vm4, %v4176_v37, -1e+30 }
0x19a2   :  { %v7133_v25 = vpop.f32.mrf.mxu0  ;;  %v4185_v52 = vsel %vm925_vm3, %v8959_v55, -inf }
0x19a3   :  { %4186 = vmax.xlane.f32.xlu0 %v4185_v52 }
0x19a4   :  { %v4297_v39 = vpop.f32.mrf.mxu0 }
0x19a5   :  { %v8965_v50 = vsel %vm8422_vm2, %v4297_v39, -1e+30 }
0x19a6   :  { %v7144_v26 = vpop.f32.mrf.mxu0  ;;  %v4306_v60 = vsel %vm925_vm3, %v8965_v50, -inf }
0x19a7   :  { %4307 = vmax.xlane.f32.xlu0 %v4306_v60 }
0x19a8   :  { %v4300_v27 = vpop.f32.mrf.mxu0 }
0x19a9   :  { %v8971_v57 = vsel %vm8429_vm4, %v4300_v27, -1e+30 }
0x19aa   :  { %v7145_v51 = vpop.f32.mrf.mxu0  ;;  %v4309_v28 = vsel %vm925_vm3, %v8971_v57, -inf }
0x19ab   :  { %4310 = vmax.xlane.f32.xlu1 %v4309_v28 }
0x19ac   :  { %v4420_v3 = vpop.f32.mrf.mxu0 }
0x19ad   :  { %v8977_v49 = vsel %vm8422_vm2, %v4420_v3, -1e+30 }
0x19ae   :  { %v7156_v29 = vpop.f32.mrf.mxu0  ;;  %v4429_v33 = vsel %vm925_vm3, %v8977_v49, -inf }
0x19af   :  { %4430 = vmax.xlane.f32.xlu0 %v4429_v33 }
0x19b0   :  { %v4423_v41 = vpop.f32.mrf.mxu0 }
0x19b1   :  { %v8983_v42 = vsel %vm8429_vm4, %v4423_v41, -1e+30 }
0x19b2   :  { %v7157_v43 = vpop.f32.mrf.mxu0  ;;  %v4432_v44 = vsel %vm925_vm3, %v8983_v42, -inf }
0x19b3   :  { %4433 = vmax.xlane.f32.xlu1 %v4432_v44 }
0x19b4   :  { %v4542_v45 = vpop.f32.mrf.mxu0 }
0x19b5   :  { %v8989_v30 = vsel %vm8422_vm2, %v4542_v45, -1e+30 }
0x19b6   :  { %v4062_v56 = vpop.xlane.xlu0 %4061  ;;  %v7168_v58 = vpop.f32.mrf.mxu0  ;;  %v4551_v61 = vsel %vm925_vm3, %v8989_v30, -inf }
0x19b7   :  { %v4066_v2 = vsub.f32 %v4058_v10, %v4062_v56  ;;  %4552 = vmax.xlane.f32.xlu0 %v4551_v61 }
0x19b8   :  { %v4545_v53 = vpop.f32.mrf.mxu0 }
0x19b9   :  { %v4068_v48 = vmul.f32 1.442695, %v4066_v2  ;;  %v8995_v38 = vsel %vm8429_vm4, %v4545_v53, -1e+30 }
0x19ba   :  { %v4065_v14 = vpop.xlane.xlu1 %4064  ;;  %v7169_v32 = vpop.f32.mrf.mxu0  ;;  %v4554_v4 = vsel %vm925_vm3, %v8995_v38, -inf }
0x19bb   :  { %8127 = vpow2.f32 %v4068_v48  ;;  %v4067_v1 = vsub.f32 %v4059_v18, %v4065_v14  ;;  %4555 = vmax.xlane.f32.xlu1 %v4554_v4 }
0x19bc   :  { %v4664_v11 = vpop.f32.mrf.mxu0 }
0x19bd   :  { %v4070_v13 = vmul.f32 1.442695, %v4067_v1  ;;  %v9001_v16 = vsel %vm8422_vm2, %v4664_v11, -1e+30 }
0x19be   :  { %v7180_v10 = vpop.f32.mrf.mxu0  ;;  %v4673_v21 = vsel %vm925_vm3, %v9001_v16, -inf }
0x19bf   :  { %8129 = vpow2.f32 %v4070_v13  ;;  %4674 = vmax.xlane.f32.xlu0 %v4673_v21 }
0x19c0   :  { %v4667_v34 = vpop.f32.mrf.mxu0 }
0x19c1   :  { %v9007_v17 = vsel %vm8429_vm4, %v4667_v34, -1e+30 }
0x19c2   :  { %v7181_v8 = vpop.f32.mrf.mxu0  ;;  %v4676_v18 = vsel %vm925_vm3, %v9007_v17, -inf }
0x19c3   :  { %4677 = vmax.xlane.f32.xlu1 %v4676_v18 }
0x19c4   :  { %v4788_v20 = vpop.f32.mrf.mxu0 }
0x19c5   :  { %v9013_v12 = vsel %vm8422_vm2, %v4788_v20, -1e+30 }
0x19c6   :  { %v7192_v54 = vpop.f32.mrf.mxu0  ;;  %v4797_v23 = vsel %vm925_vm3, %v9013_v12, -inf }
0x19c7   :  { %4798 = vmax.xlane.f32.xlu0 %v4797_v23 }
0x19c8   :  { %v9017_v37 = vpop.eup %8127  ;;  %v4791_v25 = vpop.f32.mrf.mxu0 }
0x19c9   :  { %v9021_v52 = vsel %vm8429_vm4, %v4791_v25, -1e+30  ;;  %v4072_v26 = vsel %vm925_vm3, %v9017_v37, 0.0 }
0x19ca   :  { %v7193_v39 = vpop.f32.mrf.mxu0  ;;  %v4800_v60 = vsel %vm925_vm3, %v9021_v52, -inf }
0x19cb   :  { %4073 = vadd.xlane.f32.xlu0 %v4072_v26  ;;  %4801 = vmax.xlane.f32.xlu1 %v4800_v60 }
0x19cc   :  { %v9027_v27 = vpop.eup %8129  ;;  %v4911_v51 = vpop.f32.mrf.mxu0 }
0x19cd   :  { %v9031_v28 = vsel %vm8422_vm2, %v4911_v51, -1e+30  ;;  %v4075_v29 = vsel %vm925_vm3, %v9027_v27, 0.0 }
0x19ce   :  { %v7204_v3 = vpop.f32.mrf.mxu0  ;;  %v4920_v33 = vsel %vm925_vm3, %v9031_v28, -inf }
0x19cf   :  { %4076 = vadd.xlane.f32.xlu1 %v4075_v29  ;;  %4921 = vmax.xlane.f32.xlu0 %v4920_v33 }
0x19d0   :  { %v4914_v41 = vpop.f32.mrf.mxu0 }
0x19d1   :  { %v9039_v43 = vsel %vm8429_vm4, %v4914_v41, -1e+30 }
0x19d2   :  { %v7205_v44 = vpop.f32.mrf.mxu0  ;;  %v4923_v0 = vsel %vm925_vm3, %v9039_v43, -inf }
0x19d3   :  { %4924 = vmax.xlane.f32.xlu1 %v4923_v0 }
0x19e4   :  { %4329 = vrot.lane.b32.xlu1 %v8909_v40, %s8304_s11 }
0x19e5   :  { %4206 = vrot.lane.b32.xlu0 %v8909_v40, %s8303_s10 }
0x1a28   :  { %v4184_v45 = vpop.xlane.xlu0 %4183 }
0x1a29   :  { %v4188_v56 = vsub.f32 %v8953_v22, %v4184_v45 }
0x1a2b   :  { %v4190_v58 = vmul.f32 1.442695, %v4188_v56 }
0x1a2c   :  { %v4187_v61 = vpop.xlane.xlu0 %4186 }
0x1a2d   :  { %8131 = vpow2.f32 %v4190_v58  ;;  %v4189_v7 = vsub.f32 %v8959_v55, %v4187_v61 }
0x1a2f   :  { %v4192_v2 = vmul.f32 1.442695, %v4189_v7 }
0x1a30   :  { %v4308_v53 = vpop.xlane.xlu0 %4307 }
0x1a31   :  { %8133 = vpow2.f32 %v4192_v2  ;;  %v4312_v48 = vsub.f32 %v8965_v50, %v4308_v53 }
0x1a33   :  { %v4314_v14 = vmul.f32 1.442695, %v4312_v48 }
0x1a34   :  { %v4311_v32 = vpop.xlane.xlu1 %4310 }
0x1a35   :  { %8135 = vpow2.f32 %v4314_v14  ;;  %v4313_v4 = vsub.f32 %v8971_v57, %v4311_v32 }
0x1a37   :  { %v4316_v1 = vmul.f32 1.442695, %v4313_v4 }
0x1a38   :  { %v4431_v11 = vpop.xlane.xlu0 %4430 }
0x1a39   :  { %8137 = vpow2.f32 %v4316_v1  ;;  %v4435_v22 = vsub.f32 %v8977_v49, %v4431_v11 }
0x1a3a   :  { %v9052_v13 = vpop.eup %8131 }
0x1a3b   :  { %v4437_v10 = vmul.f32 1.442695, %v4435_v22  ;;  %v4194_v55 = vsel %vm925_vm3, %v9052_v13, 0.0 }
0x1a3c   :  { %v4434_v21 = vpop.xlane.xlu1 %4433  ;;  %4195 = vadd.xlane.f32.xlu0 %v4194_v55 }
0x1a3d   :  { %8139 = vpow2.f32 %v4437_v10  ;;  %v4436_v50 = vsub.f32 %v8983_v42, %v4434_v21 }
0x1a3e   :  { %v9057_v34 = vpop.eup %8133 }
0x1a3f   :  { %v4439_v8 = vmul.f32 1.442695, %v4436_v50  ;;  %v4197_v57 = vsel %vm925_vm3, %v9057_v34, 0.0 }
0x1a40   :  { %v4553_v18 = vpop.xlane.xlu0 %4552  ;;  %4198 = vadd.xlane.f32.xlu1 %v4197_v57 }
0x1a41   :  { %8141 = vpow2.f32 %v4439_v8  ;;  %v4557_v49 = vsub.f32 %v8989_v30, %v4553_v18 }
0x1a42   :  { %v9062_v20 = vpop.eup %8135 }
0x1a43   :  { %v4559_v54 = vmul.f32 1.442695, %v4557_v49  ;;  %v4318_v23 = vsel %vm925_vm3, %v9062_v20, 0.0 }
0x1a44   :  { %v4556_v25 = vpop.xlane.xlu1 %4555  ;;  %4319 = vadd.xlane.f32.xlu0 %v4318_v23 }
0x1a45   :  { %8143 = vpow2.f32 %v4559_v54  ;;  %v4558_v42 = vsub.f32 %v8995_v38, %v4556_v25 }
0x1a46   :  { %v9067_v39 = vpop.eup %8137 }
0x1a47   :  { %v4561_v26 = vmul.f32 1.442695, %v4558_v42  ;;  %v4321_v60 = vsel %vm925_vm3, %v9067_v39, 0.0 }
0x1a48   :  { %v4675_v51 = vpop.xlane.xlu0 %4674  ;;  %4322 = vadd.xlane.f32.xlu1 %v4321_v60  ;;  %v4005_v60 = vpop.f32.mrf.mxu1 }
0x1a49   :  { %8145 = vpow2.f32 %v4561_v26  ;;  %v4679_v30 = vsub.f32 %v9001_v16, %v4675_v51  ;;  %v3392_v51 = vrot.slane %v8878_v63, %v8555_v59 }
0x1a4a   :  { %v9072_v3 = vpop.eup %8139 }
0x1a4b   :  { %v4681_v29 = vmul.f32 1.442695, %v4679_v30  ;;  %v4441_v33 = vsel %vm925_vm3, %v9072_v3, 0.0  ;;  %v4006_v30 = vadd.f32 %v4005_v60, %v3392_v51 }
0x1a4c   :  { %v4678_v41 = vpop.xlane.xlu1 %4677  ;;  %4442 = vadd.xlane.f32.xlu0 %v4441_v33 }
0x1a4d   :  { %8147 = vpow2.f32 %v4681_v29  ;;  %v4680_v38 = vsub.f32 %v9007_v17, %v4678_v41  ;;  %v4002_v29 = vadd.f32 %v8907_v47, %v3392_v51 }
0x1a4e   :  { %v9077_v44 = vpop.eup %8141 }
0x1a4f   :  { %v4683_v0 = vmul.f32 1.442695, %v4680_v38  ;;  %v4444_v45 = vsel %vm925_vm3, %v9077_v44, 0.0  ;;  %v4501_v33 = vpack.c.bf16 %v4006_v30, %v4002_v29 }
0x1a50   :  { %v4799_v56 = vpop.xlane.xlu0 %4798  ;;  %4445 = vadd.xlane.f32.xlu1 %v4444_v45 }
0x1a51   :  { %8149 = vpow2.f32 %v4683_v0 }
0x1a52   :  { %v9081_v16 = vpop.eup %8143 }
0x1a53   :  { %v4563_v58 = vsel %vm925_vm3, %v9081_v16, 0.0 }
0x1a54   :  { %v4074_v61 = vpop.xlane.xlu0 %4073  ;;  %v4802_v7 = vpop.xlane.xlu1 %4801  ;;  %4564 = vadd.xlane.f32.xlu0 %v4563_v58 }
0x1a55   :  { %v4804_v2 = vsub.f32 %v9021_v52, %v4802_v7  ;;  %8151 = vrcp.f32 %v4074_v61 }
0x1a56   :  { %v9086_v17 = vpop.eup %8145 }
0x1a57   :  { %v4807_v53 = vmul.f32 1.442695, %v4804_v2  ;;  %v4566_v48 = vsel %vm925_vm3, %v9086_v17, 0.0 }
0x1a58   :  { %v4077_v14 = vpop.xlane.xlu1 %4076  ;;  %v4922_v32 = vpop.xlane.xlu0 %4921  ;;  %4567 = vadd.xlane.f32.xlu1 %v4566_v48 }
0x1a59   :  { %8153 = vpow2.f32 %v4807_v53  ;;  %v4926_v4 = vsub.f32 %v9031_v28, %v4922_v32 }
0x1a5a   :  { %v9091_v1 = vpop.eup %8147  ;;  %8155 = vrcp.f32 %v4077_v14 }
0x1a5b   :  { %v4928_v11 = vmul.f32 1.442695, %v4926_v4  ;;  %v4685_v52 = vsel %vm925_vm3, %v9091_v1, 0.0 }
0x1a5c   :  { %4686 = vadd.xlane.f32.xlu1 %v4685_v52  ;;  %v4925_v22 = vpop.xlane.xlu1 %4924  ;;  %v4207_v42 = vpop.permute.xlu0 %4206 }
0x1a5d   :  { %8157 = vpow2.f32 %v4928_v11  ;;  %v4927_v10 = vsub.f32 %v9039_v43, %v4925_v22 }
0x1a5e   :  { %v9096_v55 = vpop.eup %8149 }
0x1a5f   :  { %v4930_v21 = vmul.f32 1.442695, %v4927_v10  ;;  %v4688_v50 = vsel %vm925_vm3, %v9096_v55, 0.0 }
0x1a60   :  { %4689 = vadd.xlane.f32.xlu1 %v4688_v50 }
0x1a61   :  { %8159 = vpow2.f32 %v4930_v21 }
0x1a62   :  { %v8152_v28 = vpop.eup %8151 }
0x1a63   :  { %v4080_v49 = vmul.f32 %v8152_v28, %v9017_v37 }
0x1a66   :  { %v9100_v8 = vpop.eup %8153 }
0x1a67   :  { %v8156_v57 = vpop.eup %8155  ;;  %v4812_v18 = vsel %vm925_vm3, %v9100_v8, 0.0 }
0x1a68   :  { %4813 = vadd.xlane.f32.xlu1 %v4812_v18  ;;  %v4081_v43 = vmul.f32 %v8156_v57, %v9027_v27 }
0x1a6a   :  { %v9106_v54 = vpop.eup %8157  ;;  %4452 = vrot.lane.b32.xlu0 %v8909_v40, %s8305_s12  ;;  %v4082_v23 = vpack.c.bf16 %v4081_v43, %v4080_v49  ;;  %v4803_v40 = vsub.f32 %v9013_v12, %v4799_v56  ;;  %v4330_v12 = vpop.permute.xlu1 %4329 }
0x1a6b   :  { %v4932_v25 = vsel %vm925_vm3, %v9106_v54, 0.0 }
0x1a6c   :  { %7125 = vmatmul.mubr.msk.bf16.vlgmr.msra.gmra.mxu1 %vm925_vm3, %v4082_v23  ;;  %4933 = vadd.xlane.f32.xlu1 %v4932_v25  ;;  %v4805_v26 = vmul.f32 1.442695, %v4803_v40 }
0x1a6d   :  { %7135 = vmatpush3.bf16.msra.mxu1 %v4207_v42  ;;  %7136 = vmatprep.mubr.msk.bf16.mxu1 %vm8302_vm0, %v8301_v6 }
0x1a6e   :  { %v9115_v37 = vpop.eup %8159  ;;  %7146 = vmatprep.subr.bf16.mxu1 %v8301_v6  ;;  %8161 = vpow2.f32 %v4805_v26 }
0x1a6f   :  { %v4935_v27 = vsel %vm925_vm3, %v9115_v37, 0.0 }
0x1a70   :  { %4936 = vadd.xlane.f32.xlu1 %v4935_v27 }
0x1a7b   :  { %v9125_v41 = vpop.eup %8161 }
0x1a7c   :  { %v4809_v38 = vsel %vm925_vm3, %v9125_v41, 0.0 }
0x1a81   :  { %4697 = vrot.lane.b32.xlu1 %v4501_v33, %s8303_s10 }
0x1a89   :  { %4810 = vadd.xlane.f32.xlu0 %v4809_v38 }
0x1a9f   :  { %4820 = vrot.lane.b32.xlu0 %v4501_v33, %s8304_s11 }
0x1aa3   :  { %4943 = vrot.lane.b32.xlu0 %v4501_v33, %s8305_s12 }
0x1ac5   :  { %v4196_v0 = vpop.xlane.xlu0 %4195 }
0x1ac6   :  { %8163 = vrcp.f32 %v4196_v0 }
0x1ac9   :  { %v4199_v63 = vpop.xlane.xlu1 %4198 }
0x1aca   :  { %8165 = vrcp.f32 %v4199_v63 }
0x1acd   :  { %v4320_v45 = vpop.xlane.xlu0 %4319 }
0x1ace   :  { %8167 = vrcp.f32 %v4320_v45 }
0x1ad1   :  { %v4323_v47 = vpop.xlane.xlu1 %4322 }
0x1ad2   :  { %8169 = vrcp.f32 %v4323_v47 }
0x1ad3   :  { %v8164_v56 = vpop.eup %8163 }
0x1ad4   :  { %v4202_v7 = vmul.f32 %v8164_v56, %v9052_v13 }
0x1ad5   :  { %v4443_v58 = vpop.xlane.xlu0 %4442 }
0x1ad6   :  { %8171 = vrcp.f32 %v4443_v58 }
0x1ad7   :  { %v8166_v61 = vpop.eup %8165 }
0x1ad8   :  { %v4203_v2 = vmul.f32 %v8166_v61, %v9057_v34 }
0x1ad9   :  { %v4446_v53 = vpop.xlane.xlu1 %4445 }
0x1ada   :  { %8173 = vrcp.f32 %v4446_v53  ;;  %v4204_v48 = vpack.c.bf16 %v4203_v2, %v4202_v7 }
0x1adb   :  { %v8168_v14 = vpop.eup %8167 }
0x1adc   :  { %7137 = vmatmul.mubr.msk.bf16.vlgmr.msra.gmra.mxu1 %vm925_vm3, %v4204_v48  ;;  %v4326_v11 = vmul.f32 %v8168_v14, %v9062_v20 }
0x1add   :  { %7147 = vmatpush3.bf16.msra.mxu1 %v4330_v12  ;;  %v4565_v32 = vpop.xlane.xlu0 %4564  ;;  %7148 = vmatprep.mubr.msk.bf16.mxu1 %vm8302_vm0, %v8301_v6 }
0x1ade   :  { %7158 = vmatprep.subr.bf16.mxu1 %v8301_v6  ;;  %8175 = vrcp.f32 %v4565_v32 }
0x1adf   :  { %v8170_v4 = vpop.eup %8169 }
0x1ae0   :  { %v4327_v13 = vmul.f32 %v8170_v4, %v9067_v39  ;;  %v7815_v4 = vld [vmem:[#allocation4 + $0x170] ss:$8 sps:$4 sm:$0xff]  }
0x1ae1   :  { %v4568_v34 = vpop.xlane.xlu1 %4567  ;;  %v4453_v22 = vpop.permute.xlu0 %4452 }
0x1ae2   :  { %8177 = vrcp.f32 %v4568_v34  ;;  %v4328_v52 = vpack.c.bf16 %v4327_v13, %v4326_v11  ;;  %v7817_v11 = vld [vmem:[#allocation4 + $0x174] ss:$8 sps:$4 sm:$0xff]   ;;  %v7820_v34 = vld [vmem:[#allocation4 + $0x164] ss:$8 sps:$4 sm:$0xff]  }
0x1ae3   :  { %v8172_v10 = vpop.eup %8171  ;;  %5253 = vmatprep.subr.bf16.mxu0 %v7817_v11 }
0x1ae4   :  { %7149 = vmatmul.mubr.msk.bf16.vlgmr.msra.gmra.mxu1 %vm925_vm3, %v4328_v52  ;;  %v4449_v28 = vmul.f32 %v8172_v10, %v9072_v3  ;;  %5254 = vmatpush1.bf16.msra.mxu0 %v7815_v4  ;;  %v7823_v10 = vld [vmem:[#allocation4 + $0x154] ss:$8 sps:$4 sm:$0xff]  }
0x1ae5   :  { %7159 = vmatpush3.bf16.msra.mxu1 %v4453_v22  ;;  %v4687_v21 = vpop.xlane.xlu1 %4686  ;;  %7160 = vmatprep.mubr.msk.bf16.mxu1 %vm8302_vm0, %v8301_v6  ;;  %v7818_v22 = vld [vmem:[#allocation4 + $0x160] ss:$8 sps:$4 sm:$0xff]  }
0x1ae6   :  { %7170 = vmatprep.subr.bf16.mxu1 %v8301_v6  ;;  %5255 = vmatprep.subr.bf16.mxu0 %v7820_v34 }
0x1ae7   :  { %v8174_v50 = vpop.eup %8173 }
0x1ae8   :  { %v4450_v20 = vmul.f32 %v8174_v50, %v9077_v44  ;;  %5256 = vmatpush1.bf16.msra.mxu0 %v7818_v22 }
0x1ae9   :  { %v4690_v39 = vpop.xlane.xlu1 %4689  ;;  %5257 = vmatprep.subr.bf16.mxu0 %v7823_v10 }
0x1aea   :  { %v4451_v57 = vpack.c.bf16 %v4450_v20, %v4449_v28  ;;  %8179 = vrcp.f32 %v4690_v39  ;;  %v7821_v28 = vld [vmem:[#allocation4 + $0x150] ss:$8 sps:$4 sm:$0xff]   ;;  %v7826_v39 = vld [vmem:[#allocation4 + $0x144] ss:$8 sps:$4 sm:$0xff]  }
0x1aeb   :  { %v8176_v18 = vpop.eup %8175  ;;  %8181 = vrcp.f32 %v4687_v21 }
0x1aec   :  { %7161 = vmatmul.mubr.msk.bf16.vlgmr.msra.gmra.mxu1 %vm925_vm3, %v4451_v57  ;;  %v4571_v43 = vmul.f32 %v8176_v18, %v9081_v16  ;;  %5258 = vmatpush1.bf16.msra.mxu0 %v7821_v28 }
0x1aed   :  { %7171 = vmatpush3.bf16.msra.mxu1 %v4501_v33  ;;  %7172 = vmatprep.mubr.msk.bf16.mxu1 %vm8302_vm0, %v8301_v6 }
0x1aee   :  { %7182 = vmatprep.subr.bf16.mxu1 %v8301_v6  ;;  %5259 = vmatprep.subr.bf16.mxu0 %v7826_v39 }
0x1aef   :  { %v8178_v49 = vpop.eup %8177 }
0x1af0   :  { %v4572_v3 = vmul.f32 %v8178_v49, %v9086_v17  ;;  %v7824_v49 = vld [vmem:[#allocation4 + $0x140] ss:$8 sps:$4 sm:$0xff]  }
0x1af1   :  { %v4814_v23 = vpop.xlane.xlu1 %4813  ;;  %5260 = vmatpush1.bf16.msra.mxu0 %v7824_v49 }
0x1af2   :  { %v4573_v44 = vpack.c.bf16 %v4572_v3, %v4571_v43  ;;  %8183 = vrcp.f32 %v4814_v23 }
0x1af4   :  { %7173 = vmatmul.mubr.msk.bf16.vlgmr.msra.gmra.mxu1 %vm925_vm3, %v4573_v44  ;;  %v7827_v44 = vld [vmem:[#allocation4 + $0x130] ss:$8 sps:$4 sm:$0xff]  }
0x1af5   :  { %v4934_v25 = vpop.xlane.xlu1 %4933  ;;  %7184 = vmatprep.mubr.msk.bf16.mxu1 %vm8302_vm0, %v8301_v6 }
0x1af7   :  { %v8180_v42 = vpop.eup %8179 }
0x1af8   :  { %v8182_v40 = vpop.eup %8181  ;;  %v4694_v26 = vmul.f32 %v8180_v42, %v9096_v55  ;;  %v7832_v42 = vld [vmem:[#allocation4 + $0x124] ss:$8 sps:$4 sm:$0xff]  }
0x1af9   :  { %v4937_v27 = vpop.xlane.xlu1 %4936  ;;  %v4693_v51 = vmul.f32 %v8182_v40, %v9091_v1 }
0x1afb   :  { %v4695_v16 = vpack.c.bf16 %v4694_v26, %v4693_v51  ;;  %v7835_v26 = vld [vmem:[#allocation4 + $0x114] ss:$8 sps:$4 sm:$0xff]   ;;  %v7833_v51 = vld [vmem:[#allocation4 + $0x110] ss:$8 sps:$4 sm:$0xff]  }
0x1afd   :  { %v4698_v60 = vpop.permute.xlu1 %4697 }
0x1afe   :  { %7183 = vmatpush3.bf16.msra.mxu1 %v4698_v60 }
0x1aff   :  { %7194 = vmatprep.subr.bf16.mxu1 %v8301_v6  ;;  %v8184_v55 = vpop.eup %8183 }
0x1b00   :  { %v4818_v33 = vmul.f32 %v8184_v55, %v9100_v8 }
0x1b01   :  { %7185 = vmatmul.mubr.msk.bf16.vlgmr.msra.gmra.mxu1 %vm925_vm3, %v4695_v16 }
0x1b02   :  { %7196 = vmatprep.mubr.msk.bf16.mxu1 %vm8302_vm0, %v8301_v6 }
0x1b12   :  { %v4811_v17 = vpop.xlane.xlu0 %4810 }
0x1b13   :  { %8185 = vrcp.f32 %v4811_v17  ;;  %v7838_v17 = vld [vmem:[#allocation4 + $0x104] ss:$8 sps:$4 sm:$0xff]  }
0x1b14   :  { %8187 = vrcp.f32 %v4937_v27  ;;  %v7830_v27 = vld [vmem:[#allocation4 + $0x120] ss:$8 sps:$4 sm:$0xff]  }
0x1b15   :  { %8189 = vrcp.f32 %v4934_v25  ;;  %v7829_v25 = vld [vmem:[#allocation4 + $0x134] ss:$8 sps:$4 sm:$0xff]  }
0x1b16   :  { %v4821_v30 = vpop.permute.xlu0 %4820  ;;  %5261 = vmatprep.subr.bf16.mxu0 %v7829_v25 }
0x1b17   :  { %7195 = vmatpush3.bf16.msra.mxu1 %v4821_v30  ;;  %5262 = vmatpush1.bf16.msra.mxu0 %v7827_v44 }
0x1b18   :  { %7206 = vmatprep.subr.bf16.mxu1 %v8301_v6  ;;  %5263 = vmatprep.subr.bf16.mxu0 %v7832_v42 }
0x1b1a   :  { %v4944_v0 = vpop.permute.xlu0 %4943 }
0x1b1b   :  { %5264 = vmatpush1.bf16.msra.mxu0 %v7830_v27 }
0x1b1c   :  { %5265 = vmatprep.subr.bf16.mxu0 %v7835_v26 }
0x1b1f   :  { %5266 = vmatpush1.bf16.msra.mxu0 %v7833_v51 }
0x1b20   :  { %v8186_v1 = vpop.eup %8185  ;;  %5267 = vmatprep.subr.bf16.mxu0 %v7838_v17 }
0x1b21   :  { %v4817_v29 = vmul.f32 %v8186_v1, %v9125_v41  ;;  %v8188_v12 = vpop.eup %8187  ;;  %v7836_v1 = vld [vmem:[#allocation4 + $0x100] ss:$8 sps:$4 sm:$0xff]  }
0x1b22   :  { %v8190_v63 = vpop.eup %8189  ;;  %v4941_v45 = vmul.f32 %v8188_v12, %v9115_v37  ;;  %v7842_v12 = vld [vmem:[#allocation4 + $0x1e0] ss:$8 sps:$4 sm:$0xff]  }
0x1b23   :  { %v4819_v38 = vpack.c.bf16 %v4818_v33, %v4817_v29  ;;  %v4940_v47 = vmul.f32 %v8190_v63, %v9106_v54  ;;  %v7841_v29 = vld [vmem:[#allocation4 + $0x1f4] ss:$8 sps:$4 sm:$0xff]   ;;  %5268 = vmatpush1.bf16.msra.mxu0 %v7836_v1  ;;  %v7839_v33 = vld [vmem:[#allocation4 + $0x1f0] ss:$8 sps:$4 sm:$0xff]  }
0x1b24   :  { %5269 = vmatprep.subr.bf16.mxu0 %v7841_v29  ;;  %v7845_v63 = vld [vmem:[#allocation4 + $0x1d0] ss:$8 sps:$4 sm:$0xff]  }
0x1b25   :  { %7197 = vmatmul.mubr.msk.bf16.vlgmr.msra.gmra.mxu1 %vm925_vm3, %v4819_v38  ;;  %v4942_v56 = vpack.c.bf16 %v4941_v45, %v4940_v47  ;;  %v7844_v38 = vld [vmem:[#allocation4 + $0x1e4] ss:$8 sps:$4 sm:$0xff]   ;;  %v7848_v47 = vld [vmem:[#allocation4 + $0x1c0] ss:$8 sps:$4 sm:$0xff]  }
0x1b26   :  { %7207 = vmatpush3.bf16.msra.mxu1 %v4944_v0  ;;  %7208 = vmatprep.mubr.msk.bf16.mxu1 %vm8302_vm0, %v8301_v6  ;;  %v7847_v0 = vld [vmem:[#allocation4 + $0x1d4] ss:$8 sps:$4 sm:$0xff]   ;;  %v7850_v45 = vld [vmem:[#allocation4 + $0x1c4] ss:$8 sps:$4 sm:$0xff]  }
0x1b27   :  { %5270 = vmatpush2.bf16.msra.mxu0 %v7839_v33 }
0x1b28   :  { %5271 = vmatprep.subr.bf16.mxu0 %v7844_v38 }
0x1b2b   :  { %5272 = vmatpush2.bf16.msra.mxu0 %v7842_v12 }
0x1b2c   :  { %v9168_v58 = vpop.f32.mrf.mxu1  ;;  %5273 = vmatprep.subr.bf16.mxu0 %v7847_v0 }
0x1b2d   :  { %7209 = vmatmul.mubr.msk.bf16.vlgmr.msra.gmra.mxu1 %vm925_vm3, %v4942_v56  ;;  %v7853_v56 = vld [vmem:[#allocation4 + $0x1b4] ss:$8 sps:$4 sm:$0xff]  }
0x1b2e   :  { %v7126_v8 = vpop.f32.mrf.mxu1 }
0x1b2f   :  { %5274 = vmatpush2.bf16.msra.mxu0 %v7845_v63  ;;  %v7851_v8 = vld [vmem:[#allocation4 + $0x1b0] ss:$8 sps:$4 sm:$0xff]  }
0x1b30   :  { %v9171_v41 = vpop.f32.mrf.mxu1  ;;  %5275 = vmatprep.subr.bf16.mxu0 %v7850_v45 }
0x1b32   :  { %v7127_v61 = vpop.f32.mrf.mxu1 }
0x1b33   :  { %5276 = vmatpush2.bf16.msra.mxu0 %v7848_v47  ;;  %v7854_v61 = vld [vmem:[#allocation4 + $0x1a0] ss:$8 sps:$4 sm:$0xff]  }
0x1b34   :  { %5277 = vmatprep.subr.bf16.mxu0 %v7853_v56 }
0x1b37   :  { %5278 = vmatpush2.bf16.msra.mxu0 %v7851_v8 }
0x1b9c   :  { %v4246_v7 = vpop.f32.mrf.mxu1 }
0x1b9e   :  { %v7138_v2 = vpop.f32.mrf.mxu1 }
0x1b9f   :  { %v7859_v2 = vld [vmem:[#allocation4 + $0x194] ss:$8 sps:$4 sm:$0xff]  }
0x1ba0   :  { %v4249_v53 = vpop.f32.mrf.mxu1 }
0x1ba1   :  { %v7257_v48 = vpack.i.bf16 %v4249_v53, %v4246_v7  ;;  %v7856_v7 = vld [vmem:[#allocation4 + $0x1a4] ss:$8 sps:$4 sm:$0xff]   ;;  %v7857_v53 = vld [vmem:[#allocation4 + $0x190] ss:$8 sps:$4 sm:$0xff]  }
0x1ba2   :  { %v7139_v14 = vpop.f32.mrf.mxu1  ;;  %5279 = vmatprep.subr.bf16.mxu0 %v7856_v7 }
0x1ba3   :  { %7258 = vrot.lane.b32.xlu1 %v7257_v48, %s8305_s12  ;;  %5280 = vmatpush2.bf16.msra.mxu0 %v7854_v61 }
0x1ba4   :  { %v4369_v6 = vpop.f32.mrf.mxu1  ;;  %5281 = vmatprep.subr.bf16.mxu0 %v7859_v2 }
0x1ba6   :  { %v7150_v37 = vpop.f32.mrf.mxu1 }
0x1ba7   :  { %5282 = vmatpush2.bf16.msra.mxu0 %v7857_v53  ;;  %v7860_v37 = vld [vmem:[#allocation4 + $0x180] ss:$8 sps:$4 sm:$0xff]  }
0x1ba8   :  { %v4372_v32 = vpop.f32.mrf.mxu1 }
0x1ba9   :  { %v7262_v54 = vpack.i.bf16 %v4372_v32, %v4369_v6  ;;  %v7862_v6 = vld [vmem:[#allocation4 + $0x184] ss:$8 sps:$4 sm:$0xff]  }
0x1baa   :  { %v7151_v13 = vpop.f32.mrf.mxu1  ;;  %5283 = vmatprep.subr.bf16.mxu0 %v7862_v6 }
0x1bab   :  { %7263 = vrot.lane.b32.xlu1 %v7262_v54, %s8304_s11  ;;  %5284 = vmatpush2.bf16.msra.mxu0 %v7860_v37 }
0x1bac   :  { %v4492_v52 = vpop.f32.mrf.mxu1 }
0x1bae   :  { %v7162_v21 = vpop.f32.mrf.mxu1 }
0x1bb0   :  { %v4495_v50 = vpop.f32.mrf.mxu1 }
0x1bb1   :  { %v7282_v20 = vpack.i.bf16 %v4495_v50, %v4492_v52 }
0x1bb2   :  { %v7163_v57 = vpop.f32.mrf.mxu1 }
0x1bb3   :  { %7283 = vrot.lane.b32.xlu1 %v7282_v20, %s8303_s10 }
0x1bb4   :  { %v9176_v18 = vpop.f32.mrf.mxu1 }
0x1bb6   :  { %v7174_v43 = vpop.f32.mrf.mxu1 }
0x1bb8   :  { %v9178_v3 = vpop.f32.mrf.mxu1 }
0x1bba   :  { %v7175_v23 = vpop.f32.mrf.mxu1 }
0x1bc1   :  { %v4737_v40 = vpop.f32.mrf.mxu1 }
0x1bc3   :  { %v7186_v60 = vpop.f32.mrf.mxu1 }
0x1bc5   :  { %v4740_v16 = vpop.f32.mrf.mxu1 }
0x1bc6   :  { %v7267_v30 = vpack.i.bf16 %v4740_v16, %v4737_v40 }
0x1bc7   :  { %v7187_v55 = vpop.f32.mrf.mxu1 }
0x1bc8   :  { %7268 = vrot.lane.b32.xlu0 %v7267_v30, %s8305_s12 }
0x1be5   :  { %v4860_v48 = vpop.f32.mrf.mxu1 }
0x1be7   :  { %v7198_v14 = vpop.f32.mrf.mxu1 }
0x1be9   :  { %v4863_v32 = vpop.f32.mrf.mxu1 }
0x1bea   :  { %v7272_v54 = vpack.i.bf16 %v4863_v32, %v4860_v48 }
0x1beb   :  { %v7199_v4 = vpop.f32.mrf.mxu1 }
0x1bec   :  { %7273 = vrot.lane.b32.xlu0 %v7272_v54, %s8304_s11 }
0x1bed   :  { %v4983_v11 = vpop.f32.mrf.mxu1 }
0x1bef   :  { %v7210_v13 = vpop.f32.mrf.mxu1 }
0x1bf0   :  { %v7866_v13 = vld [vmem:[#allocation6 + $0x2e8] ss:$16 sps:$4 sm:$0xff]  }
0x1bf1   :  { %v4986_v34 = vpop.f32.mrf.mxu1 }
0x1bf2   :  { %v7277_v52 = vpack.i.bf16 %v4986_v34, %v4983_v11  ;;  %v7863_v11 = vld [vmem:[#allocation6 + $0x2e0] ss:$16 sps:$4 sm:$0xff]   ;;  %v7868_v34 = vld [vmem:[#allocation6 + $0x2ec] ss:$16 sps:$4 sm:$0xff]  }
0x1bf3   :  { %v7211_v22 = vpop.f32.mrf.mxu1  ;;  %5802 = vmatprep.subr.bf16.mxu0 %v7868_v34  ;;  %v7934_v34 = vld [vmem:[#allocation6 + $0x38c] ss:$16 sps:$4 sm:$0xff]  }
0x1bf4   :  { %7278 = vrot.lane.b32.xlu0 %v7277_v52, %s8303_s10  ;;  %v7871_v52 = vld [vmem:[#allocation6 + $0x2c4] ss:$16 sps:$4 sm:$0xff]   ;;  %v7874_v22 = vld [vmem:[#allocation6 + $0x2cc] ss:$16 sps:$4 sm:$0xff]  }
0x1c15   :  { %v7259_v10 = vpop.permute.xlu1 %7258 }
0x1c16   :  { %v7261_v28 = vunpack.i.h.bf16 %v7259_v10  ;;  %v7260_v20 = vunpack.i.l.bf16 %v7259_v10  ;;  %v7869_v10 = vld [vmem:[#allocation6 + $0x2c0] ss:$16 sps:$4 sm:$0xff]  }
0x1c18   :  { %v5039_v26 = vsel %vm875_vm1, %v9171_v41, %v7261_v28  ;;  %v5038_v60 = vsel %vm875_vm1, %v9168_v58, %v7260_v20  ;;  %v7878_v28 = vld [vmem:[#allocation6 + $0x2a8] ss:$16 sps:$4 sm:$0xff]   ;;  %v7883_v20 = vld [vmem:[#allocation6 + $0x284] ss:$16 sps:$4 sm:$0xff]  }
0x1c1d   :  { %v7264_v21 = vpop.permute.xlu1 %7263 }
0x1c1e   :  { %v7266_v49 = vunpack.i.h.bf16 %v7264_v21  ;;  %v7265_v43 = vunpack.i.l.bf16 %v7264_v21  ;;  %v7880_v21 = vld [vmem:[#allocation6 + $0x2ac] ss:$16 sps:$4 sm:$0xff]  }
0x1c20   :  { %v5040_v51 = vsel %vm1906_vm5, %v5038_v60, %v7265_v43  ;;  %v5041_v16 = vsel %vm1906_vm5, %v5039_v26, %v7266_v49  ;;  %v7884_v49 = vld [vmem:[#allocation6 + $0x288] ss:$16 sps:$4 sm:$0xff]   ;;  %v7889_v43 = vld [vmem:[#allocation6 + $0x264] ss:$16 sps:$4 sm:$0xff]  }
0x1c21   :  { %v7896_v26 = vld [vmem:[#allocation6 + $0x248] ss:$16 sps:$4 sm:$0xff]   ;;  %v7901_v60 = vld [vmem:[#allocation6 + $0x224] ss:$16 sps:$4 sm:$0xff]  }
0x1c25   :  { %v7284_v39 = vpop.permute.xlu1 %7283 }
0x1c26   :  { %v7286_v25 = vunpack.i.h.bf16 %v7284_v39  ;;  %v7285_v42 = vunpack.i.l.bf16 %v7284_v39  ;;  %v7886_v39 = vld [vmem:[#allocation6 + $0x28c] ss:$16 sps:$4 sm:$0xff]  }
0x1c28   :  { %v5042_v33 = vsel %vm1909_vm6, %v5040_v51, %v7285_v42  ;;  %v5043_v41 = vsel %vm1909_vm6, %v5041_v16, %v7286_v25  ;;  %v7890_v25 = vld [vmem:[#allocation6 + $0x268] ss:$16 sps:$4 sm:$0xff]   ;;  %v7895_v42 = vld [vmem:[#allocation6 + $0x244] ss:$16 sps:$4 sm:$0xff]   ;;  %v7904_v51 = vld [vmem:[#allocation6 + $0x22c] ss:$16 sps:$4 sm:$0xff]  }
0x1c29   :  { %v5050_v45 = vpack.c.bf16 %v5043_v41, %v5042_v33  ;;  %v7899_v16 = vld [vmem:[#allocation6 + $0x220] ss:$16 sps:$4 sm:$0xff]   ;;  %v7913_v33 = vld [vmem:[#allocation6 + $0x3e4] ss:$16 sps:$4 sm:$0xff]   ;;  %v7916_v41 = vld [vmem:[#allocation6 + $0x3ec] ss:$16 sps:$4 sm:$0xff]  }
0x1c3a   :  { %v7269_v50 = vpop.permute.xlu0 %7268 }
0x1c3b   :  { %v7271_v23 = vunpack.i.h.bf16 %v7269_v50  ;;  %v7270_v44 = vunpack.i.l.bf16 %v7269_v50  ;;  %v7875_v50 = vld [vmem:[#allocation6 + $0x2a0] ss:$16 sps:$4 sm:$0xff]  }
0x1c3d   :  { %v5045_v30 = vsel %vm875_vm1, %v9178_v3, %v7271_v23  ;;  %v5044_v55 = vsel %vm875_vm1, %v9176_v18, %v7270_v44  ;;  %v9202_v18 = vld [vmem:[%s9319_s6 + $0x20] sm:$0x7f]  ;;  %v9207_v3 = vld [vmem:[%s9319_s6 + $0x28] sm:$0x7f] }
0x1c3e   :  { %v5088_v47 = vrot.slane %v9202_v18, %v8399_v15  ;;  %v5092_v56 = vrot.slane %v9207_v3, %v8399_v15  ;;  %v7892_v23 = vld [vmem:[#allocation6 + $0x26c] ss:$16 sps:$4 sm:$0xff]   ;;  %v7887_v44 = vld [vmem:[#allocation6 + $0x260] ss:$16 sps:$4 sm:$0xff]  }
0x1c5e   :  { %v7274_v57 = vpop.permute.xlu0 %7273 }
0x1c5f   :  { %v7276_v27 = vunpack.i.h.bf16 %v7274_v57  ;;  %v7275_v40 = vunpack.i.l.bf16 %v7274_v57  ;;  %v7881_v57 = vld [vmem:[#allocation6 + $0x280] ss:$16 sps:$4 sm:$0xff]  }
0x1c61   :  { %v5047_v38 = vsel %vm1906_vm5, %v5045_v30, %v7276_v27  ;;  %v5046_v58 = vsel %vm1906_vm5, %v5044_v55, %v7275_v40  ;;  %v7898_v27 = vld [vmem:[#allocation6 + $0x24c] ss:$16 sps:$4 sm:$0xff]   ;;  %v7893_v40 = vld [vmem:[#allocation6 + $0x240] ss:$16 sps:$4 sm:$0xff]   ;;  %v7907_v30 = vld [vmem:[#allocation6 + $0x204] ss:$16 sps:$4 sm:$0xff]  }
0x1c62   :  { %v7910_v55 = vld [vmem:[#allocation6 + $0x20c] ss:$16 sps:$4 sm:$0xff]  }
0x1c66   :  { %v7279_v17 = vpop.permute.xlu0 %7278 }
0x1c67   :  { %v7281_v1 = vunpack.i.h.bf16 %v7279_v17  ;;  %v7280_v29 = vunpack.i.l.bf16 %v7279_v17  ;;  %v7902_v17 = vld [vmem:[#allocation6 + $0x228] ss:$16 sps:$4 sm:$0xff]  }
0x1c69   :  { %v5048_v12 = vsel %vm1909_vm6, %v5046_v58, %v7280_v29  ;;  %v5049_v0 = vsel %vm1909_vm6, %v5047_v38, %v7281_v1  ;;  %v7905_v1 = vld [vmem:[#allocation6 + $0x200] ss:$16 sps:$4 sm:$0xff]   ;;  %v7908_v29 = vld [vmem:[#allocation6 + $0x208] ss:$16 sps:$4 sm:$0xff]  }
0x1c6a   :  { %v5051_v63 = vpack.c.bf16 %v5049_v0, %v5048_v12  ;;  %v7911_v38 = vld [vmem:[#allocation6 + $0x3e0] ss:$16 sps:$4 sm:$0xff]   ;;  %v7914_v58 = vld [vmem:[#allocation6 + $0x3e8] ss:$16 sps:$4 sm:$0xff]  }
0x1c6c   :  { %5285 = vmatprep.mubr.bf16.mxu0 %v5051_v63 }
0x1c6d   :  { %5286 = vmatmul.mubr.bf16.vlgmr.msra.gmra.mxu0 %v5050_v45 }
0x1c6e   :  { %5803 = vmatpush1.bf16.msra.mxu0 %v7866_v13  ;;  %v7931_v13 = vld [vmem:[#allocation6 + $0x384] ss:$16 sps:$4 sm:$0xff]  }
0x1c6f   :  { %5804 = vmatprep.subr.bf16.mxu0 %v7874_v22  ;;  %v7932_v22 = vld [vmem:[#allocation6 + $0x388] ss:$16 sps:$4 sm:$0xff]  }
0x1d2d   :  { %v5287_v8 = vpop.f32.mrf.mxu0 }
0x1d2e   :  { %v5288_v61 = vadd.f32 %v5287_v8, %v5088_v47 }
0x1d2f   :  { %v5289_v7 = vpop.f32.mrf.mxu0 }
0x1d30   :  { %v5290_v2 = vadd.f32 %v5289_v7, %v5092_v56  ;;  %v9214_v48 = vadd.f32 %v5288_v61, %v8857_v36 }
0x1d31   :  { %v5291_v53 = vpop.f32.mrf.mxu0 }
0x1d32   :  { %v9217_v14 = vadd.f32 %v5290_v2, %v8853_v5  ;;  %v5292_v6 = vadd.f32 %v5291_v53, %v5088_v47  ;;  %v7865_v5 = vld [vmem:[#allocation6 + $0x2e4] ss:$16 sps:$4 sm:$0xff]  }
0x1d33   :  { %v5293_v37 = vpop.f32.mrf.mxu0  ;;  %5759 = vmatprep.subr.bf16.mxu1 %v7865_v5  ;;  %v7926_v5 = vld [vmem:[#allocation6 + $0x3a8] ss:$16 sps:$4 sm:$0xff]  }
0x1d34   :  { %v5294_v32 = vadd.f32 %v5293_v37, %v5092_v56  ;;  %v5300_v54 = vadd.f32 %v9217_v14, %v9214_v48  ;;  %v9222_v4 = vadd.f32 %v5292_v6, %v8859_v35  ;;  %5760 = vmatpush1.bf16.msra.mxu1 %v7863_v11  ;;  %v7872_v35 = vld [vmem:[#allocation6 + $0x2c8] ss:$16 sps:$4 sm:$0xff]   ;;  %v7919_v37 = vld [vmem:[#allocation6 + $0x3c4] ss:$16 sps:$4 sm:$0xff]   ;;  %v7923_v11 = vld [vmem:[#allocation6 + $0x3a0] ss:$16 sps:$4 sm:$0xff]  }
0x1d35   :  { %5761 = vmatprep.subr.bf16.mxu1 %v7871_v52  ;;  %5805 = vmatpush1.bf16.msra.mxu0 %v7872_v35  ;;  %v7929_v52 = vld [vmem:[#allocation6 + $0x380] ss:$16 sps:$4 sm:$0xff]   ;;  %v7940_v35 = vld [vmem:[#allocation6 + $0x36c] ss:$16 sps:$4 sm:$0xff]  }
0x1d36   :  { %v9225_v15 = vadd.f32 %v5294_v32, %v8855_v24  ;;  %5301 = vadd.xlane.f32.xlu0 %v5300_v54  ;;  %v7877_v24 = vld [vmem:[#allocation6 + $0x2a4] ss:$16 sps:$4 sm:$0xff]   ;;  %5806 = vmatprep.subr.bf16.mxu0 %v7880_v21  ;;  %v7922_v32 = vld [vmem:[#allocation6 + $0x3cc] ss:$16 sps:$4 sm:$0xff]   ;;  %v7917_v54 = vld [vmem:[#allocation6 + $0x3c0] ss:$16 sps:$4 sm:$0xff]  }
0x1d37   :  { %v7938_v21 = vld [vmem:[#allocation6 + $0x368] ss:$16 sps:$4 sm:$0xff]  }
0x1d38   :  { %v5303_v36 = vadd.f32 %v9225_v15, %v9222_v4  ;;  %5762 = vmatpush1.bf16.msra.mxu1 %v7869_v10  ;;  %v7937_v10 = vld [vmem:[#allocation6 + $0x364] ss:$16 sps:$4 sm:$0xff]  }
0x1d39   :  { %5763 = vmatprep.subr.bf16.mxu1 %v7877_v24  ;;  %5807 = vmatpush1.bf16.msra.mxu0 %v7878_v28  ;;  %v7935_v24 = vld [vmem:[#allocation6 + $0x360] ss:$16 sps:$4 sm:$0xff]   ;;  %v7946_v28 = vld [vmem:[#allocation6 + $0x34c] ss:$16 sps:$4 sm:$0xff]  }
0x1d3a   :  { %5304 = vadd.xlane.f32.xlu1 %v5303_v36  ;;  %5808 = vmatprep.subr.bf16.mxu0 %v7886_v39  ;;  %v7920_v36 = vld [vmem:[#allocation6 + $0x3c8] ss:$16 sps:$4 sm:$0xff]  }
0x1d3b   :  { %v7944_v39 = vld [vmem:[#allocation6 + $0x348] ss:$16 sps:$4 sm:$0xff]  }
0x1d3c   :  { %5764 = vmatpush1.bf16.msra.mxu1 %v7875_v50  ;;  %v7943_v50 = vld [vmem:[#allocation6 + $0x344] ss:$16 sps:$4 sm:$0xff]  }
0x1d3d   :  { %5765 = vmatprep.subr.bf16.mxu1 %v7883_v20  ;;  %5809 = vmatpush1.bf16.msra.mxu0 %v7884_v49  ;;  %v7941_v20 = vld [vmem:[#allocation6 + $0x340] ss:$16 sps:$4 sm:$0xff]   ;;  %v7949_v49 = vld [vmem:[#allocation6 + $0x324] ss:$16 sps:$4 sm:$0xff]  }
0x1d3e   :  { %5810 = vmatprep.subr.bf16.mxu0 %v7892_v23  ;;  %v7952_v23 = vld [vmem:[#allocation6 + $0x32c] ss:$16 sps:$4 sm:$0xff]  }
0x1d40   :  { %5766 = vmatpush1.bf16.msra.mxu1 %v7881_v57  ;;  %v7947_v57 = vld [vmem:[#allocation6 + $0x320] ss:$16 sps:$4 sm:$0xff]  }
0x1d41   :  { %5767 = vmatprep.subr.bf16.mxu1 %v7889_v43  ;;  %5811 = vmatpush1.bf16.msra.mxu0 %v7890_v25  ;;  %v7950_v43 = vld [vmem:[#allocation6 + $0x328] ss:$16 sps:$4 sm:$0xff]   ;;  %v7958_v25 = vld [vmem:[#allocation6 + $0x30c] ss:$16 sps:$4 sm:$0xff]  }
0x1d42   :  { %5812 = vmatprep.subr.bf16.mxu0 %v7898_v27  ;;  %v7956_v27 = vld [vmem:[#allocation6 + $0x308] ss:$16 sps:$4 sm:$0xff]  }
0x1d44   :  { %5768 = vmatpush1.bf16.msra.mxu1 %v7887_v44  ;;  %v7955_v44 = vld [vmem:[#allocation6 + $0x304] ss:$16 sps:$4 sm:$0xff]  }
0x1d45   :  { %5769 = vmatprep.subr.bf16.mxu1 %v7895_v42  ;;  %5813 = vmatpush1.bf16.msra.mxu0 %v7896_v26  ;;  %v7953_v42 = vld [vmem:[#allocation6 + $0x300] ss:$16 sps:$4 sm:$0xff]   ;;  %v7964_v26 = vld [vmem:[#allocation7 + $0x374] ss:$8 sps:$4 sm:$0xff]  }
0x1d46   :  { %5814 = vmatprep.subr.bf16.mxu0 %v7904_v51 }
0x1d48   :  { %5770 = vmatpush1.bf16.msra.mxu1 %v7893_v40  ;;  %v7961_v40 = vld [vmem:[#allocation7 + $0x274] ss:$8 sps:$4 sm:$0xff]  }
0x1d49   :  { %5771 = vmatprep.subr.bf16.mxu1 %v7901_v60  ;;  %5815 = vmatpush1.bf16.msra.mxu0 %v7902_v17 }
0x1d4a   :  { %5816 = vmatprep.subr.bf16.mxu0 %v7910_v55 }
0x1d4c   :  { %5772 = vmatpush1.bf16.msra.mxu1 %v7899_v16 }
0x1d4d   :  { %5773 = vmatprep.subr.bf16.mxu1 %v7907_v30  ;;  %5817 = vmatpush1.bf16.msra.mxu0 %v7908_v29 }
0x1d4e   :  { %5818 = vmatprep.subr.bf16.mxu0 %v7916_v41  ;;  %v5339_v41 = vrot.slane %v9207_v3, %v8548_v19 }
0x1d50   :  { %5774 = vmatpush1.bf16.msra.mxu1 %v7905_v1 }
0x1d51   :  { %5775 = vmatprep.subr.bf16.mxu1 %v7913_v33  ;;  %5819 = vmatpush2.bf16.msra.mxu0 %v7914_v58 }
0x1d52   :  { %5820 = vmatprep.subr.bf16.mxu0 %v7922_v32  ;;  %v7970_v32 = vld [vmem:[#allocation7 + $0x364] ss:$8 sps:$4 sm:$0xff]  }
0x1d54   :  { %5776 = vmatpush2.bf16.msra.mxu1 %v7911_v38  ;;  %v5335_v38 = vrot.slane %v9202_v18, %v8548_v19 }
0x1d55   :  { %5777 = vmatprep.subr.bf16.mxu1 %v7919_v37  ;;  %5821 = vmatpush2.bf16.msra.mxu0 %v7920_v36  ;;  %v7967_v37 = vld [vmem:[#allocation7 + $0x264] ss:$8 sps:$4 sm:$0xff]   ;;  %v7968_v36 = vld [vmem:[#allocation7 + $0x360] ss:$8 sps:$4 sm:$0xff]  }
0x1d58   :  { %5778 = vmatpush2.bf16.msra.mxu1 %v7917_v54  ;;  %v7965_v54 = vld [vmem:[#allocation7 + $0x260] ss:$8 sps:$4 sm:$0xff]  }
0x1dbf   :  { %v5302_v12 = vpop.xlane.xlu0 %5301 }
0x1dc0   :  { %v5306_v0 = vmul.f32 0.00390625, %v5302_v12  ;;  %v5351_v12 = vrot.slane %v9207_v3, %v8443_v31 }
0x1dc2   :  { %v9230_v63 = vsub.f32 %v9214_v48, %v5306_v0  ;;  %v9233_v45 = vsub.f32 %v9217_v14, %v5306_v0  ;;  %v5347_v0 = vrot.slane %v9202_v18, %v8443_v31 }
0x1dc3   :  { %v5305_v47 = vpop.xlane.xlu1 %5304 }
0x1dc4   :  { %v5312_v56 = vmul.f32 %v9230_v63, %v9230_v63  ;;  %v5313_v8 = vmul.f32 %v9233_v45, %v9233_v45  ;;  %v5307_v61 = vmul.f32 0.00390625, %v5305_v47 }
0x1dc6   :  { %v9240_v7 = vsub.f32 %v9222_v4, %v5307_v61  ;;  %v9243_v2 = vsub.f32 %v9225_v15, %v5307_v61  ;;  %v5316_v53 = vadd.f32 %v5313_v8, %v5312_v56  ;;  %v7925_v4 = vld [vmem:[#allocation6 + $0x3a4] ss:$16 sps:$4 sm:$0xff]   ;;  %v7928_v15 = vld [vmem:[#allocation6 + $0x3ac] ss:$16 sps:$4 sm:$0xff]  }
0x1dc7   :  { %5779 = vmatprep.subr.bf16.mxu1 %v7925_v4  ;;  %5822 = vmatprep.subr.bf16.mxu0 %v7928_v15  ;;  %v7973_v4 = vld [vmem:[#allocation7 + $0x254] ss:$8 sps:$4 sm:$0xff]  }
0x1dc8   :  { %v5314_v48 = vmul.f32 %v9240_v7, %v9240_v7  ;;  %v5315_v14 = vmul.f32 %v9243_v2, %v9243_v2  ;;  %5317 = vadd.xlane.f32.xlu0 %v5316_v53  ;;  %5780 = vmatpush2.bf16.msra.mxu1 %v7923_v11  ;;  %v7976_v15 = vld [vmem:[#allocation7 + $0x354] ss:$8 sps:$4 sm:$0xff]   ;;  %v7971_v11 = vld [vmem:[#allocation7 + $0x250] ss:$8 sps:$4 sm:$0xff]  }
0x1dc9   :  { %5823 = vmatpush2.bf16.msra.mxu0 %v7926_v5  ;;  %5781 = vmatprep.subr.bf16.mxu1 %v7931_v13  ;;  %v7974_v5 = vld [vmem:[#allocation7 + $0x350] ss:$8 sps:$4 sm:$0xff]   ;;  %v7979_v13 = vld [vmem:[#allocation7 + $0x244] ss:$8 sps:$4 sm:$0xff]  }
0x1dca   :  { %v5319_v6 = vadd.f32 %v5315_v14, %v5314_v48  ;;  %5824 = vmatprep.subr.bf16.mxu0 %v7934_v34  ;;  %v7982_v34 = vld [vmem:[#allocation7 + $0x344] ss:$8 sps:$4 sm:$0xff]  }
0x1dcc   :  { %5320 = vadd.xlane.f32.xlu0 %v5319_v6  ;;  %5782 = vmatpush2.bf16.msra.mxu1 %v7929_v52  ;;  %v7977_v52 = vld [vmem:[#allocation7 + $0x240] ss:$8 sps:$4 sm:$0xff]  }
0x1dcd   :  { %5825 = vmatpush2.bf16.msra.mxu0 %v7932_v22  ;;  %5783 = vmatprep.subr.bf16.mxu1 %v7937_v10  ;;  %v7980_v22 = vld [vmem:[#allocation7 + $0x340] ss:$8 sps:$4 sm:$0xff]   ;;  %v7985_v10 = vld [vmem:[#allocation7 + $0x234] ss:$8 sps:$4 sm:$0xff]  }
0x1dce   :  { %5826 = vmatprep.subr.bf16.mxu0 %v7940_v35  ;;  %v7988_v35 = vld [vmem:[#allocation7 + $0x334] ss:$8 sps:$4 sm:$0xff]  }
0x1dd0   :  { %5784 = vmatpush2.bf16.msra.mxu1 %v7935_v24  ;;  %v7983_v24 = vld [vmem:[#allocation7 + $0x230] ss:$8 sps:$4 sm:$0xff]  }
0x1dd1   :  { %5827 = vmatpush2.bf16.msra.mxu0 %v7938_v21  ;;  %5785 = vmatprep.subr.bf16.mxu1 %v7943_v50  ;;  %v7986_v21 = vld [vmem:[#allocation7 + $0x330] ss:$8 sps:$4 sm:$0xff]   ;;  %v7991_v50 = vld [vmem:[#allocation7 + $0x224] ss:$8 sps:$4 sm:$0xff]  }
0x1dd2   :  { %5828 = vmatprep.subr.bf16.mxu0 %v7946_v28  ;;  %v7994_v28 = vld [vmem:[#allocation7 + $0x324] ss:$8 sps:$4 sm:$0xff]  }
0x1dd4   :  { %5786 = vmatpush2.bf16.msra.mxu1 %v7941_v20  ;;  %v7989_v20 = vld [vmem:[#allocation7 + $0x220] ss:$8 sps:$4 sm:$0xff]  }
0x1dd5   :  { %5829 = vmatpush2.bf16.msra.mxu0 %v7944_v39  ;;  %5787 = vmatprep.subr.bf16.mxu1 %v7949_v49  ;;  %v7992_v39 = vld [vmem:[#allocation7 + $0x320] ss:$8 sps:$4 sm:$0xff]   ;;  %v8000_v49 = vld [vmem:[#allocation7 + $0x314] ss:$8 sps:$4 sm:$0xff]  }
0x1dd6   :  { %5830 = vmatprep.subr.bf16.mxu0 %v7952_v23  ;;  %v7998_v23 = vld [vmem:[#allocation7 + $0x310] ss:$8 sps:$4 sm:$0xff]  }
0x1dd8   :  { %5788 = vmatpush2.bf16.msra.mxu1 %v7947_v57  ;;  %v7997_v57 = vld [vmem:[#allocation7 + $0x214] ss:$8 sps:$4 sm:$0xff]  }
0x1dd9   :  { %5831 = vmatpush2.bf16.msra.mxu0 %v7950_v43  ;;  %5789 = vmatprep.subr.bf16.mxu1 %v7955_v44  ;;  %v7995_v43 = vld [vmem:[#allocation7 + $0x210] ss:$8 sps:$4 sm:$0xff]   ;;  %v8003_v44 = vld [vmem:[#allocation7 + $0x204] ss:$8 sps:$4 sm:$0xff]  }
0x1dda   :  { %5832 = vmatprep.subr.bf16.mxu0 %v7958_v25  ;;  %v8006_v25 = vld [vmem:[#allocation7 + $0x304] ss:$8 sps:$4 sm:$0xff]  }
0x1ddc   :  { %5790 = vmatpush2.bf16.msra.mxu1 %v7953_v42  ;;  %v8001_v42 = vld [vmem:[#allocation7 + $0x200] ss:$8 sps:$4 sm:$0xff]  }
0x1ddd   :  { %5833 = vmatpush2.bf16.msra.mxu0 %v7956_v27  ;;  %6250 = vmatprep.subr.bf16.mxu1 %v7961_v40  ;;  %v8004_v27 = vld [vmem:[#allocation7 + $0x300] ss:$8 sps:$4 sm:$0xff]   ;;  %v8009_v40 = vld [vmem:[#allocation7 + $0x2f4] ss:$8 sps:$4 sm:$0xff]  }
0x1dde   :  { %6293 = vmatprep.subr.bf16.mxu0 %v7964_v26  ;;  %v8012_v26 = vld [vmem:[#allocation7 + $0x3f4] ss:$8 sps:$4 sm:$0xff]  }
0x1e51   :  { %v5318_v60 = vpop.xlane.xlu0 %5317 }
0x1e52   :  { %v5322_v51 = vmul.f32 0.00390625, %v5318_v60  ;;  %v8007_v60 = vld [vmem:[#allocation7 + $0x2f0] ss:$8 sps:$4 sm:$0xff]  }
0x1e54   :  { %v5324_v16 = vadd.f32 1e-05, %v5322_v51  ;;  %v8010_v51 = vld [vmem:[#allocation7 + $0x3f0] ss:$8 sps:$4 sm:$0xff]  }
0x1e55   :  { %v5321_v17 = vpop.xlane.xlu0 %5320 }
0x1e56   :  { %8191 = vrsqrt.f32 %v5324_v16  ;;  %v5323_v30 = vmul.f32 0.00390625, %v5321_v17  ;;  %v8015_v16 = vld [vmem:[#allocation7 + $0x2e4] ss:$8 sps:$4 sm:$0xff]  }
0x1e57   :  { %v8018_v17 = vld [vmem:[#allocation7 + $0x3e4] ss:$8 sps:$4 sm:$0xff]  }
0x1e58   :  { %v5325_v55 = vadd.f32 1e-05, %v5323_v30  ;;  %v8013_v30 = vld [vmem:[#allocation7 + $0x2e0] ss:$8 sps:$4 sm:$0xff]  }
0x1e5a   :  { %8193 = vrsqrt.f32 %v5325_v55  ;;  %v8016_v55 = vld [vmem:[#allocation7 + $0x3e0] ss:$8 sps:$4 sm:$0xff]  }
0x1e63   :  { %v8192_v1 = vpop.eup %8191 }
0x1e64   :  { %v5328_v29 = vmul.f32 %v8192_v1, %v9230_v63  ;;  %v5329_v33 = vmul.f32 %v8192_v1, %v9233_v45  ;;  %v8021_v1 = vld [vmem:[#allocation7 + $0x2d4] ss:$8 sps:$4 sm:$0xff]  }
0x1e66   :  { %v5341_v63 = vmul.f32 %v5339_v41, %v5329_v33  ;;  %v5340_v8 = vmul.f32 %v5335_v38, %v5328_v29  ;;  %v8024_v29 = vld [vmem:[#allocation7 + $0x3d4] ss:$8 sps:$4 sm:$0xff]   ;;  %v8019_v33 = vld [vmem:[#allocation7 + $0x2d0] ss:$8 sps:$4 sm:$0xff]  }
0x1e67   :  { %v8194_v58 = vpop.eup %8193 }
0x1e68   :  { %v5330_v47 = vmul.f32 %v8194_v58, %v9240_v7  ;;  %v5331_v56 = vmul.f32 %v8194_v58, %v9243_v2  ;;  %v9261_v53 = vadd.f32 %v5351_v12, %v5341_v63  ;;  %v9265_v19 = vadd.f32 %v5347_v0, %v5340_v8  ;;  %v7959_v7 = vld [vmem:[#allocation7 + $0x270] ss:$8 sps:$4 sm:$0xff]   ;;  %v8030_v58 = vld [vmem:[#allocation7 + $0x3c4] ss:$8 sps:$4 sm:$0xff]  }
0x1e69   :  { %v7962_v2 = vld [vmem:[#allocation7 + $0x370] ss:$8 sps:$4 sm:$0xff]  }
0x1e6a   :  { %v5343_v45 = vmul.f32 %v5339_v41, %v5331_v56  ;;  %v5342_v61 = vmul.f32 %v5335_v38, %v5330_v47  ;;  %v8022_v41 = vld [vmem:[#allocation7 + $0x3d0] ss:$8 sps:$4 sm:$0xff]   ;;  %v8027_v38 = vld [vmem:[#allocation7 + $0x2c4] ss:$8 sps:$4 sm:$0xff]   ;;  %v8033_v47 = vld [vmem:[#allocation7 + $0x2b4] ss:$8 sps:$4 sm:$0xff]  }
0x1e6b   :  { %v8036_v56 = vld [vmem:[#allocation7 + $0x3b4] ss:$8 sps:$4 sm:$0xff]   ;;  %v8031_v63 = vld [vmem:[#allocation7 + $0x2b0] ss:$8 sps:$4 sm:$0xff]  }
0x1e6c   :  { %v9263_v48 = vadd.f32 %v5351_v12, %v5343_v45  ;;  %v9267_v14 = vadd.f32 %v5347_v0, %v5342_v61  ;;  %v8025_v12 = vld [vmem:[#allocation7 + $0x2c0] ss:$8 sps:$4 sm:$0xff]   ;;  %v8034_v8 = vld [vmem:[#allocation7 + $0x3b0] ss:$8 sps:$4 sm:$0xff]   ;;  %v8039_v45 = vld [vmem:[#allocation7 + $0x2a4] ss:$8 sps:$4 sm:$0xff]  }
0x1e6d   :  { %v8028_v0 = vld [vmem:[#allocation7 + $0x3c0] ss:$8 sps:$4 sm:$0xff]   ;;  %v8042_v61 = vld [vmem:[#allocation7 + $0x3a4] ss:$8 sps:$4 sm:$0xff]  }
0x1e6e   :  { %v5357_v6 = vpack.c.bf16 %v9263_v48, %v9261_v53  ;;  %v5356_v31 = vpack.c.bf16 %v9267_v14, %v9265_v19 }
0x1e70   :  { %5791 = vmatprep.mubr.bf16.mxu1 %v5357_v6  ;;  %5834 = vmatprep.mubr.bf16.mxu0 %v5357_v6  ;;  %v8037_v6 = vld [vmem:[#allocation7 + $0x2a0] ss:$8 sps:$4 sm:$0xff]  }
0x1e71   :  { %5792 = vmatmul.mubr.bf16.vlgmr.msra.gmra.mxu1 %v5356_v31  ;;  %5835 = vmatmul.mubr.bf16.vlgmr.msra.gmra.mxu0 %v5356_v31  ;;  %v8040_v31 = vld [vmem:[#allocation7 + $0x3a0] ss:$8 sps:$4 sm:$0xff]  }
0x1e72   :  { %6251 = vmatpush1.bf16.msra.mxu1 %v7959_v7  ;;  %6294 = vmatpush1.bf16.msra.mxu0 %v7962_v2  ;;  %v8045_v7 = vld [vmem:[#allocation7 + $0x294] ss:$8 sps:$4 sm:$0xff]  }
0x1e73   :  { %6252 = vmatprep.subr.bf16.mxu1 %v7967_v37  ;;  %6295 = vmatprep.subr.bf16.mxu0 %v7970_v32  ;;  %v8048_v2 = vld [vmem:[#allocation7 + $0x394] ss:$8 sps:$4 sm:$0xff]   ;;  %v8043_v37 = vld [vmem:[#allocation7 + $0x290] ss:$8 sps:$4 sm:$0xff]  }
0x1e74   :  { %v8046_v32 = vld [vmem:[#allocation7 + $0x390] ss:$8 sps:$4 sm:$0xff]  }
0x1e76   :  { %6253 = vmatpush1.bf16.msra.mxu1 %v7965_v54  ;;  %6296 = vmatpush1.bf16.msra.mxu0 %v7968_v36  ;;  %v8051_v54 = vld [vmem:[#allocation7 + $0x284] ss:$8 sps:$4 sm:$0xff]  }
0x1e77   :  { %6254 = vmatprep.subr.bf16.mxu1 %v7973_v4  ;;  %6297 = vmatprep.subr.bf16.mxu0 %v7976_v15  ;;  %v8054_v36 = vld [vmem:[#allocation7 + $0x384] ss:$8 sps:$4 sm:$0xff]   ;;  %v8049_v4 = vld [vmem:[#allocation7 + $0x280] ss:$8 sps:$4 sm:$0xff]  }
0x1e78   :  { %v8052_v15 = vld [vmem:[#allocation7 + $0x380] ss:$8 sps:$4 sm:$0xff]  }
0x1e7a   :  { %6255 = vmatpush1.bf16.msra.mxu1 %v7971_v11  ;;  %6298 = vmatpush1.bf16.msra.mxu0 %v7974_v5  ;;  %v6682_v11 = vld [vmem:[%s9319_s6 + $0x38] sm:$0x7f]  ;;  %v6681_v5 = vld [vmem:[%s9319_s6 + $0x30] sm:$0x7f] }
0x1e7b   :  { %6256 = vmatprep.subr.bf16.mxu1 %v7979_v13  ;;  %6299 = vmatprep.subr.bf16.mxu0 %v7982_v34 }
0x1e7e   :  { %6257 = vmatpush1.bf16.msra.mxu1 %v7977_v52  ;;  %6300 = vmatpush1.bf16.msra.mxu0 %v7980_v22  ;;  %v5430_v52 = vrot.slane %v9207_v3, %v8534_v46  ;;  %v5438_v22 = vrot.slane %v6682_v11, %v8534_v46 }
0x1e7f   :  { %6258 = vmatprep.subr.bf16.mxu1 %v7985_v10  ;;  %6301 = vmatprep.subr.bf16.mxu0 %v7988_v35  ;;  %v5426_v10 = vrot.slane %v9202_v18, %v8534_v46  ;;  %v5434_v35 = vrot.slane %v6681_v5, %v8534_v46 }
0x1e82   :  { %6259 = vmatpush1.bf16.msra.mxu1 %v7983_v24  ;;  %6302 = vmatpush1.bf16.msra.mxu0 %v7986_v21 }
0x1e83   :  { %6260 = vmatprep.subr.bf16.mxu1 %v7991_v50  ;;  %6303 = vmatprep.subr.bf16.mxu0 %v7994_v28 }
0x1e86   :  { %6261 = vmatpush1.bf16.msra.mxu1 %v7989_v20  ;;  %6304 = vmatpush1.bf16.msra.mxu0 %v7992_v39 }
0x1e87   :  { %6262 = vmatprep.subr.bf16.mxu1 %v7997_v57  ;;  %6305 = vmatprep.subr.bf16.mxu0 %v8000_v49 }
0x1e8a   :  { %6263 = vmatpush1.bf16.msra.mxu1 %v7995_v43  ;;  %6306 = vmatpush1.bf16.msra.mxu0 %v7998_v23 }
0x1e8b   :  { %6264 = vmatprep.subr.bf16.mxu1 %v8003_v44  ;;  %6307 = vmatprep.subr.bf16.mxu0 %v8006_v25 }
0x1e8e   :  { %6265 = vmatpush1.bf16.msra.mxu1 %v8001_v42  ;;  %6308 = vmatpush1.bf16.msra.mxu0 %v8004_v27 }
0x1e8f   :  { %6266 = vmatprep.subr.bf16.mxu1 %v8009_v40  ;;  %6309 = vmatprep.subr.bf16.mxu0 %v8012_v26 }
0x1e92   :  { %6267 = vmatpush2.bf16.msra.mxu1 %v8007_v60  ;;  %6310 = vmatpush2.bf16.msra.mxu0 %v8010_v51 }
0x1e93   :  { %6268 = vmatprep.subr.bf16.mxu1 %v8015_v16  ;;  %6311 = vmatprep.subr.bf16.mxu0 %v8018_v17 }
0x1e96   :  { %6269 = vmatpush2.bf16.msra.mxu1 %v8013_v30  ;;  %6312 = vmatpush2.bf16.msra.mxu0 %v8016_v55 }
0x1e97   :  { %6270 = vmatprep.subr.bf16.mxu1 %v8021_v1  ;;  %6313 = vmatprep.subr.bf16.mxu0 %v8024_v29 }
0x1e9a   :  { %6271 = vmatpush2.bf16.msra.mxu1 %v8019_v33  ;;  %6314 = vmatpush2.bf16.msra.mxu0 %v8022_v41  ;;  %v5925_v41 = vrot.slane %v9202_v18, %v8387_v9 }
0x1e9b   :  { %6272 = vmatprep.subr.bf16.mxu1 %v8027_v38  ;;  %6315 = vmatprep.subr.bf16.mxu0 %v8030_v58  ;;  %v5929_v38 = vrot.slane %v9207_v3, %v8387_v9 }
0x1e9e   :  { %6273 = vmatpush2.bf16.msra.mxu1 %v8025_v12  ;;  %6316 = vmatpush2.bf16.msra.mxu0 %v8028_v0 }
0x1e9f   :  { %6274 = vmatprep.subr.bf16.mxu1 %v8033_v47  ;;  %6317 = vmatprep.subr.bf16.mxu0 %v8036_v56 }
0x1ea2   :  { %6275 = vmatpush2.bf16.msra.mxu1 %v8031_v63  ;;  %6318 = vmatpush2.bf16.msra.mxu0 %v8034_v8 }
0x1ea3   :  { %6276 = vmatprep.subr.bf16.mxu1 %v8039_v45  ;;  %6319 = vmatprep.subr.bf16.mxu0 %v8042_v61 }
0x1ea6   :  { %6277 = vmatpush2.bf16.msra.mxu1 %v8037_v6  ;;  %6320 = vmatpush2.bf16.msra.mxu0 %v8040_v31 }
0x1ea7   :  { %6278 = vmatprep.subr.bf16.mxu1 %v8045_v7  ;;  %6321 = vmatprep.subr.bf16.mxu0 %v8048_v2 }
0x1eaa   :  { %6279 = vmatpush2.bf16.msra.mxu1 %v8043_v37  ;;  %6322 = vmatpush2.bf16.msra.mxu0 %v8046_v32 }
0x1eab   :  { %6280 = vmatprep.subr.bf16.mxu1 %v8051_v54  ;;  %6323 = vmatprep.subr.bf16.mxu0 %v8054_v36 }
0x1eae   :  { %6281 = vmatpush2.bf16.msra.mxu1 %v8049_v4  ;;  %6324 = vmatpush2.bf16.msra.mxu0 %v8052_v15 }
0x1f31   :  { %v5793_v13 = vpop.f32.mrf.mxu1  ;;  %v5836_v34 = vpop.f32.mrf.mxu0 }
0x1f32   :  { %v5794_v43 = vadd.f32 %v5793_v13, %v5426_v10  ;;  %v5837_v23 = vadd.f32 %v5836_v34, %v5434_v35 }
0x1f33   :  { %v5795_v24 = vpop.f32.mrf.mxu1  ;;  %v5838_v21 = vpop.f32.mrf.mxu0 }
0x1f34   :  { %v5796_v20 = vadd.f32 %v5795_v24, %v5430_v52  ;;  %v5839_v39 = vadd.f32 %v5838_v21, %v5438_v22  ;;  %v5845_v17 = vmax.f32 %v5794_v43, 0.0  ;;  %v5847_v30 = vmax.f32 %v5837_v23, 0.0 }
0x1f35   :  { %v5797_v50 = vpop.f32.mrf.mxu1  ;;  %v5840_v28 = vpop.f32.mrf.mxu0 }
0x1f36   :  { %v5798_v57 = vadd.f32 %v5797_v50, %v5426_v10  ;;  %v5841_v49 = vadd.f32 %v5840_v28, %v5434_v35  ;;  %v5846_v60 = vmax.f32 %v5796_v20, 0.0  ;;  %v5848_v51 = vmax.f32 %v5839_v39, 0.0 }
0x1f37   :  { %v5799_v44 = vpop.f32.mrf.mxu1  ;;  %v5842_v25 = vpop.f32.mrf.mxu0 }
0x1f38   :  { %v5800_v42 = vadd.f32 %v5799_v44, %v5430_v52  ;;  %v5843_v27 = vadd.f32 %v5842_v25, %v5438_v22  ;;  %v5849_v40 = vmax.f32 %v5798_v57, 0.0  ;;  %v5851_v26 = vmax.f32 %v5841_v49, 0.0 }
0x1f39   :  { %v6375_v44 = vrot.slane %v9202_v18, %v8555_v59  ;;  %v6379_v25 = vrot.slane %v9207_v3, %v8555_v59 }
0x1f3a   :  { %v5850_v16 = vmax.f32 %v5800_v42, 0.0  ;;  %v5852_v46 = vmax.f32 %v5843_v27, 0.0  ;;  %v5853_v29 = vpack.c.bf16 %v5849_v40, %v5845_v17  ;;  %v5855_v33 = vpack.c.bf16 %v5851_v26, %v5847_v30 }
0x1f3b   :  { %v6387_v27 = vrot.slane %v9202_v18, %v8837_v62  ;;  %v6391_v40 = vrot.slane %v9207_v3, %v8837_v62 }
0x1f3c   :  { %v5854_v55 = vpack.c.bf16 %v5850_v16, %v5846_v60  ;;  %v5856_v1 = vpack.c.bf16 %v5852_v46, %v5848_v51 }
0x1f3e   :  { %6282 = vmatprep.mubr.bf16.mxu1 %v5854_v55  ;;  %6325 = vmatprep.mubr.bf16.mxu0 %v5856_v1 }
0x1f3f   :  { %6283 = vmatmul.mubr.bf16.vlgmr.msra.gmra.mxu1 %v5853_v29  ;;  %6326 = vmatmul.mubr.bf16.vlgmr.msra.gmra.mxu0 %v5855_v33 }
0x1fff   :  { %v6284_v58 = vpop.f32.mrf.mxu1  ;;  %v6327_v12 = vpop.f32.mrf.mxu0 }
0x2000   :  { %v6285_v0 = vadd.f32 %v6284_v58, %v5925_v41 }
0x2001   :  { %v6286_v47 = vpop.f32.mrf.mxu1  ;;  %v6329_v56 = vpop.f32.mrf.mxu0 }
0x2002   :  { %v6328_v63 = vadd.f32 %v6327_v12, %v6285_v0  ;;  %v6287_v8 = vadd.f32 %v6286_v47, %v5929_v38 }
0x2003   :  { %v6288_v45 = vpop.f32.mrf.mxu1  ;;  %v6331_v61 = vpop.f32.mrf.mxu0 }
0x2004   :  { %v6330_v6 = vadd.f32 %v6329_v56, %v6287_v8  ;;  %v6289_v31 = vadd.f32 %v6288_v45, %v5925_v41  ;;  %v6336_v2 = vadd.f32 %v6328_v63, %v9265_v19 }
0x2005   :  { %v6290_v7 = vpop.f32.mrf.mxu1  ;;  %v6333_v36 = vpop.f32.mrf.mxu0 }
0x2006   :  { %v6337_v37 = vadd.f32 %v6330_v6, %v9261_v53  ;;  %v6332_v32 = vadd.f32 %v6331_v61, %v6289_v31  ;;  %v6291_v54 = vadd.f32 %v6290_v7, %v5929_v38 }
0x2008   :  { %v6334_v9 = vadd.f32 %v6333_v36, %v6291_v54  ;;  %v6340_v4 = vadd.f32 %v6337_v37, %v6336_v2  ;;  %v6338_v15 = vadd.f32 %v6332_v32, %v9267_v14 }
0x200a   :  { %v6339_v11 = vadd.f32 %v6334_v9, %v9263_v48  ;;  %6341 = vadd.xlane.f32.xlu0 %v6340_v4 }
0x200c   :  { %v6343_v5 = vadd.f32 %v6339_v11, %v6338_v15 }
0x200e   :  { %6344 = vadd.xlane.f32.xlu1 %v6343_v5 }
0x2093   :  { %v6342_v13 = vpop.xlane.xlu0 %6341 }
0x2094   :  { %v6346_v34 = vmul.f32 0.00390625, %v6342_v13 }
0x2096   :  { %v6348_v52 = vsub.f32 %v6336_v2, %v6346_v34  ;;  %v6349_v22 = vsub.f32 %v6337_v37, %v6346_v34 }
0x2097   :  { %v6345_v10 = vpop.xlane.xlu1 %6344 }
0x2098   :  { %v6352_v19 = vmul.f32 %v6348_v52, %v6348_v52  ;;  %v6353_v35 = vmul.f32 %v6349_v22, %v6349_v22  ;;  %v6347_v53 = vmul.f32 0.00390625, %v6345_v10 }
0x209a   :  { %v6350_v24 = vsub.f32 %v6338_v15, %v6347_v53  ;;  %v6351_v21 = vsub.f32 %v6339_v11, %v6347_v53  ;;  %v6356_v50 = vadd.f32 %v6353_v35, %v6352_v19 }
0x209c   :  { %v6354_v28 = vmul.f32 %v6350_v24, %v6350_v24  ;;  %v6355_v20 = vmul.f32 %v6351_v21, %v6351_v21  ;;  %6357 = vadd.xlane.f32.xlu0 %v6356_v50 }
0x209e   :  { %v6359_v14 = vadd.f32 %v6355_v20, %v6354_v28 }
0x20a0   :  { %6360 = vadd.xlane.f32.xlu1 %v6359_v14 }
0x2125   :  { %v6358_v48 = vpop.xlane.xlu0 %6357 }
0x2126   :  { %v6362_v39 = vmul.f32 0.00390625, %v6358_v48 }
0x2128   :  { %v6364_v57 = vadd.f32 1e-05, %v6362_v39 }
0x2129   :  { %v6361_v49 = vpop.xlane.xlu1 %6360 }
0x212a   :  { %8195 = vrsqrt.f32 %v6364_v57  ;;  %v6363_v43 = vmul.f32 0.00390625, %v6361_v49 }
0x212c   :  { %v6365_v23 = vadd.f32 1e-05, %v6363_v43 }
0x212e   :  { %8197 = vrsqrt.f32 %v6365_v23 }
0x2137   :  { %v8196_v42 = vpop.eup %8195 }
0x2138   :  { %v6368_v26 = vmul.f32 %v8196_v42, %v6348_v52  ;;  %v6369_v60 = vmul.f32 %v8196_v42, %v6349_v22 }
0x213a   :  { %v6380_v51 = vmul.f32 %v6375_v44, %v6368_v26  ;;  %v6381_v16 = vmul.f32 %v6379_v25, %v6369_v60 }
0x213b   :  { %v8198_v46 = vpop.eup %8197 }
0x213c   :  { %v6392_v17 = vadd.f32 %v6387_v27, %v6380_v51  ;;  %v6393_v30 = vadd.f32 %v6391_v40, %v6381_v16  ;;  %v6370_v55 = vmul.f32 %v8198_v46, %v6350_v24  ;;  %v6371_v1 = vmul.f32 %v8198_v46, %v6351_v21 }
0x213e   :  { %6396 = vst [vmem:[%s9320_s7] sm:$0xff] %v6392_v17  ;;  %6397 = vst [vmem:[%s9320_s7 + $0x8] sm:$0xff] %v6393_v30  ;;  %v6382_v59 = vmul.f32 %v6375_v44, %v6370_v55  ;;  %v6383_v18 = vmul.f32 %v6379_v25, %v6371_v1 }
0x2140   :  { %v6394_v62 = vadd.f32 %v6387_v27, %v6382_v59  ;;  %v6395_v3 = vadd.f32 %v6391_v40, %v6383_v18 }
0x2142   :  { %6398 = vst [vmem:[%s9320_s7 + $0x10] sm:$0xff] %v6394_v62  ;;  %6399 = vst [vmem:[%s9320_s7 + $0x18] sm:$0xff] %v6395_v3 }
0x2143   :  { %6404 = vsyncpa [#allocation3], 1 }
0x2144   :  { %6405 = vsyncpa [#allocation5], 1 }
0x2145   :  { %6406 = vsyncpa [#allocation8], 1 }

</bundles_post_ra>
